<compile_context>
chip_gen: v5e
topology: v5e:2x2
jax: 0.10.0
libtpu: 0.0.40
codegen_flags: <defaults>
</compile_context>

<pallas_src>
import functools

import jax
import jax.numpy as jnp
from jax import lax
from jax.experimental import pallas as pl
from jax.experimental.pallas import tpu as pltpu

SOS_TOKEN = 0
MAX_LENGTH = 6
LANE = 128


def _round_up(x, m):
    return ((x + m - 1) // m) * m


# ----------------------------------------------------------------------------
# Fused decoder kernel: all MAX_LENGTH steps in one launch.
# ----------------------------------------------------------------------------
def _fused_decoder_kernel(
    # scalar control / teacher targets (SMEM)
    flag_ref,                        # (1,) int32: 1 -> teacher forcing, 0 -> greedy
    tgt_ref,                         # [T, B] int32 teacher targets (zeros when greedy)
    # activations / fused weights (VMEM)
    h0_ref,                          # [B, H]   initial hidden
    enc_ref,                         # [B, S, H] encoder outputs (keys / values)
    ua_ref, ub_ref,                  # [H, H], [1, H]   key projection Ua, bias
    va_ref,                          # [1, H]           Va row (bias dropped: cancels in softmax)
    w_in_ref, bi3_ref,               # [Vp+H, 3H] = [[emb_tab@Wie3],[Wic3]],  [1, 3H]
    w_ho_ref, b_ho_ref,              # [H, Vp+4H] = [Wout | Wa | Whr | Whz | Whn], [1, Vp+4H]
    # outputs
    logp_ref,                        # [B, T, Vp] log-probs (padded vocab, lane-dense)
    hfin_ref,                        # [B, H]     final hidden
    attn_ref,                        # [B, T, Sp] attention weights (padded S, lane-dense)
    # scratch
    next_in_ref,                     # [B, Vp]    next-input one-hot (written under pl.when)
):
    B, S, H = enc_ref.shape
    T = logp_ref.shape[1]
    Vp = logp_ref.shape[2]
    Sp = attn_ref.shape[2]

    # ---- hoisted loads: every weight / bias read from VMEM exactly once ----
    enc = enc_ref[...]                                        # [B, S, H]
    ua = ua_ref[...]
    ub = ub_ref[...]
    va_b = va_ref[...][None, :, :]                            # [1, 1, H]
    w_in = w_in_ref[...]                                      # [Vp+H, 3H]
    bi3 = bi3_ref[...]                                        # [1, 3H]
    w_ho = w_ho_ref[...]                                      # [H, Vp+4H]
    b_ho = b_ho_ref[...]                                      # [1, Vp+4H]

    use_teacher = flag_ref[0] != 0

    iota_v = lax.broadcasted_iota(jnp.int32, (B, Vp), 1)
    iota_f = iota_v.astype(jnp.float32)
    row_id = lax.broadcasted_iota(jnp.int32, (B, Vp), 0)
    if Sp > S:
        attn_zpad = jnp.zeros((B, Sp - S), jnp.float32)

    # ---- prologue: loop-invariant key projection Ua(keys) + ub (computed once) ----
    k_proj = jnp.stack(
        [jnp.dot(enc[b], ua, preferred_element_type=jnp.float32) + ub for b in range(B)],
        axis=0)                                               # [B, S, H]

    h = h0_ref[...]                                           # [B, H]
    # fused [Wout | Wa | Whr | Whz | Whn] projection of the initial hidden (step-0 gates)
    hh = jnp.dot(h, w_ho, preferred_element_type=jnp.float32) + b_ho      # [B, Vp+4H]
    onehot_in = (iota_v == SOS_TOKEN).astype(jnp.float32)                 # [B, Vp]  (SOS)

    # T is a static Python constant -> fully unrolled, all stores static-indexed.
    for t in range(T):
        # slices of h_{t-1} @ [Wout|Wa|Whr|Whz|Whn] (the Wout part of step 0 is unused)
        q_proj = hh[:, Vp:Vp + H]
        gh_r = hh[:, Vp + H:Vp + 2 * H]
        gh_z = hh[:, Vp + 2 * H:Vp + 3 * H]
        gh_n = hh[:, Vp + 3 * H:Vp + 4 * H]

        # ---- Bahdanau attention (Va bias dropped: constant offset cancels in softmax) ----
        tact = jnp.tanh(q_proj[:, None, :] + k_proj)          # [B, S, H]
        scores = jnp.sum(tact * va_b, axis=-1)                # [B, S]  (lane reduce)
        scores = scores - jnp.max(scores, axis=-1, keepdims=True)
        ex = jnp.exp(scores)
        attn = ex / jnp.sum(ex, axis=-1, keepdims=True)       # [B, S]
        context = jnp.sum(attn[:, :, None] * enc, axis=1)     # [B, H]

        # ---- GRU input-side: ONE fused matmul [onehot | ctx] @ [[emb_w3],[Wic3]] ----
        xin = jnp.concatenate([onehot_in, context], axis=-1)  # [B, Vp+H]
        gi = jnp.dot(xin, w_in, preferred_element_type=jnp.float32) + bi3  # [B, 3H]
        r = jax.nn.sigmoid(gi[:, 0:H] + gh_r)
        z = jax.nn.sigmoid(gi[:, H:2 * H] + gh_z)
        n = jnp.tanh(gi[:, 2 * H:3 * H] + r * gh_n)
        h = (1.0 - z) * n + z * h                              # [B, H]

        # ---- fused output projection + NEXT step's hidden-side matmul (N = Vp+4H = 256) ----
        ho = jnp.dot(h, w_ho, preferred_element_type=jnp.float32) + b_ho   # [B, Vp+4H]
        logits = ho[:, 0:Vp]                                   # [B, Vp]
        hh = ho                                                # gates/query for step t+1

        # ---- fused log_softmax; lane-dense stores in [B, T, *] layout ----
        m = jnp.max(logits, axis=-1, keepdims=True)
        sh = logits - m
        logp = sh - jnp.log(jnp.sum(jnp.exp(sh), axis=-1, keepdims=True))
        logp_ref[:, t, :] = logp
        if Sp > S:
            attn_ref[:, t, :] = jnp.concatenate([attn, attn_zpad], axis=-1)
        else:
            attn_ref[:, t, :] = attn

        # ---- next decoder input (skipped entirely on the last step) ----
        if t + 1 < T:
            @pl.when(use_teacher)
            def _teacher():
                teach = jnp.zeros((B, Vp), jnp.float32)
                for b in range(B):
                    tid = tgt_ref[t, b]                        # SMEM scalar read
                    teach = jnp.where(row_id == b,
                                      (iota_v == tid).astype(jnp.float32), teach)
                next_in_ref[...] = teach

            @pl.when(jnp.logical_not(use_teacher))
            def _greedy():
                # first max, like torch.topk; argmax stays on the f32 logits
                cand = jnp.where(logits == m, iota_f, float(Vp))
                first_max = jnp.min(cand, axis=-1, keepdims=True)
                next_in_ref[...] = (iota_f == first_max).astype(jnp.float32)

            onehot_in = next_in_ref[...]

    hfin_ref[...] = h


# ----------------------------------------------------------------------------
# Wrapper
# ----------------------------------------------------------------------------
_VMEM = pl.BlockSpec(memory_space=pltpu.MemorySpace.VMEM)
_SMEM = pl.BlockSpec(memory_space=pltpu.MemorySpace.SMEM)


def _prepare_fused(params, V):
    """Fuse / pre-pad parameter matrices for the kernel (cheap one-time XLA ops)."""
    H = params["wa"].shape[0]
    Vp = _round_up(V, LANE)
    hi = jax.lax.Precision.HIGHEST

    emb_tab = jnp.zeros((Vp, H), jnp.float32).at[:V].set(params["embedding"])
    wie3 = jnp.concatenate([params["wir_e"], params["wiz_e"], params["win_e"]], axis=1)
    wic3 = jnp.concatenate([params["wir_c"], params["wiz_c"], params["win_c"]], axis=1)
    emb_w3 = jnp.dot(emb_tab, wie3, precision=hi)              # [Vp, 3H] embedding folded
    w_in = jnp.concatenate([emb_w3, wic3], axis=0)             # [Vp+H, 3H]
    bi3 = jnp.concatenate([params["bir"], params["biz"], params["bin"]], axis=1)

    wout_p = jnp.zeros((H, Vp), jnp.float32).at[:, :V].set(params["w_out"])
    bout_p = jnp.full((1, Vp), -1e30, jnp.float32).at[:, :V].set(params["b_out"])
    wh4 = jnp.concatenate(
        [params["wa"], params["whr"], params["whz"], params["whn"]], axis=1)
    bh4 = jnp.concatenate(
        [params["ba"], params["bhr"], params["bhz"], params["bhn"]], axis=1)
    w_ho = jnp.concatenate([wout_p, wh4], axis=1)              # [H, Vp+4H]
    b_ho = jnp.concatenate([bout_p, bh4], axis=1)              # [1, Vp+4H]

    return dict(ua=params["ua"], ub=params["ub"], va=jnp.transpose(params["va"]),
                w_in=w_in, bi3=bi3, w_ho=w_ho, b_ho=b_ho)


def attn_decoder_forward(params, encoder_outputs, encoder_hidden, target_tensor=None):
    """Mirrors AttnDecoderRNN.forward (eval mode; greedy decode when target is None)."""
    B, S, H = encoder_outputs.shape
    V = params["w_out"].shape[1]
    Vp = _round_up(V, LANE)
    Sp = _round_up(S, LANE)
    T = MAX_LENGTH
    fused = _prepare_fused(params, V)
    h0 = encoder_hidden[0]                                     # [B, H]

    if target_tensor is not None:
        assert target_tensor.shape[1] >= T, "target_tensor must have >= MAX_LENGTH columns"
        flag = jnp.ones((1,), jnp.int32)
        tgt = jnp.transpose(target_tensor[:, :T].astype(jnp.int32), (1, 0))   # [T, B]
    else:
        flag = jnp.zeros((1,), jnp.int32)
        tgt = jnp.zeros((T, B), jnp.int32)

    out_shape = (
        jax.ShapeDtypeStruct((B, T, Vp), jnp.float32),         # log-probs (padded vocab)
        jax.ShapeDtypeStruct((B, H), jnp.float32),             # final hidden
        jax.ShapeDtypeStruct((B, T, Sp), jnp.float32),         # attention (padded S)
    )
    inputs = (flag, tgt,
              h0.astype(jnp.float32), encoder_outputs.astype(jnp.float32),
              fused["ua"], fused["ub"], fused["va"],
              fused["w_in"], fused["bi3"], fused["w_ho"], fused["b_ho"])
    in_specs = [_SMEM, _SMEM] + [_VMEM] * (len(inputs) - 2)

    logp, hfin, attn = pl.pallas_call(
        _fused_decoder_kernel,
        out_shape=out_shape,
        in_specs=in_specs,
        out_specs=(_VMEM, _VMEM, _VMEM),
        scratch_shapes=[pltpu.VMEM((B, Vp), jnp.float32)],
    )(*inputs)

    decoder_outputs = logp[:, :, :V]                           # [B, T, V]
    attentions = attn[:, :, :S]                                # [B, T, S]
    decoder_hidden = hfin[None]                                # [1, B, H]
    return decoder_outputs, decoder_hidden, attentions


# ----------------------------------------------------------------------------
# Pure-JAX reference (for correctness check under teacher forcing)
# ----------------------------------------------------------------------------
def reference_forward(params, encoder_outputs, encoder_hidden, target_tensor=None):
    B, S, H = encoder_outputs.shape
    h = encoder_hidden[0]
    dec_in = jnp.full((B,), SOS_TOKEN, jnp.int32)
    k_proj = jnp.einsum("bsh,hk->bsk", encoder_outputs, params["ua"]) + params["ub"]
    outs, attns = [], []
    for i in range(MAX_LENGTH):
        emb = params["embedding"][dec_in]
        q = h @ params["wa"] + params["ba"]
        tact = jnp.tanh(q[:, None, :] + k_proj)
        scores = jnp.squeeze(jnp.einsum("bsh,ho->bso", tact, params["va"]), -1) + params["vb"][0, 0]
        attn = jax.nn.softmax(scores, axis=-1)
        ctx = jnp.einsum("bs,bsh->bh", attn, encoder_outputs)
        gi_r = emb @ params["wir_e"] + ctx @ params["wir_c"] + params["bir"]
        gi_z = emb @ params["wiz_e"] + ctx @ params["wiz_c"] + params["biz"]
        gi_n = emb @ params["win_e"] + ctx @ params["win_c"] + params["bin"]
        gh_r = h @ params["whr"] + params["bhr"]
        gh_z = h @ params["whz"] + params["bhz"]
        gh_n = h @ params["whn"] + params["bhn"]
        r = jax.nn.sigmoid(gi_r + gh_r)
        z = jax.nn.sigmoid(gi_z + gh_z)
        n = jnp.tanh(gi_n + r * gh_n)
        h = (1.0 - z) * n + z * h
        logits = h @ params["w_out"] + params["b_out"]
        outs.append(logits[:, None, :])
        attns.append(attn[:, None, :])
        if target_tensor is not None:
            dec_in = target_tensor[:, i].astype(jnp.int32)
        else:
            dec_in = jnp.argmax(logits, axis=-1).astype(jnp.int32)
    logp = jax.nn.log_softmax(jnp.concatenate(outs, axis=1), axis=-1)
    return logp, h[None], jnp.concatenate(attns, axis=1)


# ----------------------------------------------------------------------------
# Deterministic parameter init (synthetic — shapes match the PyTorch module)
# ----------------------------------------------------------------------------
def init_params(key, hidden_size, output_size):
    H, V = hidden_size, output_size
    ks = jax.random.split(key, 32)
    u = lambda k, shape, scale: jax.random.uniform(k, shape, jnp.float32, -scale, scale)
    s = 1.0 / jnp.sqrt(H)
    return {
        "embedding": jax.random.normal(ks[0], (V, H), jnp.float32),
        # attention (Linear weights stored pre-transposed: [in, out])
        "wa": u(ks[1], (H, H), s), "ba": u(ks[2], (1, H), s),
        "ua": u(ks[3], (H, H), s), "ub": u(ks[4], (1, H), s),
        "va": u(ks[5], (H, 1), s), "vb": u(ks[6], (1, 1), s),
        # GRU input-side (input size 2H split into embedded / context halves)
        "wir_e": u(ks[7], (H, H), s), "wir_c": u(ks[8], (H, H), s),
        "wiz_e": u(ks[9], (H, H), s), "wiz_c": u(ks[10], (H, H), s),
        "win_e": u(ks[11], (H, H), s), "win_c": u(ks[12], (H, H), s),
        "bir": u(ks[13], (1, H), s), "biz": u(ks[14], (1, H), s), "bin": u(ks[15], (1, H), s),
        # GRU hidden-side
        "whr": u(ks[16], (H, H), s), "whz": u(ks[17], (H, H), s), "whn": u(ks[18], (H, H), s),
        "bhr": u(ks[19], (1, H), s), "bhz": u(ks[20], (1, H), s), "bhn": u(ks[21], (1, H), s),
        # output projection
        "w_out": u(ks[22], (H, V), s), "b_out": u(ks[23], (1, V), s),
    }


# ----------------------------------------------------------------------------
if __name__ == "__main__":
    B, S, H, V = 2, 8, 32, 20  # small shapes: batch=2, src seq=8, hidden=32, vocab=20

    key = jax.random.PRNGKey(0)
    k_par, k_enc, k_hid, k_tgt = jax.random.split(key, 4)
    params = init_params(k_par, H, V)

    encoder_outputs = jax.random.normal(k_enc, (B, S, H), jnp.float32)
    encoder_hidden = jax.random.normal(k_hid, (1, B, H), jnp.float32)

    fwd = jax.jit(functools.partial(attn_decoder_forward, params))

    # --- greedy decode path ---
    log_probs, dec_hidden, attentions = fwd(encoder_outputs, encoder_hidden)
    jax.block_until_ready((log_probs, dec_hidden, attentions))

    assert log_probs.shape == (B, MAX_LENGTH, V)
    assert dec_hidden.shape == (1, B, H)
    assert attentions.shape == (B, MAX_LENGTH, S)
    assert jnp.allclose(jnp.sum(jnp.exp(log_probs), axis=-1), 1.0, atol=1e-4)
    assert jnp.allclose(jnp.sum(attentions, axis=-1), 1.0, atol=1e-4)

    # --- teacher-forcing path, checked against pure-JAX reference ---
    targets = jax.random.randint(k_tgt, (B, MAX_LENGTH), 0, V, dtype=jnp.int32)
    lp_k, hid_k, at_k = fwd(encoder_outputs, encoder_hidden, targets)
    lp_r, hid_r, at_r = reference_forward(params, encoder_outputs, encoder_hidden, targets)
    jax.block_until_ready((lp_k, hid_k, at_k))

    assert jnp.allclose(lp_k, lp_r, atol=5e-3, rtol=5e-3)
    assert jnp.allclose(hid_k, hid_r, atol=5e-3, rtol=5e-3)
    assert jnp.allclose(at_k, at_r, atol=5e-3, rtol=5e-3)

    print("KERNEL_OK")
</pallas_src>

<mosaic_0001>
module attributes {stable_mosaic.version = 11 : i64} {
  func.func @_fused_decoder_kernel(%arg0: memref<1xi32, #tpu.memory_space<smem>>, %arg1: memref<6x2xi32, #tpu.memory_space<smem>>, %arg2: memref<2x32xf32, #tpu.memory_space<vmem>>, %arg3: memref<2x8x32xf32, #tpu.memory_space<vmem>>, %arg4: memref<32x32xf32, #tpu.memory_space<vmem>>, %arg5: memref<1x32xf32, #tpu.memory_space<vmem>>, %arg6: memref<1x32xf32, #tpu.memory_space<vmem>>, %arg7: memref<160x96xf32, #tpu.memory_space<vmem>>, %arg8: memref<1x96xf32, #tpu.memory_space<vmem>>, %arg9: memref<32x256xf32, #tpu.memory_space<vmem>>, %arg10: memref<1x256xf32, #tpu.memory_space<vmem>>, %arg11: memref<2x6x128xf32, #tpu.memory_space<vmem>>, %arg12: memref<2x32xf32, #tpu.memory_space<vmem>>, %arg13: memref<2x6x128xf32, #tpu.memory_space<vmem>>, %arg14: memref<2x128xf32, #tpu.memory_space<vmem>>) attributes {dimension_semantics = [], scalar_prefetch = 0 : i64, scratch_operands = 1 : i64, tpu.core_type = #tpu.core_type<tc>} {
    %c0 = arith.constant 0 : index
    %c0_0 = arith.constant 0 : index
    %c0_1 = arith.constant 0 : index
    %0 = vector.load %arg3[%c0, %c0_0, %c0_1] : memref<2x8x32xf32, #tpu.memory_space<vmem>>, vector<2x8x32xf32>
    %c0_2 = arith.constant 0 : index
    %c0_3 = arith.constant 0 : index
    %1 = vector.load %arg4[%c0_2, %c0_3] : memref<32x32xf32, #tpu.memory_space<vmem>>, vector<32x32xf32>
    %c0_4 = arith.constant 0 : index
    %c0_5 = arith.constant 0 : index
    %2 = vector.load %arg5[%c0_4, %c0_5] : memref<1x32xf32, #tpu.memory_space<vmem>>, vector<1x32xf32>
    %c0_6 = arith.constant 0 : index
    %c0_7 = arith.constant 0 : index
    %3 = vector.load %arg6[%c0_6, %c0_7] : memref<1x32xf32, #tpu.memory_space<vmem>>, vector<1x32xf32>
    %4 = vector.shape_cast %3 : vector<1x32xf32> to vector<1x1x32xf32>
    %c0_8 = arith.constant 0 : index
    %c0_9 = arith.constant 0 : index
    %5 = vector.load %arg7[%c0_8, %c0_9] : memref<160x96xf32, #tpu.memory_space<vmem>>, vector<160x96xf32>
    %c0_10 = arith.constant 0 : index
    %c0_11 = arith.constant 0 : index
    %6 = vector.load %arg8[%c0_10, %c0_11] : memref<1x96xf32, #tpu.memory_space<vmem>>, vector<1x96xf32>
    %c0_12 = arith.constant 0 : index
    %c0_13 = arith.constant 0 : index
    %7 = vector.load %arg9[%c0_12, %c0_13] : memref<32x256xf32, #tpu.memory_space<vmem>>, vector<32x256xf32>
    %c0_14 = arith.constant 0 : index
    %c0_15 = arith.constant 0 : index
    %8 = vector.load %arg10[%c0_14, %c0_15] : memref<1x256xf32, #tpu.memory_space<vmem>>, vector<1x256xf32>
    %c0_16 = arith.constant 0 : index
    %9 = memref.load %arg0[%c0_16] : memref<1xi32, #tpu.memory_space<smem>>
    %c0_i32 = arith.constant 0 : i32
    %10 = arith.cmpi ne, %9, %c0_i32 : i32
    %11 = tpu.iota {dimensions = array<i32: 1>} : vector<2x128xi32>
    %12 = arith.sitofp %11 : vector<2x128xi32> to vector<2x128xf32>
    %13 = tpu.iota {dimensions = array<i32: 0>} : vector<2x128xi32>
    %cst = arith.constant 0.000000e+00 : f32
    %14 = vector.broadcast %cst : f32 to vector<2x120xf32>
    %15 = vector.extract_strided_slice %0 {offsets = [0, 0, 0], sizes = [1, 8, 32], strides = [1, 1, 1]} : vector<2x8x32xf32> to vector<1x8x32xf32>
    %16 = vector.shape_cast %15 : vector<1x8x32xf32> to vector<8x32xf32>
    %cst_17 = arith.constant dense<0.000000e+00> : vector<8x32xf32>
    %17 = tpu.matmul %16, %1, %cst_17 {dimension_numbers = #tpu.dot_dimension_numbers<[1], [0], [0], [1], [0, 0, 1, 1], [], []>} : vector<8x32xf32>, vector<32x32xf32>, vector<8x32xf32> -> vector<8x32xf32>
    %18 = vector.broadcast %2 : vector<1x32xf32> to vector<8x32xf32>
    %19 = arith.addf %17, %18 : vector<8x32xf32>
    %20 = vector.extract_strided_slice %0 {offsets = [1, 0, 0], sizes = [1, 8, 32], strides = [1, 1, 1]} : vector<2x8x32xf32> to vector<1x8x32xf32>
    %21 = vector.shape_cast %20 : vector<1x8x32xf32> to vector<8x32xf32>
    %cst_18 = arith.constant dense<0.000000e+00> : vector<8x32xf32>
    %22 = tpu.matmul %21, %1, %cst_18 {dimension_numbers = #tpu.dot_dimension_numbers<[1], [0], [0], [1], [0, 0, 1, 1], [], []>} : vector<8x32xf32>, vector<32x32xf32>, vector<8x32xf32> -> vector<8x32xf32>
    %23 = vector.broadcast %2 : vector<1x32xf32> to vector<8x32xf32>
    %24 = arith.addf %22, %23 : vector<8x32xf32>
    %25 = vector.shape_cast %19 : vector<8x32xf32> to vector<1x8x32xf32>
    %26 = vector.shape_cast %24 : vector<8x32xf32> to vector<1x8x32xf32>
    %27 = tpu.concatenate %25, %26 in 0 : vector<1x8x32xf32>, vector<1x8x32xf32> -> vector<2x8x32xf32>
    %c0_19 = arith.constant 0 : index
    %c0_20 = arith.constant 0 : index
    %28 = vector.load %arg2[%c0_19, %c0_20] : memref<2x32xf32, #tpu.memory_space<vmem>>, vector<2x32xf32>
    %cst_21 = arith.constant dense<0.000000e+00> : vector<2x256xf32>
    %29 = tpu.matmul %28, %7, %cst_21 {dimension_numbers = #tpu.dot_dimension_numbers<[1], [0], [0], [1], [0, 0, 1, 1], [], []>} : vector<2x32xf32>, vector<32x256xf32>, vector<2x256xf32> -> vector<2x256xf32>
    %30 = vector.broadcast %8 : vector<1x256xf32> to vector<2x256xf32>
    %31 = arith.addf %29, %30 : vector<2x256xf32>
    %c0_i32_22 = arith.constant 0 : i32
    %32 = vector.broadcast %c0_i32_22 : i32 to vector<2x128xi32>
    %33 = arith.cmpi eq, %11, %32 : vector<2x128xi32>
    %34 = arith.extui %33 : vector<2x128xi1> to vector<2x128xi32>
    %35 = arith.sitofp %34 : vector<2x128xi32> to vector<2x128xf32>
    %36 = vector.extract_strided_slice %31 {offsets = [0, 128], sizes = [2, 32], strides = [1, 1]} : vector<2x256xf32> to vector<2x32xf32>
    %37 = vector.extract_strided_slice %31 {offsets = [0, 160], sizes = [2, 32], strides = [1, 1]} : vector<2x256xf32> to vector<2x32xf32>
    %38 = vector.extract_strided_slice %31 {offsets = [0, 192], sizes = [2, 32], strides = [1, 1]} : vector<2x256xf32> to vector<2x32xf32>
    %39 = vector.extract_strided_slice %31 {offsets = [0, 224], sizes = [2, 32], strides = [1, 1]} : vector<2x256xf32> to vector<2x32xf32>
    %40 = vector.shape_cast %36 : vector<2x32xf32> to vector<2x1x32xf32>
    %41 = vector.broadcast %40 : vector<2x1x32xf32> to vector<2x8x32xf32>
    %42 = arith.addf %41, %27 : vector<2x8x32xf32>
    %43 = math.tanh %42 : vector<2x8x32xf32>
    %44 = vector.broadcast %4 : vector<1x1x32xf32> to vector<2x8x32xf32>
    %45 = arith.mulf %43, %44 : vector<2x8x32xf32>
    %cst_23 = arith.constant dense<0.000000e+00> : vector<2x8xf32>
    %46 = vector.multi_reduction <add>, %45, %cst_23 [2] : vector<2x8x32xf32> to vector<2x8xf32>
    %cst_24 = arith.constant dense<0xFF800000> : vector<2xf32>
    %47 = vector.multi_reduction <maximumf>, %46, %cst_24 [1] : vector<2x8xf32> to vector<2xf32>
    %48 = vector.shape_cast %47 : vector<2xf32> to vector<2x1xf32>
    %49 = vector.broadcast %48 : vector<2x1xf32> to vector<2x8xf32>
    %50 = arith.subf %46, %49 : vector<2x8xf32>
    %51 = math.exp %50 : vector<2x8xf32>
    %cst_25 = arith.constant dense<0.000000e+00> : vector<2xf32>
    %52 = vector.multi_reduction <add>, %51, %cst_25 [1] : vector<2x8xf32> to vector<2xf32>
    %53 = vector.shape_cast %52 : vector<2xf32> to vector<2x1xf32>
    %54 = vector.broadcast %53 : vector<2x1xf32> to vector<2x8xf32>
    %55 = arith.divf %51, %54 : vector<2x8xf32>
    %56 = vector.shape_cast %55 : vector<2x8xf32> to vector<2x8x1xf32>
    %57 = vector.broadcast %56 : vector<2x8x1xf32> to vector<2x8x32xf32>
    %58 = arith.mulf %57, %0 : vector<2x8x32xf32>
    %cst_26 = arith.constant dense<0.000000e+00> : vector<2x32xf32>
    %59 = vector.multi_reduction <add>, %58, %cst_26 [1] : vector<2x8x32xf32> to vector<2x32xf32>
    %60 = tpu.concatenate %35, %59 in 1 : vector<2x128xf32>, vector<2x32xf32> -> vector<2x160xf32>
    %cst_27 = arith.constant dense<0.000000e+00> : vector<2x96xf32>
    %61 = tpu.matmul %60, %5, %cst_27 {dimension_numbers = #tpu.dot_dimension_numbers<[1], [0], [0], [1], [0, 0, 1, 1], [], []>} : vector<2x160xf32>, vector<160x96xf32>, vector<2x96xf32> -> vector<2x96xf32>
    %62 = vector.broadcast %6 : vector<1x96xf32> to vector<2x96xf32>
    %63 = arith.addf %61, %62 : vector<2x96xf32>
    %64 = vector.extract_strided_slice %63 {offsets = [0, 0], sizes = [2, 32], strides = [1, 1]} : vector<2x96xf32> to vector<2x32xf32>
    %65 = arith.addf %64, %37 : vector<2x32xf32>
    %66 = arith.negf %65 : vector<2x32xf32>
    %67 = math.exp %66 : vector<2x32xf32>
    %cst_28 = arith.constant 1.000000e+00 : f32
    %68 = vector.broadcast %cst_28 : f32 to vector<2x32xf32>
    %69 = arith.addf %68, %67 : vector<2x32xf32>
    %70 = arith.divf %68, %69 : vector<2x32xf32>
    %71 = vector.extract_strided_slice %63 {offsets = [0, 32], sizes = [2, 32], strides = [1, 1]} : vector<2x96xf32> to vector<2x32xf32>
    %72 = arith.addf %71, %38 : vector<2x32xf32>
    %73 = arith.negf %72 : vector<2x32xf32>
    %74 = math.exp %73 : vector<2x32xf32>
    %cst_29 = arith.constant 1.000000e+00 : f32
    %75 = vector.broadcast %cst_29 : f32 to vector<2x32xf32>
    %76 = arith.addf %75, %74 : vector<2x32xf32>
    %77 = arith.divf %75, %76 : vector<2x32xf32>
    %78 = vector.extract_strided_slice %63 {offsets = [0, 64], sizes = [2, 32], strides = [1, 1]} : vector<2x96xf32> to vector<2x32xf32>
    %79 = arith.mulf %70, %39 : vector<2x32xf32>
    %80 = arith.addf %78, %79 : vector<2x32xf32>
    %81 = math.tanh %80 : vector<2x32xf32>
    %cst_30 = arith.constant 1.000000e+00 : f32
    %82 = vector.broadcast %cst_30 : f32 to vector<2x32xf32>
    %83 = arith.subf %82, %77 : vector<2x32xf32>
    %84 = arith.mulf %83, %81 : vector<2x32xf32>
    %85 = arith.mulf %77, %28 : vector<2x32xf32>
    %86 = arith.addf %84, %85 : vector<2x32xf32>
    %cst_31 = arith.constant dense<0.000000e+00> : vector<2x256xf32>
    %87 = tpu.matmul %86, %7, %cst_31 {dimension_numbers = #tpu.dot_dimension_numbers<[1], [0], [0], [1], [0, 0, 1, 1], [], []>} : vector<2x32xf32>, vector<32x256xf32>, vector<2x256xf32> -> vector<2x256xf32>
    %88 = vector.broadcast %8 : vector<1x256xf32> to vector<2x256xf32>
    %89 = arith.addf %87, %88 : vector<2x256xf32>
    %90 = vector.extract_strided_slice %89 {offsets = [0, 0], sizes = [2, 128], strides = [1, 1]} : vector<2x256xf32> to vector<2x128xf32>
    %cst_32 = arith.constant dense<0xFF800000> : vector<2xf32>
    %91 = vector.multi_reduction <maximumf>, %90, %cst_32 [1] : vector<2x128xf32> to vector<2xf32>
    %92 = vector.shape_cast %91 : vector<2xf32> to vector<2x1xf32>
    %93 = vector.broadcast %92 : vector<2x1xf32> to vector<2x128xf32>
    %94 = arith.subf %90, %93 : vector<2x128xf32>
    %95 = math.exp %94 : vector<2x128xf32>
    %cst_33 = arith.constant dense<0.000000e+00> : vector<2xf32>
    %96 = vector.multi_reduction <add>, %95, %cst_33 [1] : vector<2x128xf32> to vector<2xf32>
    %97 = vector.shape_cast %96 : vector<2xf32> to vector<2x1xf32>
    %98 = math.log %97 : vector<2x1xf32>
    %99 = vector.broadcast %98 : vector<2x1xf32> to vector<2x128xf32>
    %100 = arith.subf %94, %99 : vector<2x128xf32>
    %c0_34 = arith.constant 0 : index
    %c0_35 = arith.constant 0 : index
    %c0_36 = arith.constant 0 : index
    %101 = vector.load %arg11[%c0_34, %c0_35, %c0_36] : memref<2x6x128xf32, #tpu.memory_space<vmem>>, vector<2x1x128xf32>
    %102 = vector.shape_cast %101 : vector<2x1x128xf32> to vector<2x128xf32>
    %103 = vector.shape_cast %100 : vector<2x128xf32> to vector<2x1x128xf32>
    tpu.vector_store %arg11[%c0_34, %c0_35, %c0_36], %103 {strides = array<i32>} : memref<2x6x128xf32, #tpu.memory_space<vmem>>, vector<2x1x128xf32>,
    %104 = tpu.concatenate %55, %14 in 1 : vector<2x8xf32>, vector<2x120xf32> -> vector<2x128xf32>
    %c0_37 = arith.constant 0 : index
    %c0_38 = arith.constant 0 : index
    %c0_39 = arith.constant 0 : index
    %105 = vector.load %arg13[%c0_37, %c0_38, %c0_39] : memref<2x6x128xf32, #tpu.memory_space<vmem>>, vector<2x1x128xf32>
    %106 = vector.shape_cast %105 : vector<2x1x128xf32> to vector<2x128xf32>
    %107 = vector.shape_cast %104 : vector<2x128xf32> to vector<2x1x128xf32>
    tpu.vector_store %arg13[%c0_37, %c0_38, %c0_39], %107 {strides = array<i32>} : memref<2x6x128xf32, #tpu.memory_space<vmem>>, vector<2x1x128xf32>,
    %108 = arith.extui %10 : i1 to i32
    %c0_i32_40 = arith.constant 0 : i32
    %109 = arith.cmpi ne, %108, %c0_i32_40 : i32
    scf.if %109 {
      %cst_146 = arith.constant 0.000000e+00 : f32
      %499 = vector.broadcast %cst_146 : f32 to vector<2x128xf32>
      %c0_147 = arith.constant 0 : index
      %c0_148 = arith.constant 0 : index
      %500 = memref.load %arg1[%c0_147, %c0_148] : memref<6x2xi32, #tpu.memory_space<smem>>
      %c0_i32_149 = arith.constant 0 : i32
      %501 = vector.broadcast %c0_i32_149 : i32 to vector<2x128xi32>
      %502 = arith.cmpi eq, %13, %501 : vector<2x128xi32>
      %503 = vector.broadcast %500 : i32 to vector<2x128xi32>
      %504 = arith.cmpi eq, %11, %503 : vector<2x128xi32>
      %505 = arith.extui %504 : vector<2x128xi1> to vector<2x128xi32>
      %506 = arith.sitofp %505 : vector<2x128xi32> to vector<2x128xf32>
      %507 = arith.select %502, %506, %499 : vector<2x128xi1>, vector<2x128xf32>
      %c0_150 = arith.constant 0 : index
      %c1_151 = arith.constant 1 : index
      %508 = memref.load %arg1[%c0_150, %c1_151] : memref<6x2xi32, #tpu.memory_space<smem>>
      %c1_i32 = arith.constant 1 : i32
      %509 = vector.broadcast %c1_i32 : i32 to vector<2x128xi32>
      %510 = arith.cmpi eq, %13, %509 : vector<2x128xi32>
      %511 = vector.broadcast %508 : i32 to vector<2x128xi32>
      %512 = arith.cmpi eq, %11, %511 : vector<2x128xi32>
      %513 = arith.extui %512 : vector<2x128xi1> to vector<2x128xi32>
      %514 = arith.sitofp %513 : vector<2x128xi32> to vector<2x128xf32>
      %515 = arith.select %510, %514, %507 : vector<2x128xi1>, vector<2x128xf32>
      %c0_152 = arith.constant 0 : index
      %c0_153 = arith.constant 0 : index
      %516 = vector.load %arg14[%c0_152, %c0_153] : memref<2x128xf32, #tpu.memory_space<vmem>>, vector<2x128xf32>
      tpu.vector_store %arg14[%c0_152, %c0_153], %515 {strides = array<i32>} : memref<2x128xf32, #tpu.memory_space<vmem>>, vector<2x128xf32>,
    } else {
    }
    %true = arith.constant true
    %110 = arith.xori %10, %true : i1
    %111 = arith.extui %110 : i1 to i32
    %c0_i32_41 = arith.constant 0 : i32
    %112 = arith.cmpi ne, %111, %c0_i32_41 : i32
    scf.if %112 {
      %499 = vector.broadcast %92 : vector<2x1xf32> to vector<2x128xf32>
      %500 = arith.cmpf oeq, %90, %499 : vector<2x128xf32>
      %cst_146 = arith.constant 1.280000e+02 : f32
      %501 = vector.broadcast %cst_146 : f32 to vector<2x128xf32>
      %502 = arith.select %500, %12, %501 : vector<2x128xi1>, vector<2x128xf32>
      %cst_147 = arith.constant dense<0x7F800000> : vector<2xf32>
      %503 = vector.multi_reduction <minimumf>, %502, %cst_147 [1] : vector<2x128xf32> to vector<2xf32>
      %504 = vector.shape_cast %503 : vector<2xf32> to vector<2x1xf32>
      %505 = vector.broadcast %504 : vector<2x1xf32> to vector<2x128xf32>
      %506 = arith.cmpf oeq, %12, %505 : vector<2x128xf32>
      %507 = arith.extui %506 : vector<2x128xi1> to vector<2x128xi32>
      %508 = arith.sitofp %507 : vector<2x128xi32> to vector<2x128xf32>
      %c0_148 = arith.constant 0 : index
      %c0_149 = arith.constant 0 : index
      %509 = vector.load %arg14[%c0_148, %c0_149] : memref<2x128xf32, #tpu.memory_space<vmem>>, vector<2x128xf32>
      tpu.vector_store %arg14[%c0_148, %c0_149], %508 {strides = array<i32>} : memref<2x128xf32, #tpu.memory_space<vmem>>, vector<2x128xf32>,
    } else {
    }
    %c0_42 = arith.constant 0 : index
    %c0_43 = arith.constant 0 : index
    %113 = vector.load %arg14[%c0_42, %c0_43] : memref<2x128xf32, #tpu.memory_space<vmem>>, vector<2x128xf32>
    %114 = vector.extract_strided_slice %89 {offsets = [0, 128], sizes = [2, 32], strides = [1, 1]} : vector<2x256xf32> to vector<2x32xf32>
    %115 = vector.extract_strided_slice %89 {offsets = [0, 160], sizes = [2, 32], strides = [1, 1]} : vector<2x256xf32> to vector<2x32xf32>
    %116 = vector.extract_strided_slice %89 {offsets = [0, 192], sizes = [2, 32], strides = [1, 1]} : vector<2x256xf32> to vector<2x32xf32>
    %117 = vector.extract_strided_slice %89 {offsets = [0, 224], sizes = [2, 32], strides = [1, 1]} : vector<2x256xf32> to vector<2x32xf32>
    %118 = vector.shape_cast %114 : vector<2x32xf32> to vector<2x1x32xf32>
    %119 = vector.broadcast %118 : vector<2x1x32xf32> to vector<2x8x32xf32>
    %120 = arith.addf %119, %27 : vector<2x8x32xf32>
    %121 = math.tanh %120 : vector<2x8x32xf32>
    %122 = vector.broadcast %4 : vector<1x1x32xf32> to vector<2x8x32xf32>
    %123 = arith.mulf %121, %122 : vector<2x8x32xf32>
    %cst_44 = arith.constant dense<0.000000e+00> : vector<2x8xf32>
    %124 = vector.multi_reduction <add>, %123, %cst_44 [2] : vector<2x8x32xf32> to vector<2x8xf32>
    %cst_45 = arith.constant dense<0xFF800000> : vector<2xf32>
    %125 = vector.multi_reduction <maximumf>, %124, %cst_45 [1] : vector<2x8xf32> to vector<2xf32>
    %126 = vector.shape_cast %125 : vector<2xf32> to vector<2x1xf32>
    %127 = vector.broadcast %126 : vector<2x1xf32> to vector<2x8xf32>
    %128 = arith.subf %124, %127 : vector<2x8xf32>
    %129 = math.exp %128 : vector<2x8xf32>
    %cst_46 = arith.constant dense<0.000000e+00> : vector<2xf32>
    %130 = vector.multi_reduction <add>, %129, %cst_46 [1] : vector<2x8xf32> to vector<2xf32>
    %131 = vector.shape_cast %130 : vector<2xf32> to vector<2x1xf32>
    %132 = vector.broadcast %131 : vector<2x1xf32> to vector<2x8xf32>
    %133 = arith.divf %129, %132 : vector<2x8xf32>
    %134 = vector.shape_cast %133 : vector<2x8xf32> to vector<2x8x1xf32>
    %135 = vector.broadcast %134 : vector<2x8x1xf32> to vector<2x8x32xf32>
    %136 = arith.mulf %135, %0 : vector<2x8x32xf32>
    %cst_47 = arith.constant dense<0.000000e+00> : vector<2x32xf32>
    %137 = vector.multi_reduction <add>, %136, %cst_47 [1] : vector<2x8x32xf32> to vector<2x32xf32>
    %138 = tpu.concatenate %113, %137 in 1 : vector<2x128xf32>, vector<2x32xf32> -> vector<2x160xf32>
    %cst_48 = arith.constant dense<0.000000e+00> : vector<2x96xf32>
    %139 = tpu.matmul %138, %5, %cst_48 {dimension_numbers = #tpu.dot_dimension_numbers<[1], [0], [0], [1], [0, 0, 1, 1], [], []>} : vector<2x160xf32>, vector<160x96xf32>, vector<2x96xf32> -> vector<2x96xf32>
    %140 = vector.broadcast %6 : vector<1x96xf32> to vector<2x96xf32>
    %141 = arith.addf %139, %140 : vector<2x96xf32>
    %142 = vector.extract_strided_slice %141 {offsets = [0, 0], sizes = [2, 32], strides = [1, 1]} : vector<2x96xf32> to vector<2x32xf32>
    %143 = arith.addf %142, %115 : vector<2x32xf32>
    %144 = arith.negf %143 : vector<2x32xf32>
    %145 = math.exp %144 : vector<2x32xf32>
    %cst_49 = arith.constant 1.000000e+00 : f32
    %146 = vector.broadcast %cst_49 : f32 to vector<2x32xf32>
    %147 = arith.addf %146, %145 : vector<2x32xf32>
    %148 = arith.divf %146, %147 : vector<2x32xf32>
    %149 = vector.extract_strided_slice %141 {offsets = [0, 32], sizes = [2, 32], strides = [1, 1]} : vector<2x96xf32> to vector<2x32xf32>
    %150 = arith.addf %149, %116 : vector<2x32xf32>
    %151 = arith.negf %150 : vector<2x32xf32>
    %152 = math.exp %151 : vector<2x32xf32>
    %cst_50 = arith.constant 1.000000e+00 : f32
    %153 = vector.broadcast %cst_50 : f32 to vector<2x32xf32>
    %154 = arith.addf %153, %152 : vector<2x32xf32>
    %155 = arith.divf %153, %154 : vector<2x32xf32>
    %156 = vector.extract_strided_slice %141 {offsets = [0, 64], sizes = [2, 32], strides = [1, 1]} : vector<2x96xf32> to vector<2x32xf32>
    %157 = arith.mulf %148, %117 : vector<2x32xf32>
    %158 = arith.addf %156, %157 : vector<2x32xf32>
    %159 = math.tanh %158 : vector<2x32xf32>
    %cst_51 = arith.constant 1.000000e+00 : f32
    %160 = vector.broadcast %cst_51 : f32 to vector<2x32xf32>
    %161 = arith.subf %160, %155 : vector<2x32xf32>
    %162 = arith.mulf %161, %159 : vector<2x32xf32>
    %163 = arith.mulf %155, %86 : vector<2x32xf32>
    %164 = arith.addf %162, %163 : vector<2x32xf32>
    %cst_52 = arith.constant dense<0.000000e+00> : vector<2x256xf32>
    %165 = tpu.matmul %164, %7, %cst_52 {dimension_numbers = #tpu.dot_dimension_numbers<[1], [0], [0], [1], [0, 0, 1, 1], [], []>} : vector<2x32xf32>, vector<32x256xf32>, vector<2x256xf32> -> vector<2x256xf32>
    %166 = vector.broadcast %8 : vector<1x256xf32> to vector<2x256xf32>
    %167 = arith.addf %165, %166 : vector<2x256xf32>
    %168 = vector.extract_strided_slice %167 {offsets = [0, 0], sizes = [2, 128], strides = [1, 1]} : vector<2x256xf32> to vector<2x128xf32>
    %cst_53 = arith.constant dense<0xFF800000> : vector<2xf32>
    %169 = vector.multi_reduction <maximumf>, %168, %cst_53 [1] : vector<2x128xf32> to vector<2xf32>
    %170 = vector.shape_cast %169 : vector<2xf32> to vector<2x1xf32>
    %171 = vector.broadcast %170 : vector<2x1xf32> to vector<2x128xf32>
    %172 = arith.subf %168, %171 : vector<2x128xf32>
    %173 = math.exp %172 : vector<2x128xf32>
    %cst_54 = arith.constant dense<0.000000e+00> : vector<2xf32>
    %174 = vector.multi_reduction <add>, %173, %cst_54 [1] : vector<2x128xf32> to vector<2xf32>
    %175 = vector.shape_cast %174 : vector<2xf32> to vector<2x1xf32>
    %176 = math.log %175 : vector<2x1xf32>
    %177 = vector.broadcast %176 : vector<2x1xf32> to vector<2x128xf32>
    %178 = arith.subf %172, %177 : vector<2x128xf32>
    %c0_55 = arith.constant 0 : index
    %c1 = arith.constant 1 : index
    %c0_56 = arith.constant 0 : index
    %179 = vector.load %arg11[%c0_55, %c1, %c0_56] : memref<2x6x128xf32, #tpu.memory_space<vmem>>, vector<2x1x128xf32>
    %180 = vector.shape_cast %179 : vector<2x1x128xf32> to vector<2x128xf32>
    %181 = vector.shape_cast %178 : vector<2x128xf32> to vector<2x1x128xf32>
    tpu.vector_store %arg11[%c0_55, %c1, %c0_56], %181 {strides = array<i32>} : memref<2x6x128xf32, #tpu.memory_space<vmem>>, vector<2x1x128xf32>,
    %182 = tpu.concatenate %133, %14 in 1 : vector<2x8xf32>, vector<2x120xf32> -> vector<2x128xf32>
    %c0_57 = arith.constant 0 : index
    %c1_58 = arith.constant 1 : index
    %c0_59 = arith.constant 0 : index
    %183 = vector.load %arg13[%c0_57, %c1_58, %c0_59] : memref<2x6x128xf32, #tpu.memory_space<vmem>>, vector<2x1x128xf32>
    %184 = vector.shape_cast %183 : vector<2x1x128xf32> to vector<2x128xf32>
    %185 = vector.shape_cast %182 : vector<2x128xf32> to vector<2x1x128xf32>
    tpu.vector_store %arg13[%c0_57, %c1_58, %c0_59], %185 {strides = array<i32>} : memref<2x6x128xf32, #tpu.memory_space<vmem>>, vector<2x1x128xf32>,
    %186 = arith.extui %10 : i1 to i32
    %c0_i32_60 = arith.constant 0 : i32
    %187 = arith.cmpi ne, %186, %c0_i32_60 : i32
    scf.if %187 {
      %cst_146 = arith.constant 0.000000e+00 : f32
      %499 = vector.broadcast %cst_146 : f32 to vector<2x128xf32>
      %c1_147 = arith.constant 1 : index
      %c0_148 = arith.constant 0 : index
      %500 = memref.load %arg1[%c1_147, %c0_148] : memref<6x2xi32, #tpu.memory_space<smem>>
      %c0_i32_149 = arith.constant 0 : i32
      %501 = vector.broadcast %c0_i32_149 : i32 to vector<2x128xi32>
      %502 = arith.cmpi eq, %13, %501 : vector<2x128xi32>
      %503 = vector.broadcast %500 : i32 to vector<2x128xi32>
      %504 = arith.cmpi eq, %11, %503 : vector<2x128xi32>
      %505 = arith.extui %504 : vector<2x128xi1> to vector<2x128xi32>
      %506 = arith.sitofp %505 : vector<2x128xi32> to vector<2x128xf32>
      %507 = arith.select %502, %506, %499 : vector<2x128xi1>, vector<2x128xf32>
      %c1_150 = arith.constant 1 : index
      %c1_151 = arith.constant 1 : index
      %508 = memref.load %arg1[%c1_150, %c1_151] : memref<6x2xi32, #tpu.memory_space<smem>>
      %c1_i32 = arith.constant 1 : i32
      %509 = vector.broadcast %c1_i32 : i32 to vector<2x128xi32>
      %510 = arith.cmpi eq, %13, %509 : vector<2x128xi32>
      %511 = vector.broadcast %508 : i32 to vector<2x128xi32>
      %512 = arith.cmpi eq, %11, %511 : vector<2x128xi32>
      %513 = arith.extui %512 : vector<2x128xi1> to vector<2x128xi32>
      %514 = arith.sitofp %513 : vector<2x128xi32> to vector<2x128xf32>
      %515 = arith.select %510, %514, %507 : vector<2x128xi1>, vector<2x128xf32>
      %c0_152 = arith.constant 0 : index
      %c0_153 = arith.constant 0 : index
      %516 = vector.load %arg14[%c0_152, %c0_153] : memref<2x128xf32, #tpu.memory_space<vmem>>, vector<2x128xf32>
      tpu.vector_store %arg14[%c0_152, %c0_153], %515 {strides = array<i32>} : memref<2x128xf32, #tpu.memory_space<vmem>>, vector<2x128xf32>,
    } else {
    }
    %true_61 = arith.constant true
    %188 = arith.xori %10, %true_61 : i1
    %189 = arith.extui %188 : i1 to i32
    %c0_i32_62 = arith.constant 0 : i32
    %190 = arith.cmpi ne, %189, %c0_i32_62 : i32
    scf.if %190 {
      %499 = vector.broadcast %170 : vector<2x1xf32> to vector<2x128xf32>
      %500 = arith.cmpf oeq, %168, %499 : vector<2x128xf32>
      %cst_146 = arith.constant 1.280000e+02 : f32
      %501 = vector.broadcast %cst_146 : f32 to vector<2x128xf32>
      %502 = arith.select %500, %12, %501 : vector<2x128xi1>, vector<2x128xf32>
      %cst_147 = arith.constant dense<0x7F800000> : vector<2xf32>
      %503 = vector.multi_reduction <minimumf>, %502, %cst_147 [1] : vector<2x128xf32> to vector<2xf32>
      %504 = vector.shape_cast %503 : vector<2xf32> to vector<2x1xf32>
      %505 = vector.broadcast %504 : vector<2x1xf32> to vector<2x128xf32>
      %506 = arith.cmpf oeq, %12, %505 : vector<2x128xf32>
      %507 = arith.extui %506 : vector<2x128xi1> to vector<2x128xi32>
      %508 = arith.sitofp %507 : vector<2x128xi32> to vector<2x128xf32>
      %c0_148 = arith.constant 0 : index
      %c0_149 = arith.constant 0 : index
      %509 = vector.load %arg14[%c0_148, %c0_149] : memref<2x128xf32, #tpu.memory_space<vmem>>, vector<2x128xf32>
      tpu.vector_store %arg14[%c0_148, %c0_149], %508 {strides = array<i32>} : memref<2x128xf32, #tpu.memory_space<vmem>>, vector<2x128xf32>,
    } else {
    }
    %c0_63 = arith.constant 0 : index
    %c0_64 = arith.constant 0 : index
    %191 = vector.load %arg14[%c0_63, %c0_64] : memref<2x128xf32, #tpu.memory_space<vmem>>, vector<2x128xf32>
    %192 = vector.extract_strided_slice %167 {offsets = [0, 128], sizes = [2, 32], strides = [1, 1]} : vector<2x256xf32> to vector<2x32xf32>
    %193 = vector.extract_strided_slice %167 {offsets = [0, 160], sizes = [2, 32], strides = [1, 1]} : vector<2x256xf32> to vector<2x32xf32>
    %194 = vector.extract_strided_slice %167 {offsets = [0, 192], sizes = [2, 32], strides = [1, 1]} : vector<2x256xf32> to vector<2x32xf32>
    %195 = vector.extract_strided_slice %167 {offsets = [0, 224], sizes = [2, 32], strides = [1, 1]} : vector<2x256xf32> to vector<2x32xf32>
    %196 = vector.shape_cast %192 : vector<2x32xf32> to vector<2x1x32xf32>
    %197 = vector.broadcast %196 : vector<2x1x32xf32> to vector<2x8x32xf32>
    %198 = arith.addf %197, %27 : vector<2x8x32xf32>
    %199 = math.tanh %198 : vector<2x8x32xf32>
    %200 = vector.broadcast %4 : vector<1x1x32xf32> to vector<2x8x32xf32>
    %201 = arith.mulf %199, %200 : vector<2x8x32xf32>
    %cst_65 = arith.constant dense<0.000000e+00> : vector<2x8xf32>
    %202 = vector.multi_reduction <add>, %201, %cst_65 [2] : vector<2x8x32xf32> to vector<2x8xf32>
    %cst_66 = arith.constant dense<0xFF800000> : vector<2xf32>
    %203 = vector.multi_reduction <maximumf>, %202, %cst_66 [1] : vector<2x8xf32> to vector<2xf32>
    %204 = vector.shape_cast %203 : vector<2xf32> to vector<2x1xf32>
    %205 = vector.broadcast %204 : vector<2x1xf32> to vector<2x8xf32>
    %206 = arith.subf %202, %205 : vector<2x8xf32>
    %207 = math.exp %206 : vector<2x8xf32>
    %cst_67 = arith.constant dense<0.000000e+00> : vector<2xf32>
    %208 = vector.multi_reduction <add>, %207, %cst_67 [1] : vector<2x8xf32> to vector<2xf32>
    %209 = vector.shape_cast %208 : vector<2xf32> to vector<2x1xf32>
    %210 = vector.broadcast %209 : vector<2x1xf32> to vector<2x8xf32>
    %211 = arith.divf %207, %210 : vector<2x8xf32>
    %212 = vector.shape_cast %211 : vector<2x8xf32> to vector<2x8x1xf32>
    %213 = vector.broadcast %212 : vector<2x8x1xf32> to vector<2x8x32xf32>
    %214 = arith.mulf %213, %0 : vector<2x8x32xf32>
    %cst_68 = arith.constant dense<0.000000e+00> : vector<2x32xf32>
    %215 = vector.multi_reduction <add>, %214, %cst_68 [1] : vector<2x8x32xf32> to vector<2x32xf32>
    %216 = tpu.concatenate %191, %215 in 1 : vector<2x128xf32>, vector<2x32xf32> -> vector<2x160xf32>
    %cst_69 = arith.constant dense<0.000000e+00> : vector<2x96xf32>
    %217 = tpu.matmul %216, %5, %cst_69 {dimension_numbers = #tpu.dot_dimension_numbers<[1], [0], [0], [1], [0, 0, 1, 1], [], []>} : vector<2x160xf32>, vector<160x96xf32>, vector<2x96xf32> -> vector<2x96xf32>
    %218 = vector.broadcast %6 : vector<1x96xf32> to vector<2x96xf32>
    %219 = arith.addf %217, %218 : vector<2x96xf32>
    %220 = vector.extract_strided_slice %219 {offsets = [0, 0], sizes = [2, 32], strides = [1, 1]} : vector<2x96xf32> to vector<2x32xf32>
    %221 = arith.addf %220, %193 : vector<2x32xf32>
    %222 = arith.negf %221 : vector<2x32xf32>
    %223 = math.exp %222 : vector<2x32xf32>
    %cst_70 = arith.constant 1.000000e+00 : f32
    %224 = vector.broadcast %cst_70 : f32 to vector<2x32xf32>
    %225 = arith.addf %224, %223 : vector<2x32xf32>
    %226 = arith.divf %224, %225 : vector<2x32xf32>
    %227 = vector.extract_strided_slice %219 {offsets = [0, 32], sizes = [2, 32], strides = [1, 1]} : vector<2x96xf32> to vector<2x32xf32>
    %228 = arith.addf %227, %194 : vector<2x32xf32>
    %229 = arith.negf %228 : vector<2x32xf32>
    %230 = math.exp %229 : vector<2x32xf32>
    %cst_71 = arith.constant 1.000000e+00 : f32
    %231 = vector.broadcast %cst_71 : f32 to vector<2x32xf32>
    %232 = arith.addf %231, %230 : vector<2x32xf32>
    %233 = arith.divf %231, %232 : vector<2x32xf32>
    %234 = vector.extract_strided_slice %219 {offsets = [0, 64], sizes = [2, 32], strides = [1, 1]} : vector<2x96xf32> to vector<2x32xf32>
    %235 = arith.mulf %226, %195 : vector<2x32xf32>
    %236 = arith.addf %234, %235 : vector<2x32xf32>
    %237 = math.tanh %236 : vector<2x32xf32>
    %cst_72 = arith.constant 1.000000e+00 : f32
    %238 = vector.broadcast %cst_72 : f32 to vector<2x32xf32>
    %239 = arith.subf %238, %233 : vector<2x32xf32>
    %240 = arith.mulf %239, %237 : vector<2x32xf32>
    %241 = arith.mulf %233, %164 : vector<2x32xf32>
    %242 = arith.addf %240, %241 : vector<2x32xf32>
    %cst_73 = arith.constant dense<0.000000e+00> : vector<2x256xf32>
    %243 = tpu.matmul %242, %7, %cst_73 {dimension_numbers = #tpu.dot_dimension_numbers<[1], [0], [0], [1], [0, 0, 1, 1], [], []>} : vector<2x32xf32>, vector<32x256xf32>, vector<2x256xf32> -> vector<2x256xf32>
    %244 = vector.broadcast %8 : vector<1x256xf32> to vector<2x256xf32>
    %245 = arith.addf %243, %244 : vector<2x256xf32>
    %246 = vector.extract_strided_slice %245 {offsets = [0, 0], sizes = [2, 128], strides = [1, 1]} : vector<2x256xf32> to vector<2x128xf32>
    %cst_74 = arith.constant dense<0xFF800000> : vector<2xf32>
    %247 = vector.multi_reduction <maximumf>, %246, %cst_74 [1] : vector<2x128xf32> to vector<2xf32>
    %248 = vector.shape_cast %247 : vector<2xf32> to vector<2x1xf32>
    %249 = vector.broadcast %248 : vector<2x1xf32> to vector<2x128xf32>
    %250 = arith.subf %246, %249 : vector<2x128xf32>
    %251 = math.exp %250 : vector<2x128xf32>
    %cst_75 = arith.constant dense<0.000000e+00> : vector<2xf32>
    %252 = vector.multi_reduction <add>, %251, %cst_75 [1] : vector<2x128xf32> to vector<2xf32>
    %253 = vector.shape_cast %252 : vector<2xf32> to vector<2x1xf32>
    %254 = math.log %253 : vector<2x1xf32>
    %255 = vector.broadcast %254 : vector<2x1xf32> to vector<2x128xf32>
    %256 = arith.subf %250, %255 : vector<2x128xf32>
    %c0_76 = arith.constant 0 : index
    %c2 = arith.constant 2 : index
    %c0_77 = arith.constant 0 : index
    %257 = vector.load %arg11[%c0_76, %c2, %c0_77] : memref<2x6x128xf32, #tpu.memory_space<vmem>>, vector<2x1x128xf32>
    %258 = vector.shape_cast %257 : vector<2x1x128xf32> to vector<2x128xf32>
    %259 = vector.shape_cast %256 : vector<2x128xf32> to vector<2x1x128xf32>
    tpu.vector_store %arg11[%c0_76, %c2, %c0_77], %259 {strides = array<i32>} : memref<2x6x128xf32, #tpu.memory_space<vmem>>, vector<2x1x128xf32>,
    %260 = tpu.concatenate %211, %14 in 1 : vector<2x8xf32>, vector<2x120xf32> -> vector<2x128xf32>
    %c0_78 = arith.constant 0 : index
    %c2_79 = arith.constant 2 : index
    %c0_80 = arith.constant 0 : index
    %261 = vector.load %arg13[%c0_78, %c2_79, %c0_80] : memref<2x6x128xf32, #tpu.memory_space<vmem>>, vector<2x1x128xf32>
    %262 = vector.shape_cast %261 : vector<2x1x128xf32> to vector<2x128xf32>
    %263 = vector.shape_cast %260 : vector<2x128xf32> to vector<2x1x128xf32>
    tpu.vector_store %arg13[%c0_78, %c2_79, %c0_80], %263 {strides = array<i32>} : memref<2x6x128xf32, #tpu.memory_space<vmem>>, vector<2x1x128xf32>,
    %264 = arith.extui %10 : i1 to i32
    %c0_i32_81 = arith.constant 0 : i32
    %265 = arith.cmpi ne, %264, %c0_i32_81 : i32
    scf.if %265 {
      %cst_146 = arith.constant 0.000000e+00 : f32
      %499 = vector.broadcast %cst_146 : f32 to vector<2x128xf32>
      %c2_147 = arith.constant 2 : index
      %c0_148 = arith.constant 0 : index
      %500 = memref.load %arg1[%c2_147, %c0_148] : memref<6x2xi32, #tpu.memory_space<smem>>
      %c0_i32_149 = arith.constant 0 : i32
      %501 = vector.broadcast %c0_i32_149 : i32 to vector<2x128xi32>
      %502 = arith.cmpi eq, %13, %501 : vector<2x128xi32>
      %503 = vector.broadcast %500 : i32 to vector<2x128xi32>
      %504 = arith.cmpi eq, %11, %503 : vector<2x128xi32>
      %505 = arith.extui %504 : vector<2x128xi1> to vector<2x128xi32>
      %506 = arith.sitofp %505 : vector<2x128xi32> to vector<2x128xf32>
      %507 = arith.select %502, %506, %499 : vector<2x128xi1>, vector<2x128xf32>
      %c2_150 = arith.constant 2 : index
      %c1_151 = arith.constant 1 : index
      %508 = memref.load %arg1[%c2_150, %c1_151] : memref<6x2xi32, #tpu.memory_space<smem>>
      %c1_i32 = arith.constant 1 : i32
      %509 = vector.broadcast %c1_i32 : i32 to vector<2x128xi32>
      %510 = arith.cmpi eq, %13, %509 : vector<2x128xi32>
      %511 = vector.broadcast %508 : i32 to vector<2x128xi32>
      %512 = arith.cmpi eq, %11, %511 : vector<2x128xi32>
      %513 = arith.extui %512 : vector<2x128xi1> to vector<2x128xi32>
      %514 = arith.sitofp %513 : vector<2x128xi32> to vector<2x128xf32>
      %515 = arith.select %510, %514, %507 : vector<2x128xi1>, vector<2x128xf32>
      %c0_152 = arith.constant 0 : index
      %c0_153 = arith.constant 0 : index
      %516 = vector.load %arg14[%c0_152, %c0_153] : memref<2x128xf32, #tpu.memory_space<vmem>>, vector<2x128xf32>
      tpu.vector_store %arg14[%c0_152, %c0_153], %515 {strides = array<i32>} : memref<2x128xf32, #tpu.memory_space<vmem>>, vector<2x128xf32>,
    } else {
    }
    %true_82 = arith.constant true
    %266 = arith.xori %10, %true_82 : i1
    %267 = arith.extui %266 : i1 to i32
    %c0_i32_83 = arith.constant 0 : i32
    %268 = arith.cmpi ne, %267, %c0_i32_83 : i32
    scf.if %268 {
      %499 = vector.broadcast %248 : vector<2x1xf32> to vector<2x128xf32>
      %500 = arith.cmpf oeq, %246, %499 : vector<2x128xf32>
      %cst_146 = arith.constant 1.280000e+02 : f32
      %501 = vector.broadcast %cst_146 : f32 to vector<2x128xf32>
      %502 = arith.select %500, %12, %501 : vector<2x128xi1>, vector<2x128xf32>
      %cst_147 = arith.constant dense<0x7F800000> : vector<2xf32>
      %503 = vector.multi_reduction <minimumf>, %502, %cst_147 [1] : vector<2x128xf32> to vector<2xf32>
      %504 = vector.shape_cast %503 : vector<2xf32> to vector<2x1xf32>
      %505 = vector.broadcast %504 : vector<2x1xf32> to vector<2x128xf32>
      %506 = arith.cmpf oeq, %12, %505 : vector<2x128xf32>
      %507 = arith.extui %506 : vector<2x128xi1> to vector<2x128xi32>
      %508 = arith.sitofp %507 : vector<2x128xi32> to vector<2x128xf32>
      %c0_148 = arith.constant 0 : index
      %c0_149 = arith.constant 0 : index
      %509 = vector.load %arg14[%c0_148, %c0_149] : memref<2x128xf32, #tpu.memory_space<vmem>>, vector<2x128xf32>
      tpu.vector_store %arg14[%c0_148, %c0_149], %508 {strides = array<i32>} : memref<2x128xf32, #tpu.memory_space<vmem>>, vector<2x128xf32>,
    } else {
    }
    %c0_84 = arith.constant 0 : index
    %c0_85 = arith.constant 0 : index
    %269 = vector.load %arg14[%c0_84, %c0_85] : memref<2x128xf32, #tpu.memory_space<vmem>>, vector<2x128xf32>
    %270 = vector.extract_strided_slice %245 {offsets = [0, 128], sizes = [2, 32], strides = [1, 1]} : vector<2x256xf32> to vector<2x32xf32>
    %271 = vector.extract_strided_slice %245 {offsets = [0, 160], sizes = [2, 32], strides = [1, 1]} : vector<2x256xf32> to vector<2x32xf32>
    %272 = vector.extract_strided_slice %245 {offsets = [0, 192], sizes = [2, 32], strides = [1, 1]} : vector<2x256xf32> to vector<2x32xf32>
    %273 = vector.extract_strided_slice %245 {offsets = [0, 224], sizes = [2, 32], strides = [1, 1]} : vector<2x256xf32> to vector<2x32xf32>
    %274 = vector.shape_cast %270 : vector<2x32xf32> to vector<2x1x32xf32>
    %275 = vector.broadcast %274 : vector<2x1x32xf32> to vector<2x8x32xf32>
    %276 = arith.addf %275, %27 : vector<2x8x32xf32>
    %277 = math.tanh %276 : vector<2x8x32xf32>
    %278 = vector.broadcast %4 : vector<1x1x32xf32> to vector<2x8x32xf32>
    %279 = arith.mulf %277, %278 : vector<2x8x32xf32>
    %cst_86 = arith.constant dense<0.000000e+00> : vector<2x8xf32>
    %280 = vector.multi_reduction <add>, %279, %cst_86 [2] : vector<2x8x32xf32> to vector<2x8xf32>
    %cst_87 = arith.constant dense<0xFF800000> : vector<2xf32>
    %281 = vector.multi_reduction <maximumf>, %280, %cst_87 [1] : vector<2x8xf32> to vector<2xf32>
    %282 = vector.shape_cast %281 : vector<2xf32> to vector<2x1xf32>
    %283 = vector.broadcast %282 : vector<2x1xf32> to vector<2x8xf32>
    %284 = arith.subf %280, %283 : vector<2x8xf32>
    %285 = math.exp %284 : vector<2x8xf32>
    %cst_88 = arith.constant dense<0.000000e+00> : vector<2xf32>
    %286 = vector.multi_reduction <add>, %285, %cst_88 [1] : vector<2x8xf32> to vector<2xf32>
    %287 = vector.shape_cast %286 : vector<2xf32> to vector<2x1xf32>
    %288 = vector.broadcast %287 : vector<2x1xf32> to vector<2x8xf32>
    %289 = arith.divf %285, %288 : vector<2x8xf32>
    %290 = vector.shape_cast %289 : vector<2x8xf32> to vector<2x8x1xf32>
    %291 = vector.broadcast %290 : vector<2x8x1xf32> to vector<2x8x32xf32>
    %292 = arith.mulf %291, %0 : vector<2x8x32xf32>
    %cst_89 = arith.constant dense<0.000000e+00> : vector<2x32xf32>
    %293 = vector.multi_reduction <add>, %292, %cst_89 [1] : vector<2x8x32xf32> to vector<2x32xf32>
    %294 = tpu.concatenate %269, %293 in 1 : vector<2x128xf32>, vector<2x32xf32> -> vector<2x160xf32>
    %cst_90 = arith.constant dense<0.000000e+00> : vector<2x96xf32>
    %295 = tpu.matmul %294, %5, %cst_90 {dimension_numbers = #tpu.dot_dimension_numbers<[1], [0], [0], [1], [0, 0, 1, 1], [], []>} : vector<2x160xf32>, vector<160x96xf32>, vector<2x96xf32> -> vector<2x96xf32>
    %296 = vector.broadcast %6 : vector<1x96xf32> to vector<2x96xf32>
    %297 = arith.addf %295, %296 : vector<2x96xf32>
    %298 = vector.extract_strided_slice %297 {offsets = [0, 0], sizes = [2, 32], strides = [1, 1]} : vector<2x96xf32> to vector<2x32xf32>
    %299 = arith.addf %298, %271 : vector<2x32xf32>
    %300 = arith.negf %299 : vector<2x32xf32>
    %301 = math.exp %300 : vector<2x32xf32>
    %cst_91 = arith.constant 1.000000e+00 : f32
    %302 = vector.broadcast %cst_91 : f32 to vector<2x32xf32>
    %303 = arith.addf %302, %301 : vector<2x32xf32>
    %304 = arith.divf %302, %303 : vector<2x32xf32>
    %305 = vector.extract_strided_slice %297 {offsets = [0, 32], sizes = [2, 32], strides = [1, 1]} : vector<2x96xf32> to vector<2x32xf32>
    %306 = arith.addf %305, %272 : vector<2x32xf32>
    %307 = arith.negf %306 : vector<2x32xf32>
    %308 = math.exp %307 : vector<2x32xf32>
    %cst_92 = arith.constant 1.000000e+00 : f32
    %309 = vector.broadcast %cst_92 : f32 to vector<2x32xf32>
    %310 = arith.addf %309, %308 : vector<2x32xf32>
    %311 = arith.divf %309, %310 : vector<2x32xf32>
    %312 = vector.extract_strided_slice %297 {offsets = [0, 64], sizes = [2, 32], strides = [1, 1]} : vector<2x96xf32> to vector<2x32xf32>
    %313 = arith.mulf %304, %273 : vector<2x32xf32>
    %314 = arith.addf %312, %313 : vector<2x32xf32>
    %315 = math.tanh %314 : vector<2x32xf32>
    %cst_93 = arith.constant 1.000000e+00 : f32
    %316 = vector.broadcast %cst_93 : f32 to vector<2x32xf32>
    %317 = arith.subf %316, %311 : vector<2x32xf32>
    %318 = arith.mulf %317, %315 : vector<2x32xf32>
    %319 = arith.mulf %311, %242 : vector<2x32xf32>
    %320 = arith.addf %318, %319 : vector<2x32xf32>
    %cst_94 = arith.constant dense<0.000000e+00> : vector<2x256xf32>
    %321 = tpu.matmul %320, %7, %cst_94 {dimension_numbers = #tpu.dot_dimension_numbers<[1], [0], [0], [1], [0, 0, 1, 1], [], []>} : vector<2x32xf32>, vector<32x256xf32>, vector<2x256xf32> -> vector<2x256xf32>
    %322 = vector.broadcast %8 : vector<1x256xf32> to vector<2x256xf32>
    %323 = arith.addf %321, %322 : vector<2x256xf32>
    %324 = vector.extract_strided_slice %323 {offsets = [0, 0], sizes = [2, 128], strides = [1, 1]} : vector<2x256xf32> to vector<2x128xf32>
    %cst_95 = arith.constant dense<0xFF800000> : vector<2xf32>
    %325 = vector.multi_reduction <maximumf>, %324, %cst_95 [1] : vector<2x128xf32> to vector<2xf32>
    %326 = vector.shape_cast %325 : vector<2xf32> to vector<2x1xf32>
    %327 = vector.broadcast %326 : vector<2x1xf32> to vector<2x128xf32>
    %328 = arith.subf %324, %327 : vector<2x128xf32>
    %329 = math.exp %328 : vector<2x128xf32>
    %cst_96 = arith.constant dense<0.000000e+00> : vector<2xf32>
    %330 = vector.multi_reduction <add>, %329, %cst_96 [1] : vector<2x128xf32> to vector<2xf32>
    %331 = vector.shape_cast %330 : vector<2xf32> to vector<2x1xf32>
    %332 = math.log %331 : vector<2x1xf32>
    %333 = vector.broadcast %332 : vector<2x1xf32> to vector<2x128xf32>
    %334 = arith.subf %328, %333 : vector<2x128xf32>
    %c0_97 = arith.constant 0 : index
    %c3 = arith.constant 3 : index
    %c0_98 = arith.constant 0 : index
    %335 = vector.load %arg11[%c0_97, %c3, %c0_98] : memref<2x6x128xf32, #tpu.memory_space<vmem>>, vector<2x1x128xf32>
    %336 = vector.shape_cast %335 : vector<2x1x128xf32> to vector<2x128xf32>
    %337 = vector.shape_cast %334 : vector<2x128xf32> to vector<2x1x128xf32>
    tpu.vector_store %arg11[%c0_97, %c3, %c0_98], %337 {strides = array<i32>} : memref<2x6x128xf32, #tpu.memory_space<vmem>>, vector<2x1x128xf32>,
    %338 = tpu.concatenate %289, %14 in 1 : vector<2x8xf32>, vector<2x120xf32> -> vector<2x128xf32>
    %c0_99 = arith.constant 0 : index
    %c3_100 = arith.constant 3 : index
    %c0_101 = arith.constant 0 : index
    %339 = vector.load %arg13[%c0_99, %c3_100, %c0_101] : memref<2x6x128xf32, #tpu.memory_space<vmem>>, vector<2x1x128xf32>
    %340 = vector.shape_cast %339 : vector<2x1x128xf32> to vector<2x128xf32>
    %341 = vector.shape_cast %338 : vector<2x128xf32> to vector<2x1x128xf32>
    tpu.vector_store %arg13[%c0_99, %c3_100, %c0_101], %341 {strides = array<i32>} : memref<2x6x128xf32, #tpu.memory_space<vmem>>, vector<2x1x128xf32>,
    %342 = arith.extui %10 : i1 to i32
    %c0_i32_102 = arith.constant 0 : i32
    %343 = arith.cmpi ne, %342, %c0_i32_102 : i32
    scf.if %343 {
      %cst_146 = arith.constant 0.000000e+00 : f32
      %499 = vector.broadcast %cst_146 : f32 to vector<2x128xf32>
      %c3_147 = arith.constant 3 : index
      %c0_148 = arith.constant 0 : index
      %500 = memref.load %arg1[%c3_147, %c0_148] : memref<6x2xi32, #tpu.memory_space<smem>>
      %c0_i32_149 = arith.constant 0 : i32
      %501 = vector.broadcast %c0_i32_149 : i32 to vector<2x128xi32>
      %502 = arith.cmpi eq, %13, %501 : vector<2x128xi32>
      %503 = vector.broadcast %500 : i32 to vector<2x128xi32>
      %504 = arith.cmpi eq, %11, %503 : vector<2x128xi32>
      %505 = arith.extui %504 : vector<2x128xi1> to vector<2x128xi32>
      %506 = arith.sitofp %505 : vector<2x128xi32> to vector<2x128xf32>
      %507 = arith.select %502, %506, %499 : vector<2x128xi1>, vector<2x128xf32>
      %c3_150 = arith.constant 3 : index
      %c1_151 = arith.constant 1 : index
      %508 = memref.load %arg1[%c3_150, %c1_151] : memref<6x2xi32, #tpu.memory_space<smem>>
      %c1_i32 = arith.constant 1 : i32
      %509 = vector.broadcast %c1_i32 : i32 to vector<2x128xi32>
      %510 = arith.cmpi eq, %13, %509 : vector<2x128xi32>
      %511 = vector.broadcast %508 : i32 to vector<2x128xi32>
      %512 = arith.cmpi eq, %11, %511 : vector<2x128xi32>
      %513 = arith.extui %512 : vector<2x128xi1> to vector<2x128xi32>
      %514 = arith.sitofp %513 : vector<2x128xi32> to vector<2x128xf32>
      %515 = arith.select %510, %514, %507 : vector<2x128xi1>, vector<2x128xf32>
      %c0_152 = arith.constant 0 : index
      %c0_153 = arith.constant 0 : index
      %516 = vector.load %arg14[%c0_152, %c0_153] : memref<2x128xf32, #tpu.memory_space<vmem>>, vector<2x128xf32>
      tpu.vector_store %arg14[%c0_152, %c0_153], %515 {strides = array<i32>} : memref<2x128xf32, #tpu.memory_space<vmem>>, vector<2x128xf32>,
    } else {
    }
    %true_103 = arith.constant true
    %344 = arith.xori %10, %true_103 : i1
    %345 = arith.extui %344 : i1 to i32
    %c0_i32_104 = arith.constant 0 : i32
    %346 = arith.cmpi ne, %345, %c0_i32_104 : i32
    scf.if %346 {
      %499 = vector.broadcast %326 : vector<2x1xf32> to vector<2x128xf32>
      %500 = arith.cmpf oeq, %324, %499 : vector<2x128xf32>
      %cst_146 = arith.constant 1.280000e+02 : f32
      %501 = vector.broadcast %cst_146 : f32 to vector<2x128xf32>
      %502 = arith.select %500, %12, %501 : vector<2x128xi1>, vector<2x128xf32>
      %cst_147 = arith.constant dense<0x7F800000> : vector<2xf32>
      %503 = vector.multi_reduction <minimumf>, %502, %cst_147 [1] : vector<2x128xf32> to vector<2xf32>
      %504 = vector.shape_cast %503 : vector<2xf32> to vector<2x1xf32>
      %505 = vector.broadcast %504 : vector<2x1xf32> to vector<2x128xf32>
      %506 = arith.cmpf oeq, %12, %505 : vector<2x128xf32>
      %507 = arith.extui %506 : vector<2x128xi1> to vector<2x128xi32>
      %508 = arith.sitofp %507 : vector<2x128xi32> to vector<2x128xf32>
      %c0_148 = arith.constant 0 : index
      %c0_149 = arith.constant 0 : index
      %509 = vector.load %arg14[%c0_148, %c0_149] : memref<2x128xf32, #tpu.memory_space<vmem>>, vector<2x128xf32>
      tpu.vector_store %arg14[%c0_148, %c0_149], %508 {strides = array<i32>} : memref<2x128xf32, #tpu.memory_space<vmem>>, vector<2x128xf32>,
    } else {
    }
    %c0_105 = arith.constant 0 : index
    %c0_106 = arith.constant 0 : index
    %347 = vector.load %arg14[%c0_105, %c0_106] : memref<2x128xf32, #tpu.memory_space<vmem>>, vector<2x128xf32>
    %348 = vector.extract_strided_slice %323 {offsets = [0, 128], sizes = [2, 32], strides = [1, 1]} : vector<2x256xf32> to vector<2x32xf32>
    %349 = vector.extract_strided_slice %323 {offsets = [0, 160], sizes = [2, 32], strides = [1, 1]} : vector<2x256xf32> to vector<2x32xf32>
    %350 = vector.extract_strided_slice %323 {offsets = [0, 192], sizes = [2, 32], strides = [1, 1]} : vector<2x256xf32> to vector<2x32xf32>
    %351 = vector.extract_strided_slice %323 {offsets = [0, 224], sizes = [2, 32], strides = [1, 1]} : vector<2x256xf32> to vector<2x32xf32>
    %352 = vector.shape_cast %348 : vector<2x32xf32> to vector<2x1x32xf32>
    %353 = vector.broadcast %352 : vector<2x1x32xf32> to vector<2x8x32xf32>
    %354 = arith.addf %353, %27 : vector<2x8x32xf32>
    %355 = math.tanh %354 : vector<2x8x32xf32>
    %356 = vector.broadcast %4 : vector<1x1x32xf32> to vector<2x8x32xf32>
    %357 = arith.mulf %355, %356 : vector<2x8x32xf32>
    %cst_107 = arith.constant dense<0.000000e+00> : vector<2x8xf32>
    %358 = vector.multi_reduction <add>, %357, %cst_107 [2] : vector<2x8x32xf32> to vector<2x8xf32>
    %cst_108 = arith.constant dense<0xFF800000> : vector<2xf32>
    %359 = vector.multi_reduction <maximumf>, %358, %cst_108 [1] : vector<2x8xf32> to vector<2xf32>
    %360 = vector.shape_cast %359 : vector<2xf32> to vector<2x1xf32>
    %361 = vector.broadcast %360 : vector<2x1xf32> to vector<2x8xf32>
    %362 = arith.subf %358, %361 : vector<2x8xf32>
    %363 = math.exp %362 : vector<2x8xf32>
    %cst_109 = arith.constant dense<0.000000e+00> : vector<2xf32>
    %364 = vector.multi_reduction <add>, %363, %cst_109 [1] : vector<2x8xf32> to vector<2xf32>
    %365 = vector.shape_cast %364 : vector<2xf32> to vector<2x1xf32>
    %366 = vector.broadcast %365 : vector<2x1xf32> to vector<2x8xf32>
    %367 = arith.divf %363, %366 : vector<2x8xf32>
    %368 = vector.shape_cast %367 : vector<2x8xf32> to vector<2x8x1xf32>
    %369 = vector.broadcast %368 : vector<2x8x1xf32> to vector<2x8x32xf32>
    %370 = arith.mulf %369, %0 : vector<2x8x32xf32>
    %cst_110 = arith.constant dense<0.000000e+00> : vector<2x32xf32>
    %371 = vector.multi_reduction <add>, %370, %cst_110 [1] : vector<2x8x32xf32> to vector<2x32xf32>
    %372 = tpu.concatenate %347, %371 in 1 : vector<2x128xf32>, vector<2x32xf32> -> vector<2x160xf32>
    %cst_111 = arith.constant dense<0.000000e+00> : vector<2x96xf32>
    %373 = tpu.matmul %372, %5, %cst_111 {dimension_numbers = #tpu.dot_dimension_numbers<[1], [0], [0], [1], [0, 0, 1, 1], [], []>} : vector<2x160xf32>, vector<160x96xf32>, vector<2x96xf32> -> vector<2x96xf32>
    %374 = vector.broadcast %6 : vector<1x96xf32> to vector<2x96xf32>
    %375 = arith.addf %373, %374 : vector<2x96xf32>
    %376 = vector.extract_strided_slice %375 {offsets = [0, 0], sizes = [2, 32], strides = [1, 1]} : vector<2x96xf32> to vector<2x32xf32>
    %377 = arith.addf %376, %349 : vector<2x32xf32>
    %378 = arith.negf %377 : vector<2x32xf32>
    %379 = math.exp %378 : vector<2x32xf32>
    %cst_112 = arith.constant 1.000000e+00 : f32
    %380 = vector.broadcast %cst_112 : f32 to vector<2x32xf32>
    %381 = arith.addf %380, %379 : vector<2x32xf32>
    %382 = arith.divf %380, %381 : vector<2x32xf32>
    %383 = vector.extract_strided_slice %375 {offsets = [0, 32], sizes = [2, 32], strides = [1, 1]} : vector<2x96xf32> to vector<2x32xf32>
    %384 = arith.addf %383, %350 : vector<2x32xf32>
    %385 = arith.negf %384 : vector<2x32xf32>
    %386 = math.exp %385 : vector<2x32xf32>
    %cst_113 = arith.constant 1.000000e+00 : f32
    %387 = vector.broadcast %cst_113 : f32 to vector<2x32xf32>
    %388 = arith.addf %387, %386 : vector<2x32xf32>
    %389 = arith.divf %387, %388 : vector<2x32xf32>
    %390 = vector.extract_strided_slice %375 {offsets = [0, 64], sizes = [2, 32], strides = [1, 1]} : vector<2x96xf32> to vector<2x32xf32>
    %391 = arith.mulf %382, %351 : vector<2x32xf32>
    %392 = arith.addf %390, %391 : vector<2x32xf32>
    %393 = math.tanh %392 : vector<2x32xf32>
    %cst_114 = arith.constant 1.000000e+00 : f32
    %394 = vector.broadcast %cst_114 : f32 to vector<2x32xf32>
    %395 = arith.subf %394, %389 : vector<2x32xf32>
    %396 = arith.mulf %395, %393 : vector<2x32xf32>
    %397 = arith.mulf %389, %320 : vector<2x32xf32>
    %398 = arith.addf %396, %397 : vector<2x32xf32>
    %cst_115 = arith.constant dense<0.000000e+00> : vector<2x256xf32>
    %399 = tpu.matmul %398, %7, %cst_115 {dimension_numbers = #tpu.dot_dimension_numbers<[1], [0], [0], [1], [0, 0, 1, 1], [], []>} : vector<2x32xf32>, vector<32x256xf32>, vector<2x256xf32> -> vector<2x256xf32>
    %400 = vector.broadcast %8 : vector<1x256xf32> to vector<2x256xf32>
    %401 = arith.addf %399, %400 : vector<2x256xf32>
    %402 = vector.extract_strided_slice %401 {offsets = [0, 0], sizes = [2, 128], strides = [1, 1]} : vector<2x256xf32> to vector<2x128xf32>
    %cst_116 = arith.constant dense<0xFF800000> : vector<2xf32>
    %403 = vector.multi_reduction <maximumf>, %402, %cst_116 [1] : vector<2x128xf32> to vector<2xf32>
    %404 = vector.shape_cast %403 : vector<2xf32> to vector<2x1xf32>
    %405 = vector.broadcast %404 : vector<2x1xf32> to vector<2x128xf32>
    %406 = arith.subf %402, %405 : vector<2x128xf32>
    %407 = math.exp %406 : vector<2x128xf32>
    %cst_117 = arith.constant dense<0.000000e+00> : vector<2xf32>
    %408 = vector.multi_reduction <add>, %407, %cst_117 [1] : vector<2x128xf32> to vector<2xf32>
    %409 = vector.shape_cast %408 : vector<2xf32> to vector<2x1xf32>
    %410 = math.log %409 : vector<2x1xf32>
    %411 = vector.broadcast %410 : vector<2x1xf32> to vector<2x128xf32>
    %412 = arith.subf %406, %411 : vector<2x128xf32>
    %c0_118 = arith.constant 0 : index
    %c4 = arith.constant 4 : index
    %c0_119 = arith.constant 0 : index
    %413 = vector.load %arg11[%c0_118, %c4, %c0_119] : memref<2x6x128xf32, #tpu.memory_space<vmem>>, vector<2x1x128xf32>
    %414 = vector.shape_cast %413 : vector<2x1x128xf32> to vector<2x128xf32>
    %415 = vector.shape_cast %412 : vector<2x128xf32> to vector<2x1x128xf32>
    tpu.vector_store %arg11[%c0_118, %c4, %c0_119], %415 {strides = array<i32>} : memref<2x6x128xf32, #tpu.memory_space<vmem>>, vector<2x1x128xf32>,
    %416 = tpu.concatenate %367, %14 in 1 : vector<2x8xf32>, vector<2x120xf32> -> vector<2x128xf32>
    %c0_120 = arith.constant 0 : index
    %c4_121 = arith.constant 4 : index
    %c0_122 = arith.constant 0 : index
    %417 = vector.load %arg13[%c0_120, %c4_121, %c0_122] : memref<2x6x128xf32, #tpu.memory_space<vmem>>, vector<2x1x128xf32>
    %418 = vector.shape_cast %417 : vector<2x1x128xf32> to vector<2x128xf32>
    %419 = vector.shape_cast %416 : vector<2x128xf32> to vector<2x1x128xf32>
    tpu.vector_store %arg13[%c0_120, %c4_121, %c0_122], %419 {strides = array<i32>} : memref<2x6x128xf32, #tpu.memory_space<vmem>>, vector<2x1x128xf32>,
    %420 = arith.extui %10 : i1 to i32
    %c0_i32_123 = arith.constant 0 : i32
    %421 = arith.cmpi ne, %420, %c0_i32_123 : i32
    scf.if %421 {
      %cst_146 = arith.constant 0.000000e+00 : f32
      %499 = vector.broadcast %cst_146 : f32 to vector<2x128xf32>
      %c4_147 = arith.constant 4 : index
      %c0_148 = arith.constant 0 : index
      %500 = memref.load %arg1[%c4_147, %c0_148] : memref<6x2xi32, #tpu.memory_space<smem>>
      %c0_i32_149 = arith.constant 0 : i32
      %501 = vector.broadcast %c0_i32_149 : i32 to vector<2x128xi32>
      %502 = arith.cmpi eq, %13, %501 : vector<2x128xi32>
      %503 = vector.broadcast %500 : i32 to vector<2x128xi32>
      %504 = arith.cmpi eq, %11, %503 : vector<2x128xi32>
      %505 = arith.extui %504 : vector<2x128xi1> to vector<2x128xi32>
      %506 = arith.sitofp %505 : vector<2x128xi32> to vector<2x128xf32>
      %507 = arith.select %502, %506, %499 : vector<2x128xi1>, vector<2x128xf32>
      %c4_150 = arith.constant 4 : index
      %c1_151 = arith.constant 1 : index
      %508 = memref.load %arg1[%c4_150, %c1_151] : memref<6x2xi32, #tpu.memory_space<smem>>
      %c1_i32 = arith.constant 1 : i32
      %509 = vector.broadcast %c1_i32 : i32 to vector<2x128xi32>
      %510 = arith.cmpi eq, %13, %509 : vector<2x128xi32>
      %511 = vector.broadcast %508 : i32 to vector<2x128xi32>
      %512 = arith.cmpi eq, %11, %511 : vector<2x128xi32>
      %513 = arith.extui %512 : vector<2x128xi1> to vector<2x128xi32>
      %514 = arith.sitofp %513 : vector<2x128xi32> to vector<2x128xf32>
      %515 = arith.select %510, %514, %507 : vector<2x128xi1>, vector<2x128xf32>
      %c0_152 = arith.constant 0 : index
      %c0_153 = arith.constant 0 : index
      %516 = vector.load %arg14[%c0_152, %c0_153] : memref<2x128xf32, #tpu.memory_space<vmem>>, vector<2x128xf32>
      tpu.vector_store %arg14[%c0_152, %c0_153], %515 {strides = array<i32>} : memref<2x128xf32, #tpu.memory_space<vmem>>, vector<2x128xf32>,
    } else {
    }
    %true_124 = arith.constant true
    %422 = arith.xori %10, %true_124 : i1
    %423 = arith.extui %422 : i1 to i32
    %c0_i32_125 = arith.constant 0 : i32
    %424 = arith.cmpi ne, %423, %c0_i32_125 : i32
    scf.if %424 {
      %499 = vector.broadcast %404 : vector<2x1xf32> to vector<2x128xf32>
      %500 = arith.cmpf oeq, %402, %499 : vector<2x128xf32>
      %cst_146 = arith.constant 1.280000e+02 : f32
      %501 = vector.broadcast %cst_146 : f32 to vector<2x128xf32>
      %502 = arith.select %500, %12, %501 : vector<2x128xi1>, vector<2x128xf32>
      %cst_147 = arith.constant dense<0x7F800000> : vector<2xf32>
      %503 = vector.multi_reduction <minimumf>, %502, %cst_147 [1] : vector<2x128xf32> to vector<2xf32>
      %504 = vector.shape_cast %503 : vector<2xf32> to vector<2x1xf32>
      %505 = vector.broadcast %504 : vector<2x1xf32> to vector<2x128xf32>
      %506 = arith.cmpf oeq, %12, %505 : vector<2x128xf32>
      %507 = arith.extui %506 : vector<2x128xi1> to vector<2x128xi32>
      %508 = arith.sitofp %507 : vector<2x128xi32> to vector<2x128xf32>
      %c0_148 = arith.constant 0 : index
      %c0_149 = arith.constant 0 : index
      %509 = vector.load %arg14[%c0_148, %c0_149] : memref<2x128xf32, #tpu.memory_space<vmem>>, vector<2x128xf32>
      tpu.vector_store %arg14[%c0_148, %c0_149], %508 {strides = array<i32>} : memref<2x128xf32, #tpu.memory_space<vmem>>, vector<2x128xf32>,
    } else {
    }
    %c0_126 = arith.constant 0 : index
    %c0_127 = arith.constant 0 : index
    %425 = vector.load %arg14[%c0_126, %c0_127] : memref<2x128xf32, #tpu.memory_space<vmem>>, vector<2x128xf32>
    %426 = vector.extract_strided_slice %401 {offsets = [0, 128], sizes = [2, 32], strides = [1, 1]} : vector<2x256xf32> to vector<2x32xf32>
    %427 = vector.extract_strided_slice %401 {offsets = [0, 160], sizes = [2, 32], strides = [1, 1]} : vector<2x256xf32> to vector<2x32xf32>
    %428 = vector.extract_strided_slice %401 {offsets = [0, 192], sizes = [2, 32], strides = [1, 1]} : vector<2x256xf32> to vector<2x32xf32>
    %429 = vector.extract_strided_slice %401 {offsets = [0, 224], sizes = [2, 32], strides = [1, 1]} : vector<2x256xf32> to vector<2x32xf32>
    %430 = vector.shape_cast %426 : vector<2x32xf32> to vector<2x1x32xf32>
    %431 = vector.broadcast %430 : vector<2x1x32xf32> to vector<2x8x32xf32>
    %432 = arith.addf %431, %27 : vector<2x8x32xf32>
    %433 = math.tanh %432 : vector<2x8x32xf32>
    %434 = vector.broadcast %4 : vector<1x1x32xf32> to vector<2x8x32xf32>
    %435 = arith.mulf %433, %434 : vector<2x8x32xf32>
    %cst_128 = arith.constant dense<0.000000e+00> : vector<2x8xf32>
    %436 = vector.multi_reduction <add>, %435, %cst_128 [2] : vector<2x8x32xf32> to vector<2x8xf32>
    %cst_129 = arith.constant dense<0xFF800000> : vector<2xf32>
    %437 = vector.multi_reduction <maximumf>, %436, %cst_129 [1] : vector<2x8xf32> to vector<2xf32>
    %438 = vector.shape_cast %437 : vector<2xf32> to vector<2x1xf32>
    %439 = vector.broadcast %438 : vector<2x1xf32> to vector<2x8xf32>
    %440 = arith.subf %436, %439 : vector<2x8xf32>
    %441 = math.exp %440 : vector<2x8xf32>
    %cst_130 = arith.constant dense<0.000000e+00> : vector<2xf32>
    %442 = vector.multi_reduction <add>, %441, %cst_130 [1] : vector<2x8xf32> to vector<2xf32>
    %443 = vector.shape_cast %442 : vector<2xf32> to vector<2x1xf32>
    %444 = vector.broadcast %443 : vector<2x1xf32> to vector<2x8xf32>
    %445 = arith.divf %441, %444 : vector<2x8xf32>
    %446 = vector.shape_cast %445 : vector<2x8xf32> to vector<2x8x1xf32>
    %447 = vector.broadcast %446 : vector<2x8x1xf32> to vector<2x8x32xf32>
    %448 = arith.mulf %447, %0 : vector<2x8x32xf32>
    %cst_131 = arith.constant dense<0.000000e+00> : vector<2x32xf32>
    %449 = vector.multi_reduction <add>, %448, %cst_131 [1] : vector<2x8x32xf32> to vector<2x32xf32>
    %450 = tpu.concatenate %425, %449 in 1 : vector<2x128xf32>, vector<2x32xf32> -> vector<2x160xf32>
    %cst_132 = arith.constant dense<0.000000e+00> : vector<2x96xf32>
    %451 = tpu.matmul %450, %5, %cst_132 {dimension_numbers = #tpu.dot_dimension_numbers<[1], [0], [0], [1], [0, 0, 1, 1], [], []>} : vector<2x160xf32>, vector<160x96xf32>, vector<2x96xf32> -> vector<2x96xf32>
    %452 = vector.broadcast %6 : vector<1x96xf32> to vector<2x96xf32>
    %453 = arith.addf %451, %452 : vector<2x96xf32>
    %454 = vector.extract_strided_slice %453 {offsets = [0, 0], sizes = [2, 32], strides = [1, 1]} : vector<2x96xf32> to vector<2x32xf32>
    %455 = arith.addf %454, %427 : vector<2x32xf32>
    %456 = arith.negf %455 : vector<2x32xf32>
    %457 = math.exp %456 : vector<2x32xf32>
    %cst_133 = arith.constant 1.000000e+00 : f32
    %458 = vector.broadcast %cst_133 : f32 to vector<2x32xf32>
    %459 = arith.addf %458, %457 : vector<2x32xf32>
    %460 = arith.divf %458, %459 : vector<2x32xf32>
    %461 = vector.extract_strided_slice %453 {offsets = [0, 32], sizes = [2, 32], strides = [1, 1]} : vector<2x96xf32> to vector<2x32xf32>
    %462 = arith.addf %461, %428 : vector<2x32xf32>
    %463 = arith.negf %462 : vector<2x32xf32>
    %464 = math.exp %463 : vector<2x32xf32>
    %cst_134 = arith.constant 1.000000e+00 : f32
    %465 = vector.broadcast %cst_134 : f32 to vector<2x32xf32>
    %466 = arith.addf %465, %464 : vector<2x32xf32>
    %467 = arith.divf %465, %466 : vector<2x32xf32>
    %468 = vector.extract_strided_slice %453 {offsets = [0, 64], sizes = [2, 32], strides = [1, 1]} : vector<2x96xf32> to vector<2x32xf32>
    %469 = arith.mulf %460, %429 : vector<2x32xf32>
    %470 = arith.addf %468, %469 : vector<2x32xf32>
    %471 = math.tanh %470 : vector<2x32xf32>
    %cst_135 = arith.constant 1.000000e+00 : f32
    %472 = vector.broadcast %cst_135 : f32 to vector<2x32xf32>
    %473 = arith.subf %472, %467 : vector<2x32xf32>
    %474 = arith.mulf %473, %471 : vector<2x32xf32>
    %475 = arith.mulf %467, %398 : vector<2x32xf32>
    %476 = arith.addf %474, %475 : vector<2x32xf32>
    %cst_136 = arith.constant dense<0.000000e+00> : vector<2x256xf32>
    %477 = tpu.matmul %476, %7, %cst_136 {dimension_numbers = #tpu.dot_dimension_numbers<[1], [0], [0], [1], [0, 0, 1, 1], [], []>} : vector<2x32xf32>, vector<32x256xf32>, vector<2x256xf32> -> vector<2x256xf32>
    %478 = vector.broadcast %8 : vector<1x256xf32> to vector<2x256xf32>
    %479 = arith.addf %477, %478 : vector<2x256xf32>
    %480 = vector.extract_strided_slice %479 {offsets = [0, 0], sizes = [2, 128], strides = [1, 1]} : vector<2x256xf32> to vector<2x128xf32>
    %cst_137 = arith.constant dense<0xFF800000> : vector<2xf32>
    %481 = vector.multi_reduction <maximumf>, %480, %cst_137 [1] : vector<2x128xf32> to vector<2xf32>
    %482 = vector.shape_cast %481 : vector<2xf32> to vector<2x1xf32>
    %483 = vector.broadcast %482 : vector<2x1xf32> to vector<2x128xf32>
    %484 = arith.subf %480, %483 : vector<2x128xf32>
    %485 = math.exp %484 : vector<2x128xf32>
    %cst_138 = arith.constant dense<0.000000e+00> : vector<2xf32>
    %486 = vector.multi_reduction <add>, %485, %cst_138 [1] : vector<2x128xf32> to vector<2xf32>
    %487 = vector.shape_cast %486 : vector<2xf32> to vector<2x1xf32>
    %488 = math.log %487 : vector<2x1xf32>
    %489 = vector.broadcast %488 : vector<2x1xf32> to vector<2x128xf32>
    %490 = arith.subf %484, %489 : vector<2x128xf32>
    %c0_139 = arith.constant 0 : index
    %c5 = arith.constant 5 : index
    %c0_140 = arith.constant 0 : index
    %491 = vector.load %arg11[%c0_139, %c5, %c0_140] : memref<2x6x128xf32, #tpu.memory_space<vmem>>, vector<2x1x128xf32>
    %492 = vector.shape_cast %491 : vector<2x1x128xf32> to vector<2x128xf32>
    %493 = vector.shape_cast %490 : vector<2x128xf32> to vector<2x1x128xf32>
    tpu.vector_store %arg11[%c0_139, %c5, %c0_140], %493 {strides = array<i32>} : memref<2x6x128xf32, #tpu.memory_space<vmem>>, vector<2x1x128xf32>,
    %494 = tpu.concatenate %445, %14 in 1 : vector<2x8xf32>, vector<2x120xf32> -> vector<2x128xf32>
    %c0_141 = arith.constant 0 : index
    %c5_142 = arith.constant 5 : index
    %c0_143 = arith.constant 0 : index
    %495 = vector.load %arg13[%c0_141, %c5_142, %c0_143] : memref<2x6x128xf32, #tpu.memory_space<vmem>>, vector<2x1x128xf32>
    %496 = vector.shape_cast %495 : vector<2x1x128xf32> to vector<2x128xf32>
    %497 = vector.shape_cast %494 : vector<2x128xf32> to vector<2x1x128xf32>
    tpu.vector_store %arg13[%c0_141, %c5_142, %c0_143], %497 {strides = array<i32>} : memref<2x6x128xf32, #tpu.memory_space<vmem>>, vector<2x1x128xf32>,
    %c0_144 = arith.constant 0 : index
    %c0_145 = arith.constant 0 : index
    %498 = vector.load %arg12[%c0_144, %c0_145] : memref<2x32xf32, #tpu.memory_space<vmem>>, vector<2x32xf32>
    tpu.vector_store %arg12[%c0_144, %c0_145], %476 {strides = array<i32>} : memref<2x32xf32, #tpu.memory_space<vmem>>, vector<2x32xf32>,
    return
  }
}

</mosaic_0001>

<bundles_post_ra>
// kernel: attn_decoder_forward.1
= control target key start
LH: loop header
LB: loop body
LE: loop exit
PB: predicated region body
PF: predicated region fallthrough
CT: control target
= control target key end

     0   :  { %20 = vsyncpa [#allocation6], 0  ;;  %s3178_s0 = inlined_call_operand.<no memory space> [shape: s32[1], index: 0, kind: input, shape index: {}]   ;;  %s3179_s1 = inlined_call_operand.vmem [shape: s32[6,2], index: 1, kind: input, shape index: {}]   ;;  %s3180_s2 = inlined_call_operand.vmem [shape: f32[2,32], index: 2, kind: input, shape index: {}]   ;;  %s3181_s3 = inlined_call_operand.vmem [shape: f32[2,8,32], index: 3, kind: input, shape index: {}]   ;;  %s3182_s4 = inlined_call_operand.vmem [shape: f32[32,32], index: 4, kind: input, shape index: {}]   ;;  %s3183_s5 = inlined_call_operand.vmem [shape: f32[1,32], index: 5, kind: input, shape index: {}]   ;;  %s3184_s6 = inlined_call_operand.vmem [shape: f32[1,32], index: 6, kind: input, shape index: {}]   ;;  %s3185_s7 = inlined_call_operand.vmem [shape: f32[160,96], index: 7, kind: input, shape index: {}]   ;;  %s3186_s8 = inlined_call_operand.vmem [shape: f32[1,96], index: 8, kind: input, shape index: {}]   ;;  %s3187_s9 = inlined_call_operand.vmem [shape: f32[32,256], index: 9, kind: input, shape index: {}]   ;;  %s3188_s10 = inlined_call_operand.vmem [shape: f32[1,256], index: 10, kind: input, shape index: {}]   ;;  %s3189_s11 = inlined_call_operand.vmem [shape: f32[2,6,128], index: 11, kind: output, shape index: {0}]   ;;  %s3190_s12 = inlined_call_operand.hbm [shape: f32[2,32], index: 12, kind: output, shape index: {1}]   ;;  %s3191_s13 = inlined_call_operand.vmem [shape: f32[2,6,128], index: 13, kind: output, shape index: {2}]  }
   0x1   :  { %21 = vsyncpa [#allocation5], 0  ;;  %s29_s27 = sshll.u32 %s3179_s1, 4  ;;  %s2264_s28 = smov [#allocation4]   ;;  %s30_s27 = int_to_ptr.vmem [resolvable:$true] %s29_s27 }
   0x2   :  { %32 = dma.vmem_to_smem %s30_s27, 128, %s2264_s28, [#allocation6]  }
   0x3   :  { %2260 = dma.done.wait [#allocation6], 128  }
   0x4   :  { %2261 = vsyncadd [#allocation6], 4294967168 }
   0x5   :  { %55 = sfence }
   0x6   :  { %v61_v0 = vld [vmem:[%s3182_s4 + $0x18] sm:$0xff]  ;;  %v60_v1 = vld [vmem:[%s3182_s4 + $0x10] sm:$0xff]  ;;  %v59_v2 = vld [vmem:[%s3182_s4 + $0x8] sm:$0xff]  ;;  %vm104_vm0 = vcmask 261120   ;;  %v96_v12 = vlaneseq  ;;  %vm208_vm1 = vcmask 1041409   ;;  %vm211_vm2 = vcmask 58368  }
   0x7   :  { %120 = vmatpush.msra.mxu2 %v61_v0  ;;  %143 = vmatpush.msra.mxu1 %v61_v0  ;;  %v58_v3 = vld [vmem:[%s3182_s4] sm:$0xff]  ;;  %v2374_v5 = vld [vmem:[%s3181_s3 + $0x8] sm:$0xff]  ;;  %v2379_v6 = vld [vmem:[%s3187_s9 + $0x38] sm:$0xff]  ;;  %v3192_v42 = vmov 0   ;;  %s2267_s17 = smov 32   ;;  %vm461_vm12 = vcmask 64512  }
   0x8   :  { %v2369_v4 = vld [vmem:[%s3181_s3] sm:$0xff]  ;;  %v2386_v7 = vld [vmem:[%s3187_s9 + $0x28] sm:$0xff]  ;;  %v2394_v8 = vld [vmem:[%s3187_s9 + $0x18] sm:$0xff]  ;;  %v2420_v14 = vand.u32 127, %v96_v12  ;;  %v2422_v15 = vshrl.u32 %v96_v12, 7  ;;  %2072 = vset.pattern.permute.xlu2 %v3192_v42  ;;  %2071 = vset.pattern.permute.xlu1 %v3192_v42  ;;  %p2001_p0 = scmp.eq.s32.totalorder %s3178_s0, 0 }
   0x9   :  { %121 = vmatpush.msra.mxu2 %v60_v1  ;;  %144 = vmatpush.msra.mxu1 %v60_v1  ;;  %v2400_v9 = vld [vmem:[%s3187_s9 + $0x8] sm:$0xff]  ;;  %v2406_v10 = vld [vmem:[%s3180_s2] sm:$0x3]  ;;  %v2467_v61 = vld [vmem:[%s3185_s7 + $0x78] sm:$0xff]  ;;  %s471_s29 = sld [smem:[#allocation4]] (!%p2001_p0) }
   0xa   :  { %v2418_v13 = vld [vmem:[%s3188_s10] sm:$0x3]  ;;  %v2428_v17 = vcvt.s32.f32 %v2420_v14  ;;  %2073 = vset.pattern.permute.xlu0 %v3192_v42  ;;  %v2472_v62 = vld [vmem:[%s3185_s7 + $0x70] sm:$0xff]  ;;  %310 = vmatpush.msra.mxu3 %v2467_v61  ;;  %v2478_v0 = vld [vmem:[%s3185_s7 + $0x68] sm:$0xff]  ;;  %vm180_vm11 = vcmp.eq.s32.totalorder %v2420_v14, 0  ;;  %s2003_s30 = sld [smem:[#allocation4 + $0x1]] (!%p2001_p0) }
   0xb   :  { %122 = vmatpush.msra.mxu2 %v59_v2  ;;  %145 = vmatpush.msra.mxu1 %v59_v2  ;;  %v2425_v16 = vperm.slane %v2418_v13, 1  ;;  %v2074_v18 = vld [vmem:[%s3183_s5] ss:$0 sm:$0xff] }
   0xc   :  { %v2447_v29 = vld [vmem:[%s3184_s6] ss:$0 sm:$0xff]  ;;  %311 = vmatpush.msra.mxu3 %v2472_v62  ;;  %s2266_s6 = smov 96  }
   0xd   :  { %123 = vmatpush.msra.mxu2 %v58_v3  ;;  %146 = vmatpush.msra.mxu1 %v58_v3 }
   0xe   :  { %1992 = vmatmul.msk.f32.vlgmr.msra.gmra.mxu2 %vm104_vm0, %v2369_v4  ;;  %1993 = vmatmul.msk.f32.vlgmr.msra.gmra.mxu1 %vm104_vm0, %v2374_v5 }
   0xf   :  { %172 = vmatpush.msrb.mxu2 %v2379_v6  ;;  %312 = vmatpush.msra.mxu3 %v2478_v0 }
  0x11   :  { %173 = vmatpush.msrb.mxu2 %v2386_v7 }
  0x13   :  { %174 = vmatpush.msrb.mxu2 %v2394_v8 }
  0x15   :  { %175 = vmatpush.msrb.mxu2 %v2400_v9 }
  0x16   :  { %1994 = vmatmul.msk.f32.vlgmr.msrb.gmra.mxu2 %vm104_vm0, %v2406_v10 }
  0x17   :  { %431 = vmatpush.msra.mxu2 %v2379_v6 }
  0x19   :  { %432 = vmatpush.msra.mxu2 %v2386_v7 }
  0x1b   :  { %433 = vmatpush.msra.mxu2 %v2394_v8 }
  0x1d   :  { %434 = vmatpush.msra.mxu2 %v2400_v9 }
  0x8b   :  { %v148_v20 = vpop.f32.mrf.mxu1 }
  0x8c   :  { %v2439_v24 = vadd.f32 %v2074_v18, %v148_v20  ;;  %v2490_v20 = vld [vmem:[%s3185_s7 + $0x58] sm:$0xff] }
  0x91   :  { %v125_v11 = vpop.f32.mrf.mxu2 }
  0x92   :  { %v2436_v22 = vadd.f32 %v2074_v18, %v125_v11  ;;  %v2484_v11 = vld [vmem:[%s3185_s7 + $0x60] sm:$0xff] }
  0x93   :  { %313 = vmatpush.msra.mxu3 %v2484_v11 }
  0x95   :  { %314 = vmatpush.msra.mxu3 %v2490_v20 }
  0x99   :  { %v177_v19 = vpop.f32.mrf.mxu2 }
  0x9a   :  { %v2434_v21 = vadd.f32 %v177_v19, %v2425_v16 }
  0x9c   :  { %v185_v23 = vperm.slane %v2434_v21, 0  ;;  %v184_v25 = vrot.slane %v2434_v21, 1 }
  0x9e   :  { %v186_v26 = vperm.slane %v184_v25, 0  ;;  %v189_v27 = vadd.f32 %v185_v23, %v2436_v22 }
  0xa0   :  { %v190_v28 = vadd.f32 %v186_v26, %v2439_v24  ;;  %2077 = vtanh.f32 %v189_v27 }
  0xa2   :  { %2079 = vtanh.f32 %v190_v28 }
  0xa6   :  { %v2078_v30 = vpop.eup %2077 }
  0xa7   :  { %v196_v31 = vmul.f32 %v2078_v30, %v2447_v29  ;;  %v2496_v30 = vld [vmem:[%s3185_s7 + $0x50] sm:$0xff] }
  0xa8   :  { %v2080_v33 = vpop.eup %2079  ;;  %315 = vmatpush.msra.mxu3 %v2496_v30 }
  0xa9   :  { %v198_v32 = vsel %vm104_vm0, %v196_v31, 0.0  ;;  %v197_v34 = vmul.f32 %v2080_v33, %v2447_v29 }
  0xaa   :  { %199 = vadd.xlane.f32.xlu0 %v198_v32 }
  0xab   :  { %v201_v35 = vsel %vm104_vm0, %v197_v34, 0.0  ;;  %v2502_v34 = vld [vmem:[%s3185_s7 + $0x48] sm:$0xff] }
  0xac   :  { %316 = vmatpush.msra.mxu3 %v2502_v34 }
  0xb2   :  { %202 = vadd.xlane.f32.xlu0 %v201_v35 }
 0x11d   :  { %v200_v36 = vpop.xlane.xlu0 %199 }
 0x11e   :  { %v206_v38 = vperm.slane %v200_v36, %v2420_v14 }
 0x125   :  { %v203_v37 = vpop.xlane.xlu0 %202 }
 0x126   :  { %v207_v39 = vperm.slane %v203_v37, %v2420_v14 }
 0x128   :  { %v209_v40 = vsel %vm208_vm1, %v207_v39, %v206_v38  ;;  %v2508_v39 = vld [vmem:[%s3185_s7 + $0x40] sm:$0xff] }
 0x129   :  { %v212_v41 = vsel %vm211_vm2, %v209_v40, -inf  ;;  %317 = vmatpush.msra.mxu3 %v2508_v39 }
 0x12a   :  { %213 = vmax.xlane.f32.xlu1 %v212_v41 }
 0x19d   :  { %v214_v43 = vpop.xlane.xlu1 %213 }
 0x19e   :  { %v216_v44 = vperm.slane %v214_v43, 0  ;;  %v217_v45 = vperm.slane %v214_v43, 1 }
 0x1a0   :  { %v220_v46 = vsub.f32 %v200_v36, %v216_v44  ;;  %v221_v47 = vsub.f32 %v203_v37, %v217_v45  ;;  %v2514_v44 = vld [vmem:[%s3185_s7 + $0x38] sm:$0xff]  ;;  %v2520_v45 = vld [vmem:[%s3185_s7 + $0x30] sm:$0xff] }
 0x1a1   :  { %318 = vmatpush.msra.mxu3 %v2514_v44 }
 0x1a2   :  { %v222_v48 = vmul.f32 1.442695, %v220_v46  ;;  %v224_v49 = vmul.f32 1.442695, %v221_v47  ;;  %v2526_v46 = vld [vmem:[%s3185_s7 + $0x28] sm:$0xff]  ;;  %v2532_v47 = vld [vmem:[%s3185_s7 + $0x20] sm:$0xff] }
 0x1a3   :  { %319 = vmatpush.msra.mxu3 %v2520_v45 }
 0x1a4   :  { %2081 = vpow2.f32 %v222_v48  ;;  %v2545_v48 = vld [vmem:[%s3185_s7 + $0x18] sm:$0xff] }
 0x1a5   :  { %2083 = vpow2.f32 %v224_v49  ;;  %320 = vmatpush.msra.mxu3 %v2526_v46  ;;  %v2551_v49 = vld [vmem:[%s3185_s7 + $0x10] sm:$0xff] }
 0x1a7   :  { %321 = vmatpush.msra.mxu3 %v2532_v47 }
 0x1a9   :  { %322 = vmatpush.msra.mxu3 %v2545_v48 }
 0x1aa   :  { %v2082_v50 = vpop.eup %2081 }
 0x1ab   :  { %v2084_v51 = vpop.eup %2083  ;;  %229 = vperm.xlu1 %2071, %v2082_v50   ;;  %323 = vmatpush.msra.mxu3 %v2551_v49 }
 0x1ac   :  { %232 = vperm.xlu2 %2072, %v2084_v51  }
 0x206   :  { %v233_v52 = vpop.permute.xlu2 %232 }
 0x207   :  { %v235_v54 = vperm.slane %v233_v52, %v2420_v14  ;;  %v2576_v52 = vld [vmem:[%s3185_s7 + $0x90] sm:$0xff] }
 0x21d   :  { %v230_v53 = vpop.permute.xlu1 %229 }
 0x21e   :  { %v234_v55 = vperm.slane %v230_v53, %v2420_v14  ;;  %v2582_v53 = vld [vmem:[%s3185_s7 + $0x88] sm:$0xff] }
 0x220   :  { %v236_v56 = vsel %vm208_vm1, %v235_v54, %v234_v55  ;;  %v2587_v54 = vld [vmem:[%s3185_s7 + $0x80] sm:$0xff] }
 0x221   :  { %v238_v57 = vsel %vm211_vm2, %v236_v56, 0.0 }
 0x222   :  { %239 = vadd.xlane.f32.xlu2 %v238_v57 }
 0x295   :  { %v240_v58 = vpop.xlane.xlu2 %239 }
 0x296   :  { %v242_v59 = vperm.slane %v240_v58, 0  ;;  %v243_v60 = vperm.slane %v240_v58, 1 }
 0x298   :  { %2085 = vrcp.f32 %v242_v59  ;;  %v257_v19 = vand.u32 2147483648, %v242_v59  ;;  %v272_v23 = vand.u32 2147483648, %v243_v60  ;;  %v255_v26 = vand.u32 2147483647, %v242_v59 }
 0x299   :  { %2087 = vrcp.f32 %v243_v60  ;;  %v270_v28 = vand.u32 2147483647, %v243_v60  ;;  %vm251_vm5 = vweird.f32 %v242_v59  ;;  %vm266_vm6 = vweird.f32 %v243_v60 }
 0x29a   :  { %v258_v33 = vor.u32 1.1754944e-38, %v257_v19  ;;  %v273_v35 = vor.u32 1.1754944e-38, %v272_v23  ;;  %vm256_vm9 = vcmp.eq.f32.partialorder %v255_v26, 8.507059e+37 }
 0x29b   :  { %vm271_vm10 = vcmp.eq.f32.partialorder %v270_v28, 8.507059e+37 }
 0x29e   :  { %v2086_v63 = vpop.eup %2085 }
 0x29f   :  { %v2088_v1 = vpop.eup %2087  ;;  %v247_v2 = vmul.f32 %v2086_v63, %v242_v59  ;;  %vm252_vm3 = vweird.f32 %v2086_v63 }
 0x2a0   :  { %v262_v3 = vmul.f32 %v2088_v1, %v243_v60  ;;  %vm267_vm4 = vweird.f32 %v2088_v1  ;;  %vm253_vm7 = vmor %vm251_vm5, %vm252_vm3 }
 0x2a1   :  { %v248_v12 = vsub.f32 1.0, %v247_v2  ;;  %vm268_vm8 = vmor %vm266_vm6, %vm267_vm4  ;;  %vm439_vm4 = vcmask 1041408  }
 0x2a2   :  { %v263_v18 = vsub.f32 1.0, %v262_v3 }
 0x2a3   :  { %v249_v25 = vmul.f32 %v2086_v63, %v248_v12 }
 0x2a4   :  { %v264_v27 = vmul.f32 %v2088_v1, %v263_v18 }
 0x2a5   :  { %v250_v31 = vadd.f32 %v2086_v63, %v249_v25 }
 0x2a6   :  { %v265_v32 = vadd.f32 %v2088_v1, %v264_v27 }
 0x2a7   :  { %v254_v36 = vsel %vm253_vm7, %v2086_v63, %v250_v31 }
 0x2a8   :  { %v269_v37 = vsel %vm268_vm8, %v2088_v1, %v265_v32  ;;  %v259_v38 = vsel %vm256_vm9, %v258_v33, %v254_v36 }
 0x2a9   :  { %v274_v40 = vsel %vm271_vm10, %v273_v35, %v269_v37  ;;  %v260_v41 = vmul.f32 %v2082_v50, %v259_v38  ;;  %v2268_v50 = vmov 1.0  }
 0x2aa   :  { %v275_v43 = vmul.f32 %v2084_v51, %v274_v40  ;;  %v2570_v51 = vld [vmem:[%s3185_s7 + $0x98] sm:$0xff]  ;;  %v2610_v40 = vld [vmem:[%s3186_s8] ss:$0 sm:$0xff]  ;;  %s2269_s8 = smov 64  }
 0x2ab   :  { %278 = vperm.xlu0 %2073, %v260_v41  }
 0x2ac   :  { %283 = vperm.xlu1 %2071, %v275_v43  }
 0x2b4   :  { %350 = vrot.lane.b32.xlu1 %v2434_v21, %s2266_s6 }
 0x2bc   :  { %373 = vrot.lane.b32.xlu1 %v2434_v21, %s2267_s17  ;;  %v2557_v21 = vld [vmem:[%s3185_s7 + $0x8] sm:$0xff] }
 0x2bd   :  { %324 = vmatpush.msra.mxu3 %v2557_v21 }
 0x2c4   :  { %389 = vrot.lane.b32.xlu1 %v2406_v10, %s2267_s17  ;;  %v2563_v10 = vld [vmem:[%s3185_s7] sm:$0xff] }
 0x2c5   :  { %325 = vmatpush.msra.mxu3 %v2563_v10 }
 0x2c6   :  { %1996 = vmatmul.msk.f32.vlgmr.msra.gmra.mxu3 %vm180_vm11, %v2268_v50 }
 0x2c7   :  { %342 = vmatpush.msrb.mxu3 %v2570_v51 }
 0x2c9   :  { %343 = vmatpush.msrb.mxu3 %v2576_v52 }
 0x2cb   :  { %344 = vmatpush.msrb.mxu3 %v2582_v53 }
 0x2cd   :  { %345 = vmatpush.msrb.mxu3 %v2587_v54 }
 0x31d   :  { %v279_v55 = vpop.permute.xlu0 %278 }
 0x31e   :  { %v284_v56 = vpop.permute.xlu1 %283  ;;  %v286_v57 = vmul.f32 %v279_v55, %v2369_v4  ;;  %v457_v58 = vperm.slane %v279_v55, %v2420_v14 }
 0x31f   :  { %v287_v59 = vmul.f32 %v284_v56, %v2374_v5  ;;  %v458_v60 = vperm.slane %v284_v56, %v2420_v14 }
 0x320   :  { %v288_v63 = vsel %vm104_vm0, %v286_v57, 0.0 }
 0x321   :  { %v295_v1 = vsel %vm104_vm0, %v287_v59, 0.0  ;;  %v289_v2 = vrot.slane %v288_v63, 4  ;;  %v459_v3 = vsel %vm208_vm1, %v458_v60, %v457_v58 }
 0x322   :  { %v296_v12 = vrot.slane %v295_v1, 4  ;;  %v462_v18 = vsel %vm461_vm12, %v459_v3, 0.0 }
 0x323   :  { %v290_v19 = vadd.f32 %v289_v2, %v288_v63  ;;  %v464_v23 = vrot.slane %v462_v18, 1  ;;  %466 = vst [vmem:[%s3191_s13] sm:$0x1] %v462_v18 }
 0x324   :  { %v297_v25 = vadd.f32 %v296_v12, %v295_v1 }
 0x325   :  { %v291_v26 = vrot.slane %v290_v19, 2  ;;  %467 = vst [vmem:[%s3191_s13 + $0x8] sm:$0x1] %v464_v23 }
 0x326   :  { %v298_v27 = vrot.slane %v297_v25, 2  ;;  %v351_v55 = vpop.permute.xlu1 %350 }
 0x327   :  { %v292_v28 = vadd.f32 %v291_v26, %v290_v19 }
 0x328   :  { %v299_v31 = vadd.f32 %v298_v27, %v297_v25 }
 0x329   :  { %v293_v32 = vrot.slane %v292_v28, 1 }
 0x32a   :  { %v300_v33 = vrot.slane %v299_v31, 1 }
 0x32b   :  { %v294_v35 = vadd.f32 %v293_v32, %v292_v28 }
 0x32c   :  { %v301_v36 = vadd.f32 %v300_v33, %v299_v31  ;;  %v2618_v33 = vld [vmem:[%s3187_s9 + $0x30] sm:$0xff] }
 0x32d   :  { %411 = vmatpush.msrb.mxu1 %v2618_v33 }
 0x32e   :  { %v304_v37 = vsel %vm208_vm1, %v301_v36, %v294_v35  ;;  %v374_v25 = vpop.permute.xlu1 %373  ;;  %v2623_v35 = vld [vmem:[%s3187_s9 + $0x20] sm:$0xff]  ;;  %v2629_v36 = vld [vmem:[%s3187_s9 + $0x10] sm:$0xff] }
 0x32f   :  { %1997 = vmatmul.msk.f32.vlgmr.msrb.gmra.mxu3 %vm104_vm0, %v304_v37  ;;  %412 = vmatpush.msrb.mxu1 %v2623_v35  ;;  %v2635_v37 = vld [vmem:[%s3187_s9] sm:$0xff] }
 0x331   :  { %413 = vmatpush.msrb.mxu1 %v2629_v36 }
 0x333   :  { %414 = vmatpush.msrb.mxu1 %v2635_v37 }
 0x349   :  { %v327_v38 = vpop.f32.mrf.mxu3 }
 0x34a   :  { %v328_v41 = vadd.f32 %v2610_v40, %v327_v38  ;;  %v390_v38 = vpop.permute.xlu1 %389 }
 0x3b2   :  { %v347_v43 = vpop.f32.mrf.mxu3 }
 0x3b3   :  { %v348_v50 = vadd.f32 %v347_v43, %v328_v41 }
 0x3b5   :  { %v353_v56 = vadd.f32 %v351_v55, %v348_v50 }
 0x3b7   :  { %v1998_v57 = vmul.f32 -1.442695, %v353_v56 }
 0x3b9   :  { %2089 = vpow2.f32 %v1998_v57 }
 0x3bf   :  { %v2090_v58 = vpop.eup %2089 }
 0x3c0   :  { %v357_v59 = vadd.f32 1.0, %v2090_v58  ;;  %v2646_v58 = vperm.slane %v2418_v13, 0 }
 0x3c2   :  { %2091 = vrcp.f32 %v357_v59  ;;  %v369_v2 = vand.u32 2147483648, %v357_v59  ;;  %v367_v12 = vand.u32 2147483647, %v357_v59  ;;  %vm363_vm14 = vweird.f32 %v357_v59 }
 0x3c4   :  { %v370_v19 = vor.u32 1.1754944e-38, %v369_v2  ;;  %vm368_vm3 = vcmp.eq.f32.partialorder %v367_v12, 8.507059e+37 }
 0x3c8   :  { %v2092_v60 = vpop.eup %2091 }
 0x3c9   :  { %v359_v63 = vmul.f32 %v2092_v60, %v357_v59  ;;  %vm364_vm13 = vweird.f32 %v2092_v60 }
 0x3ca   :  { %vm365_vm15 = vmor %vm363_vm14, %vm364_vm13 }
 0x3cb   :  { %v360_v1 = vsub.f32 1.0, %v359_v63 }
 0x3cd   :  { %v361_v3 = vmul.f32 %v2092_v60, %v360_v1 }
 0x3cf   :  { %v362_v18 = vadd.f32 %v2092_v60, %v361_v3 }
 0x3d1   :  { %v366_v23 = vsel %vm365_vm15, %v2092_v60, %v362_v18 }
 0x3d2   :  { %v371_v26 = vsel %vm368_vm3, %v370_v19, %v366_v23 }
 0x3d3   :  { %v376_v27 = vmul.f32 %v374_v25, %v371_v26  ;;  %v383_v41 = vsub.f32 1.0, %v371_v26 }
 0x3d5   :  { %378 = vrot.lane.b32.xlu2 %v376_v27, %s2269_s8 }
 0x42f   :  { %v379_v28 = vpop.permute.xlu2 %378 }
 0x430   :  { %v381_v31 = vadd.f32 %v379_v28, %v348_v50  ;;  %v392_v50 = vmul.f32 %v390_v38, %v371_v26 }
 0x432   :  { %2093 = vtanh.f32 %v381_v31 }
 0x438   :  { %v2094_v32 = vpop.eup %2093 }
 0x439   :  { %385 = vrot.lane.b32.xlu0 %v2094_v32, %s2266_s6 }
 0x4ab   :  { %v386_v43 = vpop.permute.xlu0 %385 }
 0x4ac   :  { %v388_v55 = vmul.f32 %v386_v43, %v383_v41 }
 0x4ae   :  { %v2639_v56 = vadd.f32 %v392_v50, %v388_v55 }
 0x4b0   :  { %395 = vrot.lane.b32.xlu0 %v2639_v56, %s2266_s6 }
 0x522   :  { %v396_v57 = vpop.permute.xlu0 %395 }
 0x523   :  { %1999 = vmatmul.msk.f32.vlgmr.msrb.gmra.mxu1 %vm104_vm0, %v396_v57  ;;  %2000 = vmatmul.msk.f32.vlgmr.msra.gmra.mxu2 %vm104_vm0, %v396_v57 }
 0x5a0   :  { %v416_v59 = vpop.f32.mrf.mxu1 }
 0x5a1   :  { %v417_v60 = vadd.f32 %v416_v59, %v2646_v58 }
 0x5a3   :  { %v440_v63 = vsel %vm439_vm4, %v417_v60, -inf }
 0x5a4   :  { %441 = vmax.xlane.f32.xlu1 %v440_v63 }
 0x5a6   :  { %v436_v1 = vpop.f32.mrf.mxu2 }
 0x5a7   :  { %v2651_v2 = vadd.f32 %v436_v1, %v2425_v16 }
 0x617   :  { %v442_v3 = vpop.xlane.xlu1 %441 }
 0x618   :  { %v443_v12 = vsub.f32 %v417_v60, %v442_v3 }
 0x61a   :  { %v444_v18 = vmul.f32 1.442695, %v443_v12 }
 0x61c   :  { %2095 = vpow2.f32 %v444_v18 }
 0x622   :  { %v2096_v19 = vpop.eup %2095 }
 0x623   :  { %v446_v23 = vsel %vm439_vm4, %v2096_v19, 0.0 }
 0x624   :  { %447 = vadd.xlane.f32.xlu0 %v446_v23 }
 0x697   :  { %v448_v13 = vpop.xlane.xlu0 %447 }
 0x698   :  { %2097 = vlog2.f32 %v448_v13 }
 0x69e   :  { %v2098_v25 = vpop.eup %2097 }
 0x69f   :  { %v450_v26 = vmul.f32 0.6931472, %v2098_v25 }
 0x6a1   :  { %v451_v27 = vsub.f32 %v443_v12, %v450_v26  ;;  %470 = sbr.rel (%p2001_p0) target bundleno = 1708 (0x6ac), region = 53 }
 0x6a3   :  { %v453_v28 = vrot.slane %v451_v27, 1  ;;  %455 = vst [vmem:[%s3189_s11] sm:$0x1] %v451_v27 }
 0x6a5   :  { %456 = vst [vmem:[%s3189_s11 + $0x8] sm:$0x1] %v453_v28 }
 0x6a6   :  { %vm472_vm5 = vcmp.eq.s32.totalorder %v2422_v15, 0  ;;  %v473_v31 = vstv %s471_s29  ;;  %vm479_vm7 = vcmp.eq.s32.totalorder %v2422_v15, 1  ;;  %v480_v32 = vstv %s2003_s30 }
 0x6a7   :  { %vm474_vm6 = vcmp.eq.s32.totalorder %v2420_v14, %v473_v31  ;;  %v2270_v38 = vmov 0.0   ;;  %vm481_vm8 = vcmp.eq.s32.totalorder %v2420_v14, %v480_v32 }
 0x6a8   :  { %v2002_v41 = vsel %vm474_vm6, 1.0, %v2270_v38  ;;  %v2004_v50 = vsel %vm481_vm8, 1.0, %v2270_v38 }
 0x6a9   :  { %v477_v43 = vsel %vm472_vm5, %v2002_v41, 0.0 }
 0x6aa   :  { %v484_v55 = vsel %vm479_vm7, %v2004_v50, %v477_v43 }
 0x6ab   :  { %485 = vst [vmem:[#allocation2] sm:$0x3] %v484_v55 }
 0x6ac PF:  { %p2005_p1 = scmp.ne.s32.totalorder %s3178_s0, 0 }
 0x6ae   :  { %489 = sbr.rel (%p2005_p1) target bundleno = 1837 (0x72d), region = 57 }
 0x6b3   :  { %vm490_vm9 = vcmp.eq.f32.partialorder %v417_v60, %v442_v3  ;;  %v2271_v1 = vmov 0.0  }
 0x6b4   :  { %v491_v57 = vsel %vm490_vm9, %v2428_v17, 128.0 }
 0x6b5   :  { %v492_v59 = vsel %vm439_vm4, %v491_v57, inf }
 0x6b6   :  { %493 = vmin.xlane.f32.xlu0 %v492_v59 }
 0x729   :  { %v494_v63 = vpop.xlane.xlu0 %493 }
 0x72a   :  { %vm495_vm10 = vcmp.eq.f32.partialorder %v2428_v17, %v494_v63 }
 0x72b   :  { %v2006_v12 = vsel %vm495_vm10, 1.0, %v2271_v1 }
 0x72c   :  { %498 = vst [vmem:[#allocation2] sm:$0x3] %v2006_v12 }
 0x72d PF:  { %v502_v18 = vperm.slane %v2651_v2, 0  ;;  %v501_v19 = vrot.slane %v2651_v2, 1  ;;  %2100 = vset.pattern.permute.xlu2 %v3192_v42  ;;  %2099 = vset.pattern.permute.xlu1 %v3192_v42  ;;  %s2012_s9 = sld [smem:[#allocation4 + $0x80]] (!%p2001_p0) }
 0x72e   :  { %2101 = vset.pattern.permute.xlu0 %v3192_v42  ;;  %619 = vmatpush.msra.mxu0 %v2467_v61  ;;  %s2014_s24 = sld [smem:[#allocation4 + $0x81]] (!%p2001_p0) }
 0x72f   :  { %v506_v60 = vadd.f32 %v502_v18, %v2436_v22  ;;  %v503_v3 = vperm.slane %v501_v19, 0  ;;  %651 = vmatpush.msra.mxu1 %v2570_v51  ;;  %717 = vmatpush.msrb.mxu2 %v2618_v33 }
 0x730   :  { %620 = vmatpush.msra.mxu0 %v2472_v62 }
 0x731   :  { %2102 = vtanh.f32 %v506_v60  ;;  %v507_v23 = vadd.f32 %v503_v3, %v2439_v24  ;;  %652 = vmatpush.msra.mxu1 %v2576_v52  ;;  %718 = vmatpush.msrb.mxu2 %v2623_v35 }
 0x732   :  { %621 = vmatpush.msra.mxu0 %v2478_v0 }
 0x733   :  { %2104 = vtanh.f32 %v507_v23  ;;  %653 = vmatpush.msra.mxu1 %v2582_v53  ;;  %719 = vmatpush.msrb.mxu2 %v2629_v36 }
 0x734   :  { %622 = vmatpush.msra.mxu0 %v2484_v11 }
 0x735   :  { %654 = vmatpush.msra.mxu1 %v2587_v54  ;;  %720 = vmatpush.msrb.mxu2 %v2635_v37 }
 0x736   :  { %623 = vmatpush.msra.mxu0 %v2490_v20 }
 0x737   :  { %737 = vmatpush.msrb.mxu1 %v2379_v6  ;;  %v2103_v13 = vpop.eup %2102 }
 0x738   :  { %v510_v25 = vmul.f32 %v2103_v13, %v2447_v29  ;;  %624 = vmatpush.msra.mxu0 %v2496_v30 }
 0x739   :  { %738 = vmatpush.msrb.mxu1 %v2386_v7  ;;  %v2105_v26 = vpop.eup %2104 }
 0x73a   :  { %v512_v27 = vsel %vm104_vm0, %v510_v25, 0.0  ;;  %625 = vmatpush.msra.mxu0 %v2502_v34  ;;  %v511_v28 = vmul.f32 %v2105_v26, %v2447_v29 }
 0x73b   :  { %739 = vmatpush.msrb.mxu1 %v2394_v8  ;;  %513 = vadd.xlane.f32.xlu0 %v512_v27 }
 0x73c   :  { %626 = vmatpush.msra.mxu0 %v2508_v39  ;;  %v515_v31 = vsel %vm104_vm0, %v511_v28, 0.0 }
 0x73d   :  { %740 = vmatpush.msrb.mxu1 %v2400_v9 }
 0x73e   :  { %627 = vmatpush.msra.mxu0 %v2514_v44 }
 0x740   :  { %628 = vmatpush.msra.mxu0 %v2520_v45 }
 0x742   :  { %629 = vmatpush.msra.mxu0 %v2526_v46 }
 0x743   :  { %516 = vadd.xlane.f32.xlu0 %v515_v31 }
 0x744   :  { %630 = vmatpush.msra.mxu0 %v2532_v47 }
 0x746   :  { %631 = vmatpush.msra.mxu0 %v2545_v48 }
 0x748   :  { %632 = vmatpush.msra.mxu0 %v2551_v49 }
 0x74a   :  { %633 = vmatpush.msra.mxu0 %v2557_v21 }
 0x74c   :  { %634 = vmatpush.msra.mxu0 %v2563_v10 }
 0x7ae   :  { %v514_v32 = vpop.xlane.xlu0 %513 }
 0x7af   :  { %v520_v41 = vperm.slane %v514_v32, %v2420_v14 }
 0x7b6   :  { %v517_v38 = vpop.xlane.xlu0 %516 }
 0x7b7   :  { %v521_v43 = vperm.slane %v517_v38, %v2420_v14 }
 0x7b9   :  { %v522_v50 = vsel %vm208_vm1, %v521_v43, %v520_v41 }
 0x7ba   :  { %v524_v55 = vsel %vm211_vm2, %v522_v50, -inf }
 0x7bb   :  { %525 = vmax.xlane.f32.xlu1 %v524_v55 }
 0x82e   :  { %v526_v57 = vpop.xlane.xlu1 %525 }
 0x82f   :  { %v528_v59 = vperm.slane %v526_v57, 0  ;;  %v529_v63 = vperm.slane %v526_v57, 1 }
 0x831   :  { %v532_v1 = vsub.f32 %v514_v32, %v528_v59  ;;  %v533_v12 = vsub.f32 %v517_v38, %v529_v63 }
 0x833   :  { %v534_v18 = vmul.f32 1.442695, %v532_v1  ;;  %v536_v19 = vmul.f32 1.442695, %v533_v12 }
 0x835   :  { %2106 = vpow2.f32 %v534_v18 }
 0x836   :  { %2108 = vpow2.f32 %v536_v19 }
 0x83b   :  { %v2107_v60 = vpop.eup %2106 }
 0x83c   :  { %v2109_v3 = vpop.eup %2108  ;;  %541 = vperm.xlu1 %2099, %v2107_v60  }
 0x83d   :  { %544 = vperm.xlu2 %2100, %v2109_v3  }
 0x897   :  { %v545_v23 = vpop.permute.xlu2 %544 }
 0x898   :  { %v547_v25 = vperm.slane %v545_v23, %v2420_v14 }
 0x8ae   :  { %v542_v13 = vpop.permute.xlu1 %541 }
 0x8af   :  { %v546_v26 = vperm.slane %v542_v13, %v2420_v14 }
 0x8b1   :  { %v548_v27 = vsel %vm208_vm1, %v547_v25, %v546_v26 }
 0x8b2   :  { %v550_v28 = vsel %vm211_vm2, %v548_v27, 0.0 }
 0x8b3   :  { %551 = vadd.xlane.f32.xlu2 %v550_v28 }
 0x926   :  { %v552_v31 = vpop.xlane.xlu2 %551 }
 0x927   :  { %v554_v32 = vperm.slane %v552_v31, 0  ;;  %v555_v38 = vperm.slane %v552_v31, 1 }
 0x929   :  { %2110 = vrcp.f32 %v554_v32  ;;  %v569_v63 = vand.u32 2147483648, %v554_v32  ;;  %v584_v1 = vand.u32 2147483648, %v555_v38  ;;  %v567_v18 = vand.u32 2147483647, %v554_v32 }
 0x92a   :  { %2112 = vrcp.f32 %v555_v38  ;;  %v582_v23 = vand.u32 2147483647, %v555_v38  ;;  %vm563_vm14 = vweird.f32 %v554_v32  ;;  %vm578_vm15 = vweird.f32 %v555_v38 }
 0x92b   :  { %v570_v26 = vor.u32 1.1754944e-38, %v569_v63  ;;  %v585_v27 = vor.u32 1.1754944e-38, %v584_v1  ;;  %vm568_vm6 = vcmp.eq.f32.partialorder %v567_v18, 8.507059e+37 }
 0x92c   :  { %vm583_vm7 = vcmp.eq.f32.partialorder %v582_v23, 8.507059e+37 }
 0x92f   :  { %v2111_v41 = vpop.eup %2110 }
 0x930   :  { %v2113_v43 = vpop.eup %2112  ;;  %v559_v50 = vmul.f32 %v2111_v41, %v554_v32  ;;  %vm564_vm11 = vweird.f32 %v2111_v41  ;;  %v499_v32 = vld [vmem:[#allocation2] sm:$0x3] }
 0x931   :  { %v574_v55 = vmul.f32 %v2113_v43, %v555_v38  ;;  %vm579_vm13 = vweird.f32 %v2113_v43  ;;  %vm565_vm3 = vmor %vm563_vm14, %vm564_vm11  ;;  %635 = vmatmul.f32.vlgmr.msra.gmra.mxu0 %v499_v32 }
 0x932   :  { %v560_v57 = vsub.f32 1.0, %v559_v50  ;;  %vm580_vm5 = vmor %vm578_vm15, %vm579_vm13 }
 0x933   :  { %v575_v59 = vsub.f32 1.0, %v574_v55 }
 0x934   :  { %v561_v12 = vmul.f32 %v2111_v41, %v560_v57 }
 0x935   :  { %v576_v19 = vmul.f32 %v2113_v43, %v575_v59 }
 0x936   :  { %v562_v13 = vadd.f32 %v2111_v41, %v561_v12 }
 0x937   :  { %v577_v25 = vadd.f32 %v2113_v43, %v576_v19 }
 0x938   :  { %v566_v28 = vsel %vm565_vm3, %v2111_v41, %v562_v13 }
 0x939   :  { %v581_v31 = vsel %vm580_vm5, %v2113_v43, %v577_v25  ;;  %v571_v50 = vsel %vm568_vm6, %v570_v26, %v566_v28 }
 0x93a   :  { %v586_v55 = vsel %vm583_vm7, %v585_v27, %v581_v31  ;;  %v572_v57 = vmul.f32 %v2107_v60, %v571_v50 }
 0x93b   :  { %v587_v42 = vmul.f32 %v2109_v3, %v586_v55 }
 0x93c   :  { %590 = vperm.xlu0 %2101, %v572_v57  }
 0x93d   :  { %595 = vperm.xlu1 %2099, %v587_v42  }
 0x945   :  { %659 = vrot.lane.b32.xlu1 %v2651_v2, %s2266_s6 }
 0x94d   :  { %682 = vrot.lane.b32.xlu1 %v2651_v2, %s2267_s17 }
 0x9ae   :  { %v591_v38 = vpop.permute.xlu0 %590 }
 0x9af   :  { %v596_v59 = vpop.permute.xlu1 %595  ;;  %v598_v41 = vmul.f32 %v591_v38, %v2369_v4  ;;  %v762_v43 = vperm.slane %v591_v38, %v2420_v14  ;;  %v636_v38 = vpop.f32.mrf.mxu0 }
 0x9b0   :  { %v599_v63 = vmul.f32 %v596_v59, %v2374_v5  ;;  %v763_v60 = vperm.slane %v596_v59, %v2420_v14  ;;  %v637_v59 = vadd.f32 %v2610_v40, %v636_v38 }
 0x9b1   :  { %v600_v42 = vsel %vm104_vm0, %v598_v41, 0.0 }
 0x9b2   :  { %v607_v3 = vsel %vm104_vm0, %v599_v63, 0.0  ;;  %v601_v1 = vrot.slane %v600_v42, 4  ;;  %v764_v12 = vsel %vm208_vm1, %v763_v60, %v762_v43 }
 0x9b3   :  { %v608_v2 = vrot.slane %v607_v3, 4  ;;  %v766_v18 = vsel %vm461_vm12, %v764_v12, 0.0 }
 0x9b4   :  { %v602_v19 = vadd.f32 %v601_v1, %v600_v42  ;;  %v768_v23 = vrot.slane %v766_v18, 1  ;;  %770 = vst [vmem:[%s3191_s13 + $0x1] sm:$0x1] %v766_v18 }
 0x9b5   :  { %v609_v13 = vadd.f32 %v608_v2, %v607_v3 }
 0x9b6   :  { %v603_v25 = vrot.slane %v602_v19, 2  ;;  %771 = vst [vmem:[%s3191_s13 + $0x9] sm:$0x1] %v768_v23 }
 0x9b7   :  { %v610_v26 = vrot.slane %v609_v13, 2  ;;  %v660_v43 = vpop.permute.xlu1 %659 }
 0x9b8   :  { %v604_v27 = vadd.f32 %v603_v25, %v602_v19 }
 0x9b9   :  { %v611_v28 = vadd.f32 %v610_v26, %v609_v13 }
 0x9ba   :  { %v605_v31 = vrot.slane %v604_v27, 1 }
 0x9bb   :  { %v612_v50 = vrot.slane %v611_v28, 1 }
 0x9bc   :  { %v606_v55 = vadd.f32 %v605_v31, %v604_v27 }
 0x9bd   :  { %v613_v57 = vadd.f32 %v612_v50, %v611_v28 }
 0x9bf   :  { %v616_v32 = vsel %vm208_vm1, %v613_v57, %v606_v55  ;;  %v683_v26 = vpop.permute.xlu1 %682 }
 0x9c0   :  { %2007 = vmatmul.msk.f32.vlgmr.msra.gmra.mxu1 %vm104_vm0, %v616_v32 }
 0xa3d   :  { %v656_v41 = vpop.f32.mrf.mxu1 }
 0xa3e   :  { %v657_v63 = vadd.f32 %v656_v41, %v637_v59 }
 0xa40   :  { %v662_v60 = vadd.f32 %v660_v43, %v657_v63 }
 0xa42   :  { %v2008_v42 = vmul.f32 -1.442695, %v662_v60 }
 0xa44   :  { %2114 = vpow2.f32 %v2008_v42 }
 0xa4a   :  { %v2115_v3 = vpop.eup %2114 }
 0xa4b   :  { %v666_v1 = vadd.f32 1.0, %v2115_v3 }
 0xa4d   :  { %2116 = vrcp.f32 %v666_v1  ;;  %v678_v19 = vand.u32 2147483648, %v666_v1  ;;  %v676_v13 = vand.u32 2147483647, %v666_v1  ;;  %vm672_vm9 = vweird.f32 %v666_v1 }
 0xa4f   :  { %v679_v27 = vor.u32 1.1754944e-38, %v678_v19  ;;  %vm677_vm11 = vcmp.eq.f32.partialorder %v676_v13, 8.507059e+37 }
 0xa53   :  { %v2117_v12 = vpop.eup %2116 }
 0xa54   :  { %v668_v2 = vmul.f32 %v2117_v12, %v666_v1  ;;  %vm673_vm8 = vweird.f32 %v2117_v12 }
 0xa55   :  { %vm674_vm10 = vmor %vm672_vm9, %vm673_vm8 }
 0xa56   :  { %v669_v18 = vsub.f32 1.0, %v668_v2 }
 0xa58   :  { %v670_v23 = vmul.f32 %v2117_v12, %v669_v18 }
 0xa5a   :  { %v671_v25 = vadd.f32 %v2117_v12, %v670_v23 }
 0xa5c   :  { %v675_v28 = vsel %vm674_vm10, %v2117_v12, %v671_v25 }
 0xa5d   :  { %v680_v31 = vsel %vm677_vm11, %v679_v27, %v675_v28 }
 0xa5e   :  { %v685_v50 = vmul.f32 %v683_v26, %v680_v31  ;;  %v692_v38 = vsub.f32 1.0, %v680_v31  ;;  %v698_v43 = vmul.f32 %v680_v31, %v2639_v56 }
 0xa60   :  { %687 = vrot.lane.b32.xlu2 %v685_v50, %s2269_s8 }
 0xaba   :  { %v688_v55 = vpop.permute.xlu2 %687 }
 0xabb   :  { %v690_v57 = vadd.f32 %v688_v55, %v657_v63 }
 0xabd   :  { %2118 = vtanh.f32 %v690_v57 }
 0xac3   :  { %v2119_v32 = vpop.eup %2118 }
 0xac4   :  { %694 = vrot.lane.b32.xlu0 %v2119_v32, %s2266_s6 }
 0xb36   :  { %v695_v59 = vpop.permute.xlu0 %694 }
 0xb37   :  { %v697_v41 = vmul.f32 %v695_v59, %v692_v38 }
 0xb39   :  { %v2752_v60 = vadd.f32 %v698_v43, %v697_v41 }
 0xb3b   :  { %701 = vrot.lane.b32.xlu1 %v2752_v60, %s2266_s6 }
 0xbad   :  { %v702_v42 = vpop.permute.xlu1 %701 }
 0xbae   :  { %2009 = vmatmul.msk.f32.vlgmr.msrb.gmra.mxu2 %vm104_vm0, %v702_v42  ;;  %2010 = vmatmul.msk.f32.vlgmr.msrb.gmra.mxu1 %vm104_vm0, %v702_v42 }
 0xc2b   :  { %v742_v63 = vpop.f32.mrf.mxu1 }
 0xc2c   :  { %v2759_v3 = vadd.f32 %v742_v63, %v2425_v16 }
 0xc31   :  { %v722_v1 = vpop.f32.mrf.mxu2 }
 0xc32   :  { %v723_v12 = vadd.f32 %v722_v1, %v2646_v58 }
 0xc34   :  { %v745_v2 = vsel %vm439_vm4, %v723_v12, -inf }
 0xc35   :  { %746 = vmax.xlane.f32.xlu0 %v745_v2 }
 0xca8   :  { %v747_v56 = vpop.xlane.xlu0 %746 }
 0xca9   :  { %v748_v18 = vsub.f32 %v723_v12, %v747_v56 }
 0xcab   :  { %v749_v19 = vmul.f32 1.442695, %v748_v18 }
 0xcad   :  { %2120 = vpow2.f32 %v749_v19 }
 0xcb3   :  { %v2121_v23 = vpop.eup %2120 }
 0xcb4   :  { %v751_v13 = vsel %vm439_vm4, %v2121_v23, 0.0 }
 0xcb5   :  { %752 = vadd.xlane.f32.xlu1 %v751_v13 }
 0xd28   :  { %v753_v25 = vpop.xlane.xlu1 %752 }
 0xd29   :  { %2122 = vlog2.f32 %v753_v25 }
 0xd2f   :  { %v2123_v26 = vpop.eup %2122 }
 0xd30   :  { %v755_v27 = vmul.f32 0.6931472, %v2123_v26 }
 0xd32   :  { %v756_v28 = vsub.f32 %v748_v18, %v755_v27  ;;  %774 = sbr.rel (%p2001_p0) target bundleno = 3389 (0xd3d), region = 61 }
 0xd34   :  { %v758_v31 = vrot.slane %v756_v28, 1  ;;  %760 = vst [vmem:[%s3189_s11 + $0x1] sm:$0x1] %v756_v28 }
 0xd36   :  { %761 = vst [vmem:[%s3189_s11 + $0x9] sm:$0x1] %v758_v31 }
 0xd37   :  { %vm776_vm13 = vcmp.eq.s32.totalorder %v2422_v15, 0  ;;  %v777_v50 = vstv %s2012_s9  ;;  %vm783_vm15 = vcmp.eq.s32.totalorder %v2422_v15, 1  ;;  %v784_v55 = vstv %s2014_s24 }
 0xd38   :  { %vm778_vm14 = vcmp.eq.s32.totalorder %v2420_v14, %v777_v50  ;;  %v2272_v57 = vmov 0.0   ;;  %vm785_vm3 = vcmp.eq.s32.totalorder %v2420_v14, %v784_v55 }
 0xd39   :  { %v2013_v32 = vsel %vm778_vm14, 1.0, %v2272_v57  ;;  %v2015_v59 = vsel %vm785_vm3, 1.0, %v2272_v57 }
 0xd3a   :  { %v781_v38 = vsel %vm776_vm13, %v2013_v32, 0.0 }
 0xd3b   :  { %v788_v41 = vsel %vm783_vm15, %v2015_v59, %v781_v38 }
 0xd3c   :  { %789 = vst [vmem:[#allocation2] sm:$0x3] %v788_v41 }
 0xd3d PF:  { %792 = sbr.rel (%p2005_p1) target bundleno = 3516 (0xdbc), region = 65 }
 0xd42   :  { %vm793_vm5 = vcmp.eq.f32.partialorder %v723_v12, %v747_v56  ;;  %v2273_v1 = vmov 0.0  }
 0xd43   :  { %v794_v43 = vsel %vm793_vm5, %v2428_v17, 128.0 }
 0xd44   :  { %v795_v42 = vsel %vm439_vm4, %v794_v43, inf }
 0xd45   :  { %796 = vmin.xlane.f32.xlu0 %v795_v42 }
 0xdb8   :  { %v797_v63 = vpop.xlane.xlu0 %796 }
 0xdb9   :  { %vm798_vm6 = vcmp.eq.f32.partialorder %v2428_v17, %v797_v63 }
 0xdba   :  { %v2017_v2 = vsel %vm798_vm6, 1.0, %v2273_v1 }
 0xdbb   :  { %801 = vst [vmem:[#allocation2] sm:$0x3] %v2017_v2 }
 0xdbc PF:  { %v805_v18 = vperm.slane %v2759_v3, 0  ;;  %v804_v19 = vrot.slane %v2759_v3, 1  ;;  %v3197_v23 = vmov 0   ;;  %922 = vmatpush.msra.mxu2 %v2467_v61  ;;  %954 = vmatpush.msra.mxu1 %v2570_v51  ;;  %s2023_s16 = sld [smem:[#allocation4 + $0x100]] (!%p2001_p0) }
 0xdbd   :  { %2125 = vset.pattern.permute.xlu2 %v3197_v23  ;;  %2124 = vset.pattern.permute.xlu1 %v3197_v23  ;;  %s2025_s5 = sld [smem:[#allocation4 + $0x101]] (!%p2001_p0) }
 0xdbe   :  { %2126 = vset.pattern.permute.xlu0 %v3197_v23  ;;  %v809_v12 = vadd.f32 %v805_v18, %v2436_v22  ;;  %v806_v56 = vperm.slane %v804_v19, 0  ;;  %1020 = vmatpush.msra.mxu3 %v2618_v33 }
 0xdbf   :  { %923 = vmatpush.msra.mxu2 %v2472_v62  ;;  %955 = vmatpush.msra.mxu1 %v2576_v52 }
 0xdc0   :  { %2127 = vtanh.f32 %v809_v12  ;;  %v810_v13 = vadd.f32 %v806_v56, %v2439_v24  ;;  %1021 = vmatpush.msra.mxu3 %v2623_v35 }
 0xdc1   :  { %924 = vmatpush.msra.mxu2 %v2478_v0  ;;  %956 = vmatpush.msra.mxu1 %v2582_v53 }
 0xdc2   :  { %2129 = vtanh.f32 %v810_v13  ;;  %1022 = vmatpush.msra.mxu3 %v2629_v36 }
 0xdc3   :  { %925 = vmatpush.msra.mxu2 %v2484_v11  ;;  %957 = vmatpush.msra.mxu1 %v2587_v54 }
 0xdc4   :  { %1023 = vmatpush.msra.mxu3 %v2635_v37 }
 0xdc5   :  { %926 = vmatpush.msra.mxu2 %v2490_v20  ;;  %1040 = vmatpush.msrb.mxu1 %v2379_v6 }
 0xdc6   :  { %v2128_v25 = vpop.eup %2127 }
 0xdc7   :  { %v813_v26 = vmul.f32 %v2128_v25, %v2447_v29  ;;  %927 = vmatpush.msra.mxu2 %v2496_v30  ;;  %1041 = vmatpush.msrb.mxu1 %v2386_v7 }
 0xdc8   :  { %v2130_v27 = vpop.eup %2129 }
 0xdc9   :  { %v815_v28 = vsel %vm104_vm0, %v813_v26, 0.0  ;;  %928 = vmatpush.msra.mxu2 %v2502_v34  ;;  %1042 = vmatpush.msrb.mxu1 %v2394_v8  ;;  %v814_v31 = vmul.f32 %v2130_v27, %v2447_v29 }
 0xdca   :  { %816 = vadd.xlane.f32.xlu0 %v815_v28 }
 0xdcb   :  { %929 = vmatpush.msra.mxu2 %v2508_v39  ;;  %1043 = vmatpush.msrb.mxu1 %v2400_v9  ;;  %v818_v50 = vsel %vm104_vm0, %v814_v31, 0.0 }
 0xdcd   :  { %930 = vmatpush.msra.mxu2 %v2514_v44 }
 0xdcf   :  { %931 = vmatpush.msra.mxu2 %v2520_v45 }
 0xdd1   :  { %932 = vmatpush.msra.mxu2 %v2526_v46 }
 0xdd2   :  { %819 = vadd.xlane.f32.xlu0 %v818_v50 }
 0xdd3   :  { %933 = vmatpush.msra.mxu2 %v2532_v47 }
 0xdd5   :  { %934 = vmatpush.msra.mxu2 %v2545_v48 }
 0xdd7   :  { %935 = vmatpush.msra.mxu2 %v2551_v49 }
 0xdd9   :  { %936 = vmatpush.msra.mxu2 %v2557_v21 }
 0xddb   :  { %937 = vmatpush.msra.mxu2 %v2563_v10 }
 0xe3d   :  { %v817_v55 = vpop.xlane.xlu0 %816 }
 0xe3e   :  { %v823_v32 = vperm.slane %v817_v55, %v2420_v14 }
 0xe45   :  { %v820_v57 = vpop.xlane.xlu0 %819 }
 0xe46   :  { %v824_v38 = vperm.slane %v820_v57, %v2420_v14 }
 0xe48   :  { %v825_v59 = vsel %vm208_vm1, %v824_v38, %v823_v32 }
 0xe49   :  { %v827_v41 = vsel %vm211_vm2, %v825_v59, -inf }
 0xe4a   :  { %828 = vmax.xlane.f32.xlu1 %v827_v41 }
 0xebd   :  { %v829_v43 = vpop.xlane.xlu1 %828 }
 0xebe   :  { %v831_v42 = vperm.slane %v829_v43, 0  ;;  %v832_v63 = vperm.slane %v829_v43, 1 }
 0xec0   :  { %v835_v1 = vsub.f32 %v817_v55, %v831_v42  ;;  %v836_v2 = vsub.f32 %v820_v57, %v832_v63 }
 0xec2   :  { %v837_v18 = vmul.f32 1.442695, %v835_v1  ;;  %v839_v19 = vmul.f32 1.442695, %v836_v2 }
 0xec4   :  { %2131 = vpow2.f32 %v837_v18 }
 0xec5   :  { %2133 = vpow2.f32 %v839_v19 }
 0xeca   :  { %v2132_v23 = vpop.eup %2131 }
 0xecb   :  { %v2134_v12 = vpop.eup %2133  ;;  %844 = vperm.xlu1 %2124, %v2132_v23  }
 0xecc   :  { %847 = vperm.xlu2 %2125, %v2134_v12  }
 0xf26   :  { %v848_v56 = vpop.permute.xlu2 %847 }
 0xf27   :  { %v850_v25 = vperm.slane %v848_v56, %v2420_v14 }
 0xf3d   :  { %v845_v13 = vpop.permute.xlu1 %844 }
 0xf3e   :  { %v849_v26 = vperm.slane %v845_v13, %v2420_v14 }
 0xf40   :  { %v851_v27 = vsel %vm208_vm1, %v850_v25, %v849_v26 }
 0xf41   :  { %v853_v28 = vsel %vm211_vm2, %v851_v27, 0.0 }
 0xf42   :  { %854 = vadd.xlane.f32.xlu2 %v853_v28 }
 0xfb5   :  { %v855_v31 = vpop.xlane.xlu2 %854 }
 0xfb6   :  { %v857_v50 = vperm.slane %v855_v31, 0  ;;  %v858_v55 = vperm.slane %v855_v31, 1 }
 0xfb8   :  { %2135 = vrcp.f32 %v857_v50  ;;  %v872_v42 = vand.u32 2147483648, %v857_v50  ;;  %v887_v63 = vand.u32 2147483648, %v858_v55  ;;  %v870_v2 = vand.u32 2147483647, %v857_v50 }
 0xfb9   :  { %2137 = vrcp.f32 %v858_v55  ;;  %v885_v19 = vand.u32 2147483647, %v858_v55  ;;  %vm866_vm9 = vweird.f32 %v857_v50  ;;  %vm881_vm10 = vweird.f32 %v858_v55 }
 0xfba   :  { %v873_v25 = vor.u32 1.1754944e-38, %v872_v42  ;;  %v888_v26 = vor.u32 1.1754944e-38, %v887_v63  ;;  %vm871_vm14 = vcmp.eq.f32.partialorder %v870_v2, 8.507059e+37 }
 0xfbb   :  { %vm886_vm15 = vcmp.eq.f32.partialorder %v885_v19, 8.507059e+37 }
 0xfbe   :  { %v2136_v57 = vpop.eup %2135 }
 0xfbf   :  { %v2138_v32 = vpop.eup %2137  ;;  %v862_v38 = vmul.f32 %v2136_v57, %v857_v50  ;;  %vm867_vm7 = vweird.f32 %v2136_v57  ;;  %v802_v50 = vld [vmem:[#allocation2] sm:$0x3] }
 0xfc0   :  { %v877_v59 = vmul.f32 %v2138_v32, %v858_v55  ;;  %vm882_vm8 = vweird.f32 %v2138_v32  ;;  %vm868_vm11 = vmor %vm866_vm9, %vm867_vm7  ;;  %938 = vmatmul.f32.vlgmr.msra.gmra.mxu2 %v802_v50 }
 0xfc1   :  { %v863_v41 = vsub.f32 1.0, %v862_v38  ;;  %vm883_vm13 = vmor %vm881_vm10, %vm882_vm8 }
 0xfc2   :  { %v878_v43 = vsub.f32 1.0, %v877_v59 }
 0xfc3   :  { %v864_v1 = vmul.f32 %v2136_v57, %v863_v41 }
 0xfc4   :  { %v879_v18 = vmul.f32 %v2138_v32, %v878_v43 }
 0xfc5   :  { %v865_v56 = vadd.f32 %v2136_v57, %v864_v1 }
 0xfc6   :  { %v880_v13 = vadd.f32 %v2138_v32, %v879_v18 }
 0xfc7   :  { %v869_v27 = vsel %vm868_vm11, %v2136_v57, %v865_v56 }
 0xfc8   :  { %v884_v28 = vsel %vm883_vm13, %v2138_v32, %v880_v13  ;;  %v874_v31 = vsel %vm871_vm14, %v873_v25, %v869_v27 }
 0xfc9   :  { %v889_v38 = vsel %vm886_vm15, %v888_v26, %v884_v28  ;;  %v875_v59 = vmul.f32 %v2132_v23, %v874_v31 }
 0xfca   :  { %v890_v41 = vmul.f32 %v2134_v12, %v889_v38 }
 0xfcb   :  { %893 = vperm.xlu0 %2126, %v875_v59  }
 0xfcc   :  { %898 = vperm.xlu1 %2124, %v890_v41  }
 0xfd4   :  { %962 = vrot.lane.b32.xlu1 %v2759_v3, %s2266_s6 }
 0xfdc   :  { %985 = vrot.lane.b32.xlu1 %v2759_v3, %s2267_s17 }
0x103d   :  { %v894_v55 = vpop.permute.xlu0 %893 }
0x103e   :  { %v899_v43 = vpop.permute.xlu1 %898  ;;  %v901_v57 = vmul.f32 %v894_v55, %v2369_v4  ;;  %v1065_v32 = vperm.slane %v894_v55, %v2420_v14 }
0x103f   :  { %v902_v42 = vmul.f32 %v899_v43, %v2374_v5  ;;  %v1066_v23 = vperm.slane %v899_v43, %v2420_v14 }
0x1040   :  { %v903_v12 = vsel %vm104_vm0, %v901_v57, 0.0 }
0x1041   :  { %v910_v63 = vsel %vm104_vm0, %v902_v42, 0.0  ;;  %v904_v1 = vrot.slane %v903_v12, 4  ;;  %v1067_v2 = vsel %vm208_vm1, %v1066_v23, %v1065_v32 }
0x1042   :  { %v911_v3 = vrot.slane %v910_v63, 4  ;;  %v1069_v18 = vsel %vm461_vm12, %v1067_v2, 0.0 }
0x1043   :  { %v905_v19 = vadd.f32 %v904_v1, %v903_v12  ;;  %v1071_v56 = vrot.slane %v1069_v18, 1  ;;  %1073 = vst [vmem:[%s3191_s13 + $0x2] sm:$0x1] %v1069_v18  ;;  %v939_v55 = vpop.f32.mrf.mxu2 }
0x1044   :  { %v912_v13 = vadd.f32 %v911_v3, %v910_v63  ;;  %v940_v43 = vadd.f32 %v2610_v40, %v939_v55 }
0x1045   :  { %v906_v25 = vrot.slane %v905_v19, 2  ;;  %1074 = vst [vmem:[%s3191_s13 + $0xa] sm:$0x1] %v1071_v56 }
0x1046   :  { %v913_v26 = vrot.slane %v912_v13, 2  ;;  %v963_v32 = vpop.permute.xlu1 %962 }
0x1047   :  { %v907_v27 = vadd.f32 %v906_v25, %v905_v19 }
0x1048   :  { %v914_v28 = vadd.f32 %v913_v26, %v912_v13 }
0x1049   :  { %v908_v31 = vrot.slane %v907_v27, 1 }
0x104a   :  { %v915_v38 = vrot.slane %v914_v28, 1 }
0x104b   :  { %v909_v59 = vadd.f32 %v908_v31, %v907_v27 }
0x104c   :  { %v916_v41 = vadd.f32 %v915_v38, %v914_v28 }
0x104e   :  { %v919_v50 = vsel %vm208_vm1, %v916_v41, %v909_v59  ;;  %v986_v26 = vpop.permute.xlu1 %985 }
0x104f   :  { %2018 = vmatmul.msk.f32.vlgmr.msra.gmra.mxu1 %vm104_vm0, %v919_v50 }
0x10cc   :  { %v959_v57 = vpop.f32.mrf.mxu1 }
0x10cd   :  { %v960_v42 = vadd.f32 %v959_v57, %v940_v43 }
0x10cf   :  { %v965_v23 = vadd.f32 %v963_v32, %v960_v42 }
0x10d1   :  { %v2019_v12 = vmul.f32 -1.442695, %v965_v23 }
0x10d3   :  { %2139 = vpow2.f32 %v2019_v12 }
0x10d9   :  { %v2140_v63 = vpop.eup %2139 }
0x10da   :  { %v969_v1 = vadd.f32 1.0, %v2140_v63 }
0x10dc   :  { %2141 = vrcp.f32 %v969_v1  ;;  %v981_v19 = vand.u32 2147483648, %v969_v1  ;;  %v979_v13 = vand.u32 2147483647, %v969_v1  ;;  %vm975_vm5 = vweird.f32 %v969_v1 }
0x10de   :  { %v982_v27 = vor.u32 1.1754944e-38, %v981_v19  ;;  %vm980_vm7 = vcmp.eq.f32.partialorder %v979_v13, 8.507059e+37 }
0x10e2   :  { %v2142_v2 = vpop.eup %2141 }
0x10e3   :  { %v971_v3 = vmul.f32 %v2142_v2, %v969_v1  ;;  %vm976_vm3 = vweird.f32 %v2142_v2 }
0x10e4   :  { %vm977_vm6 = vmor %vm975_vm5, %vm976_vm3 }
0x10e5   :  { %v972_v18 = vsub.f32 1.0, %v971_v3 }
0x10e7   :  { %v973_v56 = vmul.f32 %v2142_v2, %v972_v18 }
0x10e9   :  { %v974_v25 = vadd.f32 %v2142_v2, %v973_v56 }
0x10eb   :  { %v978_v28 = vsel %vm977_vm6, %v2142_v2, %v974_v25 }
0x10ec   :  { %v983_v31 = vsel %vm980_vm7, %v982_v27, %v978_v28 }
0x10ed   :  { %v988_v38 = vmul.f32 %v986_v26, %v983_v31  ;;  %v995_v55 = vsub.f32 1.0, %v983_v31  ;;  %v1001_v32 = vmul.f32 %v983_v31, %v2752_v60 }
0x10ef   :  { %990 = vrot.lane.b32.xlu2 %v988_v38, %s2269_s8 }
0x1149   :  { %v991_v59 = vpop.permute.xlu2 %990 }
0x114a   :  { %v993_v41 = vadd.f32 %v991_v59, %v960_v42 }
0x114c   :  { %2143 = vtanh.f32 %v993_v41 }
0x1152   :  { %v2144_v50 = vpop.eup %2143 }
0x1153   :  { %997 = vrot.lane.b32.xlu0 %v2144_v50, %s2266_s6 }
0x11c5   :  { %v998_v43 = vpop.permute.xlu0 %997 }
0x11c6   :  { %v1000_v57 = vmul.f32 %v998_v43, %v995_v55 }
0x11c8   :  { %v2856_v23 = vadd.f32 %v1001_v32, %v1000_v57 }
0x11ca   :  { %1004 = vrot.lane.b32.xlu1 %v2856_v23, %s2266_s6 }
0x123c   :  { %v1005_v12 = vpop.permute.xlu1 %1004 }
0x123d   :  { %2020 = vmatmul.msk.f32.vlgmr.msra.gmra.mxu3 %vm104_vm0, %v1005_v12  ;;  %2021 = vmatmul.msk.f32.vlgmr.msrb.gmra.mxu1 %vm104_vm0, %v1005_v12 }
0x12ba   :  { %v1045_v42 = vpop.f32.mrf.mxu1 }
0x12bb   :  { %v2863_v63 = vadd.f32 %v1045_v42, %v2425_v16 }
0x12c0   :  { %v1025_v1 = vpop.f32.mrf.mxu3 }
0x12c1   :  { %v1026_v2 = vadd.f32 %v1025_v1, %v2646_v58 }
0x12c3   :  { %v1048_v3 = vsel %vm439_vm4, %v1026_v2, -inf }
0x12c4   :  { %1049 = vmax.xlane.f32.xlu0 %v1048_v3 }
0x1337   :  { %v1050_v60 = vpop.xlane.xlu0 %1049 }
0x1338   :  { %v1051_v18 = vsub.f32 %v1026_v2, %v1050_v60 }
0x133a   :  { %v1052_v19 = vmul.f32 1.442695, %v1051_v18 }
0x133c   :  { %2145 = vpow2.f32 %v1052_v19 }
0x1342   :  { %v2146_v56 = vpop.eup %2145 }
0x1343   :  { %v1054_v13 = vsel %vm439_vm4, %v2146_v56, 0.0 }
0x1344   :  { %1055 = vadd.xlane.f32.xlu1 %v1054_v13 }
0x13b7   :  { %v1056_v25 = vpop.xlane.xlu1 %1055 }
0x13b8   :  { %2147 = vlog2.f32 %v1056_v25 }
0x13be   :  { %v2148_v26 = vpop.eup %2147 }
0x13bf   :  { %v1058_v27 = vmul.f32 0.6931472, %v2148_v26 }
0x13c1   :  { %v1059_v28 = vsub.f32 %v1051_v18, %v1058_v27  ;;  %1077 = sbr.rel (%p2001_p0) target bundleno = 5068 (0x13cc), region = 69 }
0x13c3   :  { %v1061_v31 = vrot.slane %v1059_v28, 1  ;;  %1063 = vst [vmem:[%s3189_s11 + $0x2] sm:$0x1] %v1059_v28 }
0x13c5   :  { %1064 = vst [vmem:[%s3189_s11 + $0xa] sm:$0x1] %v1061_v31 }
0x13c6   :  { %vm1079_vm8 = vcmp.eq.s32.totalorder %v2422_v15, 0  ;;  %v1080_v38 = vstv %s2023_s16  ;;  %vm1086_vm10 = vcmp.eq.s32.totalorder %v2422_v15, 1  ;;  %v1087_v59 = vstv %s2025_s5 }
0x13c7   :  { %vm1081_vm9 = vcmp.eq.s32.totalorder %v2420_v14, %v1080_v38  ;;  %v2274_v41 = vmov 0.0   ;;  %vm1088_vm11 = vcmp.eq.s32.totalorder %v2420_v14, %v1087_v59 }
0x13c8   :  { %v2024_v50 = vsel %vm1081_vm9, 1.0, %v2274_v41  ;;  %v2026_v43 = vsel %vm1088_vm11, 1.0, %v2274_v41 }
0x13c9   :  { %v1084_v55 = vsel %vm1079_vm8, %v2024_v50, 0.0 }
0x13ca   :  { %v1091_v57 = vsel %vm1086_vm10, %v2026_v43, %v1084_v55 }
0x13cb   :  { %1092 = vst [vmem:[#allocation2] sm:$0x3] %v1091_v57 }
0x13cc PF:  { %1095 = sbr.rel (%p2005_p1) target bundleno = 5195 (0x144b), region = 73 }
0x13d1   :  { %vm1096_vm13 = vcmp.eq.f32.partialorder %v1026_v2, %v1050_v60  ;;  %v2275_v1 = vmov 0.0  }
0x13d2   :  { %v1097_v32 = vsel %vm1096_vm13, %v2428_v17, 128.0 }
0x13d3   :  { %v1098_v12 = vsel %vm439_vm4, %v1097_v32, inf }
0x13d4   :  { %1099 = vmin.xlane.f32.xlu0 %v1098_v12 }
0x1447   :  { %v1100_v42 = vpop.xlane.xlu0 %1099 }
0x1448   :  { %vm1101_vm14 = vcmp.eq.f32.partialorder %v2428_v17, %v1100_v42 }
0x1449   :  { %v2028_v3 = vsel %vm1101_vm14, 1.0, %v2275_v1 }
0x144a   :  { %1104 = vst [vmem:[#allocation2] sm:$0x3] %v2028_v3 }
0x144b PF:  { %v1108_v18 = vperm.slane %v2863_v63, 0  ;;  %v1107_v19 = vrot.slane %v2863_v63, 1  ;;  %v3198_v56 = vmov 0   ;;  %1225 = vmatpush.msrb.mxu3 %v2467_v61  ;;  %1257 = vmatpush.msrb.mxu0 %v2570_v51  ;;  %s2034_s3 = sld [smem:[#allocation4 + $0x180]] (!%p2001_p0) }
0x144c   :  { %2150 = vset.pattern.permute.xlu2 %v3198_v56  ;;  %2149 = vset.pattern.permute.xlu1 %v3198_v56  ;;  %s2036_s26 = sld [smem:[#allocation4 + $0x181]] (!%p2001_p0) }
0x144d   :  { %2151 = vset.pattern.permute.xlu0 %v3198_v56  ;;  %v1112_v2 = vadd.f32 %v1108_v18, %v2436_v22  ;;  %v1109_v60 = vperm.slane %v1107_v19, 0  ;;  %1323 = vmatpush.msra.mxu1 %v2618_v33 }
0x144e   :  { %1226 = vmatpush.msrb.mxu3 %v2472_v62  ;;  %1258 = vmatpush.msrb.mxu0 %v2576_v52 }
0x144f   :  { %2152 = vtanh.f32 %v1112_v2  ;;  %v1113_v13 = vadd.f32 %v1109_v60, %v2439_v24  ;;  %1324 = vmatpush.msra.mxu1 %v2623_v35 }
0x1450   :  { %1227 = vmatpush.msrb.mxu3 %v2478_v0  ;;  %1259 = vmatpush.msrb.mxu0 %v2582_v53 }
0x1451   :  { %2154 = vtanh.f32 %v1113_v13  ;;  %1325 = vmatpush.msra.mxu1 %v2629_v36 }
0x1452   :  { %1228 = vmatpush.msrb.mxu3 %v2484_v11  ;;  %1260 = vmatpush.msrb.mxu0 %v2587_v54 }
0x1453   :  { %1326 = vmatpush.msra.mxu1 %v2635_v37 }
0x1454   :  { %1229 = vmatpush.msrb.mxu3 %v2490_v20  ;;  %1343 = vmatpush.msra.mxu0 %v2379_v6 }
0x1455   :  { %v2153_v25 = vpop.eup %2152 }
0x1456   :  { %v1116_v26 = vmul.f32 %v2153_v25, %v2447_v29  ;;  %1230 = vmatpush.msrb.mxu3 %v2496_v30  ;;  %1344 = vmatpush.msra.mxu0 %v2386_v7 }
0x1457   :  { %v2155_v27 = vpop.eup %2154 }
0x1458   :  { %v1118_v28 = vsel %vm104_vm0, %v1116_v26, 0.0  ;;  %1231 = vmatpush.msrb.mxu3 %v2502_v34  ;;  %1345 = vmatpush.msra.mxu0 %v2394_v8  ;;  %v1117_v31 = vmul.f32 %v2155_v27, %v2447_v29 }
0x1459   :  { %1119 = vadd.xlane.f32.xlu0 %v1118_v28 }
0x145a   :  { %1232 = vmatpush.msrb.mxu3 %v2508_v39  ;;  %1346 = vmatpush.msra.mxu0 %v2400_v9  ;;  %v1121_v38 = vsel %vm104_vm0, %v1117_v31, 0.0 }
0x145c   :  { %1233 = vmatpush.msrb.mxu3 %v2514_v44 }
0x145e   :  { %1234 = vmatpush.msrb.mxu3 %v2520_v45 }
0x1460   :  { %1235 = vmatpush.msrb.mxu3 %v2526_v46 }
0x1461   :  { %1122 = vadd.xlane.f32.xlu0 %v1121_v38 }
0x1462   :  { %1236 = vmatpush.msrb.mxu3 %v2532_v47 }
0x1464   :  { %1237 = vmatpush.msrb.mxu3 %v2545_v48 }
0x1466   :  { %1238 = vmatpush.msrb.mxu3 %v2551_v49 }
0x1468   :  { %1239 = vmatpush.msrb.mxu3 %v2557_v21 }
0x146a   :  { %1240 = vmatpush.msrb.mxu3 %v2563_v10 }
0x14cc   :  { %v1120_v59 = vpop.xlane.xlu0 %1119 }
0x14cd   :  { %v1126_v50 = vperm.slane %v1120_v59, %v2420_v14 }
0x14d4   :  { %v1123_v41 = vpop.xlane.xlu0 %1122 }
0x14d5   :  { %v1127_v55 = vperm.slane %v1123_v41, %v2420_v14 }
0x14d7   :  { %v1128_v43 = vsel %vm208_vm1, %v1127_v55, %v1126_v50 }
0x14d8   :  { %v1130_v57 = vsel %vm211_vm2, %v1128_v43, -inf }
0x14d9   :  { %1131 = vmax.xlane.f32.xlu1 %v1130_v57 }
0x154c   :  { %v1132_v32 = vpop.xlane.xlu1 %1131 }
0x154d   :  { %v1134_v12 = vperm.slane %v1132_v32, 0  ;;  %v1135_v42 = vperm.slane %v1132_v32, 1 }
0x154f   :  { %v1138_v1 = vsub.f32 %v1120_v59, %v1134_v12  ;;  %v1139_v3 = vsub.f32 %v1123_v41, %v1135_v42 }
0x1551   :  { %v1140_v18 = vmul.f32 1.442695, %v1138_v1  ;;  %v1142_v19 = vmul.f32 1.442695, %v1139_v3 }
0x1553   :  { %2156 = vpow2.f32 %v1140_v18 }
0x1554   :  { %2158 = vpow2.f32 %v1142_v19 }
0x1559   :  { %v2157_v56 = vpop.eup %2156 }
0x155a   :  { %v2159_v2 = vpop.eup %2158  ;;  %1147 = vperm.xlu1 %2149, %v2157_v56  }
0x155b   :  { %1150 = vperm.xlu2 %2150, %v2159_v2  }
0x15b5   :  { %v1151_v60 = vpop.permute.xlu2 %1150 }
0x15b6   :  { %v1153_v25 = vperm.slane %v1151_v60, %v2420_v14 }
0x15cc   :  { %v1148_v13 = vpop.permute.xlu1 %1147 }
0x15cd   :  { %v1152_v26 = vperm.slane %v1148_v13, %v2420_v14 }
0x15cf   :  { %v1154_v27 = vsel %vm208_vm1, %v1153_v25, %v1152_v26 }
0x15d0   :  { %v1156_v28 = vsel %vm211_vm2, %v1154_v27, 0.0 }
0x15d1   :  { %1157 = vadd.xlane.f32.xlu2 %v1156_v28 }
0x1644   :  { %v1158_v31 = vpop.xlane.xlu2 %1157 }
0x1645   :  { %v1160_v38 = vperm.slane %v1158_v31, 0  ;;  %v1161_v59 = vperm.slane %v1158_v31, 1 }
0x1647   :  { %2160 = vrcp.f32 %v1160_v38  ;;  %v1175_v12 = vand.u32 2147483648, %v1160_v38  ;;  %v1190_v42 = vand.u32 2147483648, %v1161_v59  ;;  %v1173_v3 = vand.u32 2147483647, %v1160_v38 }
0x1648   :  { %2162 = vrcp.f32 %v1161_v59  ;;  %v1188_v19 = vand.u32 2147483647, %v1161_v59  ;;  %vm1169_vm5 = vweird.f32 %v1160_v38  ;;  %vm1184_vm6 = vweird.f32 %v1161_v59 }
0x1649   :  { %v1176_v25 = vor.u32 1.1754944e-38, %v1175_v12  ;;  %v1191_v26 = vor.u32 1.1754944e-38, %v1190_v42  ;;  %vm1174_vm9 = vcmp.eq.f32.partialorder %v1173_v3, 8.507059e+37 }
0x164a   :  { %vm1189_vm10 = vcmp.eq.f32.partialorder %v1188_v19, 8.507059e+37 }
0x164d   :  { %v2161_v41 = vpop.eup %2160 }
0x164e   :  { %v2163_v50 = vpop.eup %2162  ;;  %v1165_v55 = vmul.f32 %v2161_v41, %v1160_v38  ;;  %vm1170_vm15 = vweird.f32 %v2161_v41  ;;  %v1105_v38 = vld [vmem:[#allocation2] sm:$0x3] }
0x164f   :  { %v1180_v43 = vmul.f32 %v2163_v50, %v1161_v59  ;;  %vm1185_vm3 = vweird.f32 %v2163_v50  ;;  %vm1171_vm7 = vmor %vm1169_vm5, %vm1170_vm15  ;;  %1241 = vmatmul.f32.vlgmr.msrb.gmra.mxu3 %v1105_v38 }
0x1650   :  { %v1166_v57 = vsub.f32 1.0, %v1165_v55  ;;  %vm1186_vm8 = vmor %vm1184_vm6, %vm1185_vm3 }
0x1651   :  { %v1181_v32 = vsub.f32 1.0, %v1180_v43 }
0x1652   :  { %v1167_v1 = vmul.f32 %v2161_v41, %v1166_v57 }
0x1653   :  { %v1182_v18 = vmul.f32 %v2163_v50, %v1181_v32 }
0x1654   :  { %v1168_v60 = vadd.f32 %v2161_v41, %v1167_v1 }
0x1655   :  { %v1183_v13 = vadd.f32 %v2163_v50, %v1182_v18 }
0x1656   :  { %v1172_v27 = vsel %vm1171_vm7, %v2161_v41, %v1168_v60 }
0x1657   :  { %v1187_v28 = vsel %vm1186_vm8, %v2163_v50, %v1183_v13  ;;  %v1177_v31 = vsel %vm1174_vm9, %v1176_v25, %v1172_v27 }
0x1658   :  { %v1192_v55 = vsel %vm1189_vm10, %v1191_v26, %v1187_v28  ;;  %v1178_v43 = vmul.f32 %v2157_v56, %v1177_v31 }
0x1659   :  { %v1193_v57 = vmul.f32 %v2159_v2, %v1192_v55 }
0x165a   :  { %1196 = vperm.xlu0 %2151, %v1178_v43  }
0x165b   :  { %1201 = vperm.xlu1 %2149, %v1193_v57  }
0x1663   :  { %1265 = vrot.lane.b32.xlu1 %v2863_v63, %s2266_s6 }
0x166b   :  { %1288 = vrot.lane.b32.xlu1 %v2863_v63, %s2267_s17 }
0x16cc   :  { %v1197_v59 = vpop.permute.xlu0 %1196 }
0x16cd   :  { %v1202_v32 = vpop.permute.xlu1 %1201  ;;  %v1204_v41 = vmul.f32 %v1197_v59, %v2369_v4  ;;  %v1368_v50 = vperm.slane %v1197_v59, %v2420_v14 }
0x16ce   :  { %v1205_v12 = vmul.f32 %v1202_v32, %v2374_v5  ;;  %v1369_v56 = vperm.slane %v1202_v32, %v2420_v14 }
0x16cf   :  { %v1206_v2 = vsel %vm104_vm0, %v1204_v41, 0.0 }
0x16d0   :  { %v1213_v42 = vsel %vm104_vm0, %v1205_v12, 0.0  ;;  %v1207_v1 = vrot.slane %v1206_v2, 4  ;;  %v1370_v3 = vsel %vm208_vm1, %v1369_v56, %v1368_v50 }
0x16d1   :  { %v1214_v63 = vrot.slane %v1213_v42, 4  ;;  %v1372_v18 = vsel %vm461_vm12, %v1370_v3, 0.0 }
0x16d2   :  { %v1208_v19 = vadd.f32 %v1207_v1, %v1206_v2  ;;  %v1374_v60 = vrot.slane %v1372_v18, 1  ;;  %1376 = vst [vmem:[%s3191_s13 + $0x3] sm:$0x1] %v1372_v18  ;;  %v1242_v59 = vpop.f32.mrf.mxu3 }
0x16d3   :  { %v1215_v13 = vadd.f32 %v1214_v63, %v1213_v42  ;;  %v1243_v32 = vadd.f32 %v2610_v40, %v1242_v59 }
0x16d4   :  { %v1209_v25 = vrot.slane %v1208_v19, 2  ;;  %1377 = vst [vmem:[%s3191_s13 + $0xb] sm:$0x1] %v1374_v60 }
0x16d5   :  { %v1216_v26 = vrot.slane %v1215_v13, 2  ;;  %v1266_v50 = vpop.permute.xlu1 %1265 }
0x16d6   :  { %v1210_v27 = vadd.f32 %v1209_v25, %v1208_v19 }
0x16d7   :  { %v1217_v28 = vadd.f32 %v1216_v26, %v1215_v13 }
0x16d8   :  { %v1211_v31 = vrot.slane %v1210_v27, 1 }
0x16d9   :  { %v1218_v55 = vrot.slane %v1217_v28, 1 }
0x16da   :  { %v1212_v43 = vadd.f32 %v1211_v31, %v1210_v27 }
0x16db   :  { %v1219_v57 = vadd.f32 %v1218_v55, %v1217_v28 }
0x16dd   :  { %v1222_v38 = vsel %vm208_vm1, %v1219_v57, %v1212_v43  ;;  %v1289_v26 = vpop.permute.xlu1 %1288 }
0x16de   :  { %2029 = vmatmul.msk.f32.vlgmr.msrb.gmra.mxu0 %vm104_vm0, %v1222_v38 }
0x175b   :  { %v1262_v41 = vpop.f32.mrf.mxu0 }
0x175c   :  { %v1263_v12 = vadd.f32 %v1262_v41, %v1243_v32 }
0x175e   :  { %v1268_v56 = vadd.f32 %v1266_v50, %v1263_v12 }
0x1760   :  { %v2030_v2 = vmul.f32 -1.442695, %v1268_v56 }
0x1762   :  { %2164 = vpow2.f32 %v2030_v2 }
0x1768   :  { %v2165_v42 = vpop.eup %2164 }
0x1769   :  { %v1272_v1 = vadd.f32 1.0, %v2165_v42 }
0x176b   :  { %2166 = vrcp.f32 %v1272_v1  ;;  %v1284_v19 = vand.u32 2147483648, %v1272_v1  ;;  %v1282_v13 = vand.u32 2147483647, %v1272_v1  ;;  %vm1278_vm13 = vweird.f32 %v1272_v1 }
0x176d   :  { %v1285_v27 = vor.u32 1.1754944e-38, %v1284_v19  ;;  %vm1283_vm15 = vcmp.eq.f32.partialorder %v1282_v13, 8.507059e+37 }
0x1771   :  { %v2167_v3 = vpop.eup %2166 }
0x1772   :  { %v1274_v63 = vmul.f32 %v2167_v3, %v1272_v1  ;;  %vm1279_vm11 = vweird.f32 %v2167_v3 }
0x1773   :  { %vm1280_vm14 = vmor %vm1278_vm13, %vm1279_vm11 }
0x1774   :  { %v1275_v18 = vsub.f32 1.0, %v1274_v63 }
0x1776   :  { %v1276_v60 = vmul.f32 %v2167_v3, %v1275_v18 }
0x1778   :  { %v1277_v25 = vadd.f32 %v2167_v3, %v1276_v60 }
0x177a   :  { %v1281_v28 = vsel %vm1280_vm14, %v2167_v3, %v1277_v25 }
0x177b   :  { %v1286_v31 = vsel %vm1283_vm15, %v1285_v27, %v1281_v28 }
0x177c   :  { %v1291_v55 = vmul.f32 %v1289_v26, %v1286_v31  ;;  %v1298_v59 = vsub.f32 1.0, %v1286_v31  ;;  %v1304_v50 = vmul.f32 %v1286_v31, %v2856_v23 }
0x177e   :  { %1293 = vrot.lane.b32.xlu2 %v1291_v55, %s2269_s8 }
0x17d8   :  { %v1294_v43 = vpop.permute.xlu2 %1293 }
0x17d9   :  { %v1296_v57 = vadd.f32 %v1294_v43, %v1263_v12 }
0x17db   :  { %2168 = vtanh.f32 %v1296_v57 }
0x17e1   :  { %v2169_v38 = vpop.eup %2168 }
0x17e2   :  { %1300 = vrot.lane.b32.xlu0 %v2169_v38, %s2266_s6 }
0x1854   :  { %v1301_v32 = vpop.permute.xlu0 %1300 }
0x1855   :  { %v1303_v41 = vmul.f32 %v1301_v32, %v1298_v59 }
0x1857   :  { %v2960_v56 = vadd.f32 %v1304_v50, %v1303_v41 }
0x1859   :  { %1307 = vrot.lane.b32.xlu1 %v2960_v56, %s2266_s6 }
0x18cb   :  { %v1308_v2 = vpop.permute.xlu1 %1307 }
0x18cc   :  { %2031 = vmatmul.msk.f32.vlgmr.msra.gmra.mxu1 %vm104_vm0, %v1308_v2  ;;  %2032 = vmatmul.msk.f32.vlgmr.msra.gmra.mxu0 %vm104_vm0, %v1308_v2 }
0x1949   :  { %v1328_v12 = vpop.f32.mrf.mxu1  ;;  %v1348_v42 = vpop.f32.mrf.mxu0 }
0x194a   :  { %v1329_v1 = vadd.f32 %v1328_v12, %v2646_v58  ;;  %v2968_v3 = vadd.f32 %v1348_v42, %v2425_v16 }
0x194c   :  { %v1351_v63 = vsel %vm439_vm4, %v1329_v1, -inf }
0x194d   :  { %1352 = vmax.xlane.f32.xlu0 %v1351_v63 }
0x19c0   :  { %v1353_v23 = vpop.xlane.xlu0 %1352 }
0x19c1   :  { %v1354_v18 = vsub.f32 %v1329_v1, %v1353_v23 }
0x19c3   :  { %v1355_v19 = vmul.f32 1.442695, %v1354_v18 }
0x19c5   :  { %2170 = vpow2.f32 %v1355_v19 }
0x19cb   :  { %v2171_v60 = vpop.eup %2170 }
0x19cc   :  { %v1357_v13 = vsel %vm439_vm4, %v2171_v60, 0.0 }
0x19cd   :  { %1358 = vadd.xlane.f32.xlu1 %v1357_v13 }
0x1a40   :  { %v1359_v25 = vpop.xlane.xlu1 %1358 }
0x1a41   :  { %2172 = vlog2.f32 %v1359_v25 }
0x1a47   :  { %v2173_v26 = vpop.eup %2172 }
0x1a48   :  { %v1361_v27 = vmul.f32 0.6931472, %v2173_v26 }
0x1a4a   :  { %v1362_v28 = vsub.f32 %v1354_v18, %v1361_v27  ;;  %1380 = sbr.rel (%p2001_p0) target bundleno = 6741 (0x1a55), region = 77 }
0x1a4c   :  { %v1364_v31 = vrot.slane %v1362_v28, 1  ;;  %1366 = vst [vmem:[%s3189_s11 + $0x3] sm:$0x1] %v1362_v28 }
0x1a4e   :  { %1367 = vst [vmem:[%s3189_s11 + $0xb] sm:$0x1] %v1364_v31 }
0x1a4f   :  { %vm1382_vm3 = vcmp.eq.s32.totalorder %v2422_v15, 0  ;;  %v1383_v55 = vstv %s2034_s3  ;;  %vm1389_vm6 = vcmp.eq.s32.totalorder %v2422_v15, 1  ;;  %v1390_v43 = vstv %s2036_s26 }
0x1a50   :  { %vm1384_vm5 = vcmp.eq.s32.totalorder %v2420_v14, %v1383_v55  ;;  %v2276_v57 = vmov 0.0   ;;  %vm1391_vm7 = vcmp.eq.s32.totalorder %v2420_v14, %v1390_v43 }
0x1a51   :  { %v2035_v38 = vsel %vm1384_vm5, 1.0, %v2276_v57  ;;  %v2037_v32 = vsel %vm1391_vm7, 1.0, %v2276_v57 }
0x1a52   :  { %v1387_v59 = vsel %vm1382_vm3, %v2035_v38, 0.0 }
0x1a53   :  { %v1394_v41 = vsel %vm1389_vm6, %v2037_v32, %v1387_v59 }
0x1a54   :  { %1395 = vst [vmem:[#allocation2] sm:$0x3] %v1394_v41 }
0x1a55 PF:  { %1398 = sbr.rel (%p2005_p1) target bundleno = 6868 (0x1ad4), region = 81 }
0x1a5a   :  { %vm1399_vm8 = vcmp.eq.f32.partialorder %v1329_v1, %v1353_v23  ;;  %v2277_v42 = vmov 0.0  }
0x1a5b   :  { %v1400_v50 = vsel %vm1399_vm8, %v2428_v17, 128.0 }
0x1a5c   :  { %v1401_v2 = vsel %vm439_vm4, %v1400_v50, inf }
0x1a5d   :  { %1402 = vmin.xlane.f32.xlu0 %v1401_v2 }
0x1ad0   :  { %v1403_v12 = vpop.xlane.xlu0 %1402 }
0x1ad1   :  { %vm1404_vm9 = vcmp.eq.f32.partialorder %v2428_v17, %v1403_v12 }
0x1ad2   :  { %v2039_v63 = vsel %vm1404_vm9, 1.0, %v2277_v42 }
0x1ad3   :  { %1407 = vst [vmem:[#allocation2] sm:$0x3] %v2039_v63 }
0x1ad4 PF:  { %v1411_v18 = vperm.slane %v2968_v3, 0  ;;  %v1410_v19 = vrot.slane %v2968_v3, 1  ;;  %v3199_v60 = vmov 0   ;;  %1528 = vmatpush.msrb.mxu1 %v2467_v61  ;;  %1560 = vmatpush.msrb.mxu2 %v2570_v51  ;;  %s2045_s18 = sld [smem:[#allocation4 + $0x200]] (!%p2001_p0) }
0x1ad5   :  { %2175 = vset.pattern.permute.xlu2 %v3199_v60  ;;  %2174 = vset.pattern.permute.xlu1 %v3199_v60  ;;  %s2047_s19 = sld [smem:[#allocation4 + $0x201]] (!%p2001_p0) }
0x1ad6   :  { %2176 = vset.pattern.permute.xlu0 %v3199_v60  ;;  %v1415_v1 = vadd.f32 %v1411_v18, %v2436_v22  ;;  %v1412_v23 = vperm.slane %v1410_v19, 0  ;;  %1626 = vmatpush.msrb.mxu0 %v2618_v33 }
0x1ad7   :  { %1529 = vmatpush.msrb.mxu1 %v2472_v62  ;;  %1561 = vmatpush.msrb.mxu2 %v2576_v52 }
0x1ad8   :  { %2177 = vtanh.f32 %v1415_v1  ;;  %v1416_v13 = vadd.f32 %v1412_v23, %v2439_v24  ;;  %1627 = vmatpush.msrb.mxu0 %v2623_v35 }
0x1ad9   :  { %1530 = vmatpush.msrb.mxu1 %v2478_v0  ;;  %1562 = vmatpush.msrb.mxu2 %v2582_v53 }
0x1ada   :  { %2179 = vtanh.f32 %v1416_v13  ;;  %1628 = vmatpush.msrb.mxu0 %v2629_v36 }
0x1adb   :  { %1531 = vmatpush.msrb.mxu1 %v2484_v11  ;;  %1563 = vmatpush.msrb.mxu2 %v2587_v54 }
0x1adc   :  { %1629 = vmatpush.msrb.mxu0 %v2635_v37 }
0x1add   :  { %1532 = vmatpush.msrb.mxu1 %v2490_v20  ;;  %1646 = vmatpush.msra.mxu2 %v2379_v6 }
0x1ade   :  { %v2178_v25 = vpop.eup %2177 }
0x1adf   :  { %v1419_v26 = vmul.f32 %v2178_v25, %v2447_v29  ;;  %1533 = vmatpush.msrb.mxu1 %v2496_v30  ;;  %1647 = vmatpush.msra.mxu2 %v2386_v7 }
0x1ae0   :  { %v2180_v27 = vpop.eup %2179 }
0x1ae1   :  { %v1421_v28 = vsel %vm104_vm0, %v1419_v26, 0.0  ;;  %1534 = vmatpush.msrb.mxu1 %v2502_v34  ;;  %1648 = vmatpush.msra.mxu2 %v2394_v8  ;;  %v1420_v31 = vmul.f32 %v2180_v27, %v2447_v29 }
0x1ae2   :  { %1422 = vadd.xlane.f32.xlu0 %v1421_v28 }
0x1ae3   :  { %1535 = vmatpush.msrb.mxu1 %v2508_v39  ;;  %1649 = vmatpush.msra.mxu2 %v2400_v9  ;;  %v1424_v6 = vsel %vm104_vm0, %v1420_v31, 0.0 }
0x1ae5   :  { %1536 = vmatpush.msrb.mxu1 %v2514_v44 }
0x1ae7   :  { %1537 = vmatpush.msrb.mxu1 %v2520_v45 }
0x1ae9   :  { %1538 = vmatpush.msrb.mxu1 %v2526_v46 }
0x1aea   :  { %1425 = vadd.xlane.f32.xlu0 %v1424_v6 }
0x1aeb   :  { %1539 = vmatpush.msrb.mxu1 %v2532_v47 }
0x1aed   :  { %1540 = vmatpush.msrb.mxu1 %v2545_v48 }
0x1aef   :  { %1541 = vmatpush.msrb.mxu1 %v2551_v49 }
0x1af1   :  { %1542 = vmatpush.msrb.mxu1 %v2557_v21 }
0x1af3   :  { %1543 = vmatpush.msrb.mxu1 %v2563_v10 }
0x1b55   :  { %v1423_v7 = vpop.xlane.xlu0 %1422 }
0x1b56   :  { %v1429_v9 = vperm.slane %v1423_v7, %v2420_v14 }
0x1b5d   :  { %v1426_v8 = vpop.xlane.xlu0 %1425 }
0x1b5e   :  { %v1430_v55 = vperm.slane %v1426_v8, %v2420_v14 }
0x1b60   :  { %v1431_v43 = vsel %vm208_vm1, %v1430_v55, %v1429_v9 }
0x1b61   :  { %v1433_v57 = vsel %vm211_vm2, %v1431_v43, -inf }
0x1b62   :  { %1434 = vmax.xlane.f32.xlu1 %v1433_v57 }
0x1bd5   :  { %v1435_v38 = vpop.xlane.xlu1 %1434 }
0x1bd6   :  { %v1437_v59 = vperm.slane %v1435_v38, 0  ;;  %v1438_v32 = vperm.slane %v1435_v38, 1 }
0x1bd8   :  { %v1441_v41 = vsub.f32 %v1423_v7, %v1437_v59  ;;  %v1442_v50 = vsub.f32 %v1426_v8, %v1438_v32 }
0x1bda   :  { %v1443_v2 = vmul.f32 1.442695, %v1441_v41  ;;  %v1445_v12 = vmul.f32 1.442695, %v1442_v50 }
0x1bdc   :  { %2181 = vpow2.f32 %v1443_v2 }
0x1bdd   :  { %2183 = vpow2.f32 %v1445_v12 }
0x1be2   :  { %v2182_v42 = vpop.eup %2181 }
0x1be3   :  { %v2184_v63 = vpop.eup %2183  ;;  %1450 = vperm.xlu1 %2174, %v2182_v42  }
0x1be4   :  { %1453 = vperm.xlu2 %2175, %v2184_v63  }
0x1c3e   :  { %v1454_v18 = vpop.permute.xlu2 %1453 }
0x1c3f   :  { %v1456_v60 = vperm.slane %v1454_v18, %v2420_v14 }
0x1c55   :  { %v1451_v19 = vpop.permute.xlu1 %1450 }
0x1c56   :  { %v1455_v1 = vperm.slane %v1451_v19, %v2420_v14 }
0x1c58   :  { %v1457_v23 = vsel %vm208_vm1, %v1456_v60, %v1455_v1 }
0x1c59   :  { %v1459_v13 = vsel %vm211_vm2, %v1457_v23, 0.0 }
0x1c5a   :  { %1460 = vadd.xlane.f32.xlu2 %v1459_v13 }
0x1ccd   :  { %v1461_v25 = vpop.xlane.xlu2 %1460 }
0x1cce   :  { %v1463_v26 = vperm.slane %v1461_v25, 0  ;;  %v1464_v27 = vperm.slane %v1461_v25, 1  ;;  %v1408_v25 = vld [vmem:[#allocation2] sm:$0x3] }
0x1ccf   :  { %1544 = vmatmul.f32.vlgmr.msrb.gmra.mxu1 %v1408_v25 }
0x1cd0   :  { %2185 = vrcp.f32 %v1463_v26  ;;  %v1478_v55 = vand.u32 2147483648, %v1463_v26  ;;  %v1493_v43 = vand.u32 2147483648, %v1464_v27  ;;  %v1476_v38 = vand.u32 2147483647, %v1463_v26 }
0x1cd1   :  { %2187 = vrcp.f32 %v1464_v27  ;;  %v1491_v32 = vand.u32 2147483647, %v1464_v27  ;;  %vm1472_vm13 = vweird.f32 %v1463_v26  ;;  %vm1487_vm14 = vweird.f32 %v1464_v27 }
0x1cd2   :  { %v1479_v2 = vor.u32 1.1754944e-38, %v1478_v55  ;;  %v1494_v12 = vor.u32 1.1754944e-38, %v1493_v43  ;;  %vm1477_vm5 = vcmp.eq.f32.partialorder %v1476_v38, 8.507059e+37 }
0x1cd3   :  { %vm1492_vm6 = vcmp.eq.f32.partialorder %v1491_v32, 8.507059e+37 }
0x1cd6   :  { %v2186_v28 = vpop.eup %2185 }
0x1cd7   :  { %v2188_v31 = vpop.eup %2187  ;;  %v1468_v6 = vmul.f32 %v2186_v28, %v1463_v26  ;;  %vm1473_vm10 = vweird.f32 %v2186_v28 }
0x1cd8   :  { %v1483_v7 = vmul.f32 %v2188_v31, %v1464_v27  ;;  %vm1488_vm11 = vweird.f32 %v2188_v31  ;;  %vm1474_vm15 = vmor %vm1472_vm13, %vm1473_vm10 }
0x1cd9   :  { %v1469_v8 = vsub.f32 1.0, %v1468_v6  ;;  %vm1489_vm3 = vmor %vm1487_vm14, %vm1488_vm11 }
0x1cda   :  { %v1484_v9 = vsub.f32 1.0, %v1483_v7 }
0x1cdb   :  { %v1470_v57 = vmul.f32 %v2186_v28, %v1469_v8 }
0x1cdc   :  { %v1485_v59 = vmul.f32 %v2188_v31, %v1484_v9 }
0x1cdd   :  { %v1471_v41 = vadd.f32 %v2186_v28, %v1470_v57 }
0x1cde   :  { %v1486_v50 = vadd.f32 %v2188_v31, %v1485_v59 }
0x1cdf   :  { %v1475_v18 = vsel %vm1474_vm15, %v2186_v28, %v1471_v41 }
0x1ce0   :  { %v1490_v19 = vsel %vm1489_vm3, %v2188_v31, %v1486_v50  ;;  %v1480_v60 = vsel %vm1477_vm5, %v1479_v2, %v1475_v18 }
0x1ce1   :  { %v1495_v1 = vsel %vm1492_vm6, %v1494_v12, %v1490_v19  ;;  %v1481_v23 = vmul.f32 %v2182_v42, %v1480_v60 }
0x1ce2   :  { %v1496_v13 = vmul.f32 %v2184_v63, %v1495_v1 }
0x1ce3   :  { %1499 = vperm.xlu0 %2176, %v1481_v23  }
0x1ce4   :  { %1504 = vperm.xlu1 %2174, %v1496_v13  }
0x1cec   :  { %1568 = vrot.lane.b32.xlu1 %v2968_v3, %s2266_s6 }
0x1cf4   :  { %1591 = vrot.lane.b32.xlu1 %v2968_v3, %s2267_s17 }
0x1d4c   :  { %v1545_v1 = vpop.f32.mrf.mxu1 }
0x1d4d   :  { %v1546_v23 = vadd.f32 %v2610_v40, %v1545_v1 }
0x1d55   :  { %v1500_v26 = vpop.permute.xlu0 %1499 }
0x1d56   :  { %v1505_v27 = vpop.permute.xlu1 %1504  ;;  %v1507_v28 = vmul.f32 %v1500_v26, %v2369_v4  ;;  %v1671_v31 = vperm.slane %v1500_v26, %v2420_v14 }
0x1d57   :  { %v1508_v6 = vmul.f32 %v1505_v27, %v2374_v5  ;;  %v1672_v42 = vperm.slane %v1505_v27, %v2420_v14 }
0x1d58   :  { %v1509_v63 = vsel %vm104_vm0, %v1507_v28, 0.0 }
0x1d59   :  { %v1516_v7 = vsel %vm104_vm0, %v1508_v6, 0.0  ;;  %v1510_v8 = vrot.slane %v1509_v63, 4  ;;  %v1673_v9 = vsel %vm208_vm1, %v1672_v42, %v1671_v31 }
0x1d5a   :  { %v1517_v3 = vrot.slane %v1516_v7, 4  ;;  %v1675_v55 = vsel %vm461_vm12, %v1673_v9, 0.0 }
0x1d5b   :  { %v1511_v43 = vadd.f32 %v1510_v8, %v1509_v63  ;;  %v1677_v57 = vrot.slane %v1675_v55, 1  ;;  %1679 = vst [vmem:[%s3191_s13 + $0x4] sm:$0x1] %v1675_v55 }
0x1d5c   :  { %v1518_v38 = vadd.f32 %v1517_v3, %v1516_v7 }
0x1d5d   :  { %v1512_v59 = vrot.slane %v1511_v43, 2  ;;  %1680 = vst [vmem:[%s3191_s13 + $0xc] sm:$0x1] %v1677_v57 }
0x1d5e   :  { %v1519_v32 = vrot.slane %v1518_v38, 2  ;;  %v1569_v25 = vpop.permute.xlu1 %1568 }
0x1d5f   :  { %v1513_v41 = vadd.f32 %v1512_v59, %v1511_v43 }
0x1d60   :  { %v1520_v50 = vadd.f32 %v1519_v32, %v1518_v38 }
0x1d61   :  { %v1514_v2 = vrot.slane %v1513_v41, 1 }
0x1d62   :  { %v1521_v12 = vrot.slane %v1520_v50, 1 }
0x1d63   :  { %v1515_v18 = vadd.f32 %v1514_v2, %v1513_v41 }
0x1d64   :  { %v1522_v19 = vadd.f32 %v1521_v12, %v1520_v50 }
0x1d66   :  { %v1525_v60 = vsel %vm208_vm1, %v1522_v19, %v1515_v18  ;;  %v1592_v43 = vpop.permute.xlu1 %1591 }
0x1d67   :  { %2040 = vmatmul.msk.f32.vlgmr.msrb.gmra.mxu2 %vm104_vm0, %v1525_v60 }
0x1dea   :  { %v1565_v13 = vpop.f32.mrf.mxu2 }
0x1deb   :  { %v1566_v26 = vadd.f32 %v1565_v13, %v1546_v23 }
0x1ded   :  { %v1571_v27 = vadd.f32 %v1569_v25, %v1566_v26 }
0x1def   :  { %v2041_v28 = vmul.f32 -1.442695, %v1571_v27 }
0x1df1   :  { %2189 = vpow2.f32 %v2041_v28 }
0x1df7   :  { %v2190_v31 = vpop.eup %2189 }
0x1df8   :  { %v1575_v6 = vadd.f32 1.0, %v2190_v31 }
0x1dfa   :  { %2191 = vrcp.f32 %v1575_v6  ;;  %v1587_v8 = vand.u32 2147483648, %v1575_v6  ;;  %v1585_v3 = vand.u32 2147483647, %v1575_v6  ;;  %vm1581_vm8 = vweird.f32 %v1575_v6 }
0x1dfc   :  { %v1588_v57 = vor.u32 1.1754944e-38, %v1587_v8  ;;  %vm1586_vm10 = vcmp.eq.f32.partialorder %v1585_v3, 8.507059e+37 }
0x1e00   :  { %v2192_v42 = vpop.eup %2191 }
0x1e01   :  { %v1577_v63 = vmul.f32 %v2192_v42, %v1575_v6  ;;  %vm1582_vm7 = vweird.f32 %v2192_v42 }
0x1e02   :  { %vm1583_vm9 = vmor %vm1581_vm8, %vm1582_vm7 }
0x1e03   :  { %v1578_v7 = vsub.f32 1.0, %v1577_v63 }
0x1e05   :  { %v1579_v9 = vmul.f32 %v2192_v42, %v1578_v7 }
0x1e07   :  { %v1580_v55 = vadd.f32 %v2192_v42, %v1579_v9 }
0x1e09   :  { %v1584_v38 = vsel %vm1583_vm9, %v2192_v42, %v1580_v55 }
0x1e0a   :  { %v1589_v59 = vsel %vm1586_vm10, %v1588_v57, %v1584_v38 }
0x1e0b   :  { %v1594_v32 = vmul.f32 %v1592_v43, %v1589_v59  ;;  %v1601_v12 = vsub.f32 1.0, %v1589_v59  ;;  %v1607_v60 = vmul.f32 %v1589_v59, %v2960_v56 }
0x1e0d   :  { %1596 = vrot.lane.b32.xlu2 %v1594_v32, %s2269_s8 }
0x1e67   :  { %v1597_v41 = vpop.permute.xlu2 %1596 }
0x1e68   :  { %v1599_v50 = vadd.f32 %v1597_v41, %v1566_v26 }
0x1e6a   :  { %2193 = vtanh.f32 %v1599_v50 }
0x1e70   :  { %v2194_v2 = vpop.eup %2193 }
0x1e71   :  { %1603 = vrot.lane.b32.xlu0 %v2194_v2, %s2266_s6 }
0x1ee3   :  { %v1604_v18 = vpop.permute.xlu0 %1603 }
0x1ee4   :  { %v1606_v19 = vmul.f32 %v1604_v18, %v1601_v12 }
0x1ee6   :  { %v3064_v1 = vadd.f32 %v1607_v60, %v1606_v19 }
0x1ee8   :  { %1610 = vrot.lane.b32.xlu1 %v3064_v1, %s2266_s6 }
0x1f5a   :  { %v1611_v23 = vpop.permute.xlu1 %1610 }
0x1f5b   :  { %2042 = vmatmul.msk.f32.vlgmr.msrb.gmra.mxu0 %vm104_vm0, %v1611_v23  ;;  %2043 = vmatmul.msk.f32.vlgmr.msra.gmra.mxu2 %vm104_vm0, %v1611_v23 }
0x1fd8   :  { %v1631_v13 = vpop.f32.mrf.mxu0 }
0x1fd9   :  { %v1632_v25 = vadd.f32 %v1631_v13, %v2646_v58 }
0x1fdb   :  { %v1654_v26 = vsel %vm439_vm4, %v1632_v25, -inf }
0x1fdc   :  { %1655 = vmax.xlane.f32.xlu0 %v1654_v26 }
0x1fde   :  { %v1651_v27 = vpop.f32.mrf.mxu2 }
0x1fdf   :  { %v3073_v28 = vadd.f32 %v1651_v27, %v2425_v16 }
0x204f   :  { %v1656_v56 = vpop.xlane.xlu0 %1655 }
0x2050   :  { %v1657_v31 = vsub.f32 %v1632_v25, %v1656_v56 }
0x2052   :  { %v1658_v6 = vmul.f32 1.442695, %v1657_v31 }
0x2054   :  { %2195 = vpow2.f32 %v1658_v6 }
0x205a   :  { %v2196_v42 = vpop.eup %2195 }
0x205b   :  { %v1660_v63 = vsel %vm439_vm4, %v2196_v42, 0.0 }
0x205c   :  { %1661 = vadd.xlane.f32.xlu1 %v1660_v63 }
0x20cf   :  { %v1662_v7 = vpop.xlane.xlu1 %1661 }
0x20d0   :  { %2197 = vlog2.f32 %v1662_v7 }
0x20d6   :  { %v2198_v8 = vpop.eup %2197 }
0x20d7   :  { %v1664_v9 = vmul.f32 0.6931472, %v2198_v8 }
0x20d9   :  { %v1665_v3 = vsub.f32 %v1657_v31, %v1664_v9  ;;  %1683 = sbr.rel (%p2001_p0) target bundleno = 8420 (0x20e4), region = 85 }
0x20db   :  { %v1667_v55 = vrot.slane %v1665_v3, 1  ;;  %1669 = vst [vmem:[%s3189_s11 + $0x4] sm:$0x1] %v1665_v3 }
0x20dd   :  { %1670 = vst [vmem:[%s3189_s11 + $0xc] sm:$0x1] %v1667_v55 }
0x20de   :  { %vm1685_vm11 = vcmp.eq.s32.totalorder %v2422_v15, 0  ;;  %v1686_v16 = vstv %s2045_s18  ;;  %vm1692_vm14 = vcmp.eq.s32.totalorder %v2422_v15, 1  ;;  %v1693_v43 = vstv %s2047_s19 }
0x20df   :  { %vm1687_vm13 = vcmp.eq.s32.totalorder %v2420_v14, %v1686_v16  ;;  %v2278_v57 = vmov 0.0   ;;  %vm1694_vm15 = vcmp.eq.s32.totalorder %v2420_v14, %v1693_v43 }
0x20e0   :  { %v2046_v38 = vsel %vm1687_vm13, 1.0, %v2278_v57  ;;  %v2048_v32 = vsel %vm1694_vm15, 1.0, %v2278_v57 }
0x20e1   :  { %v1690_v59 = vsel %vm1685_vm11, %v2046_v38, 0.0 }
0x20e2   :  { %v1697_v41 = vsel %vm1692_vm14, %v2048_v32, %v1690_v59 }
0x20e3   :  { %1698 = vst [vmem:[#allocation2] sm:$0x3] %v1697_v41 }
0x20e4 PF:  { %1701 = sbr.rel (%p2005_p1) target bundleno = 8547 (0x2163), region = 89 }
0x20e9   :  { %vm1702_vm3 = vcmp.eq.f32.partialorder %v1632_v25, %v1656_v56  ;;  %v2279_v12 = vmov 0.0  }
0x20ea   :  { %v1703_v50 = vsel %vm1702_vm3, %v2428_v17, 128.0 }
0x20eb   :  { %v1704_v15 = vsel %vm439_vm4, %v1703_v50, inf }
0x20ec   :  { %1705 = vmin.xlane.f32.xlu0 %v1704_v15 }
0x215f   :  { %v1706_v2 = vpop.xlane.xlu0 %1705 }
0x2160   :  { %vm1707_vm5 = vcmp.eq.f32.partialorder %v2428_v17, %v1706_v2 }
0x2161   :  { %v2050_v18 = vsel %vm1707_vm5, 1.0, %v2279_v12 }
0x2162   :  { %1710 = vst [vmem:[#allocation2] sm:$0x3] %v2050_v18 }
0x2163 PF:  { %v1714_v19 = vperm.slane %v3073_v28, 0  ;;  %v1713_v60 = vrot.slane %v3073_v28, 1  ;;  %v3200_v23 = vmov 0   ;;  %1831 = vmatpush.msra.mxu0 %v2467_v61  ;;  %1863 = vmatpush.msrb.mxu2 %v2570_v51  ;;  %vm1965_vm3 = vcmask 254976   ;;  %s1976_s24 = sshll.u32 %s3190_s12, 4  ;;  %s1977_s24 = int_to_ptr.hbm [resolvable:$true] %s1976_s24 }
0x2164   :  { %2200 = vset.pattern.permute.xlu2 %v3200_v23  ;;  %2199 = vset.pattern.permute.xlu1 %v3200_v23 }
0x2165   :  { %2201 = vset.pattern.permute.xlu0 %v3200_v23  ;;  %v1718_v13 = vadd.f32 %v1714_v19, %v2436_v22  ;;  %v1715_v25 = vperm.slane %v1713_v60, 0  ;;  %1929 = vmatpush.msra.mxu3 %v2618_v33 }
0x2166   :  { %1832 = vmatpush.msra.mxu0 %v2472_v62  ;;  %1864 = vmatpush.msrb.mxu2 %v2576_v52 }
0x2167   :  { %2202 = vtanh.f32 %v1718_v13  ;;  %v1719_v17 = vadd.f32 %v1715_v25, %v2439_v24  ;;  %1930 = vmatpush.msra.mxu3 %v2623_v35 }
0x2168   :  { %1833 = vmatpush.msra.mxu0 %v2478_v0  ;;  %1865 = vmatpush.msrb.mxu2 %v2582_v53 }
0x2169   :  { %2204 = vtanh.f32 %v1719_v17  ;;  %1931 = vmatpush.msra.mxu3 %v2629_v36  ;;  %v1711_v60 = vld [vmem:[#allocation2] sm:$0x3] }
0x216a   :  { %1834 = vmatpush.msra.mxu0 %v2484_v11  ;;  %1866 = vmatpush.msrb.mxu2 %v2587_v54 }
0x216b   :  { %1932 = vmatpush.msra.mxu3 %v2635_v37 }
0x216c   :  { %1835 = vmatpush.msra.mxu0 %v2490_v20 }
0x216d   :  { %v2203_v22 = vpop.eup %2202 }
0x216e   :  { %v1722_v24 = vmul.f32 %v2203_v22, %v2447_v29  ;;  %1836 = vmatpush.msra.mxu0 %v2496_v30 }
0x216f   :  { %v2205_v61 = vpop.eup %2204 }
0x2170   :  { %v1724_v62 = vsel %vm104_vm0, %v1722_v24, 0.0  ;;  %1837 = vmatpush.msra.mxu0 %v2502_v34  ;;  %v1723_v0 = vmul.f32 %v2205_v61, %v2447_v29 }
0x2171   :  { %1725 = vadd.xlane.f32.xlu0 %v1724_v62 }
0x2172   :  { %1838 = vmatpush.msra.mxu0 %v2508_v39  ;;  %v1727_v11 = vsel %vm104_vm0, %v1723_v0, 0.0 }
0x2174   :  { %1839 = vmatpush.msra.mxu0 %v2514_v44 }
0x2176   :  { %1840 = vmatpush.msra.mxu0 %v2520_v45 }
0x2178   :  { %1841 = vmatpush.msra.mxu0 %v2526_v46 }
0x2179   :  { %1728 = vadd.xlane.f32.xlu0 %v1727_v11 }
0x217a   :  { %1842 = vmatpush.msra.mxu0 %v2532_v47 }
0x217c   :  { %1843 = vmatpush.msra.mxu0 %v2545_v48 }
0x217e   :  { %1844 = vmatpush.msra.mxu0 %v2551_v49 }
0x2180   :  { %1845 = vmatpush.msra.mxu0 %v2557_v21 }
0x2182   :  { %1846 = vmatpush.msra.mxu0 %v2563_v10 }
0x2183   :  { %1847 = vmatmul.f32.vlgmr.msra.gmra.mxu0 %v1711_v60 }
0x21e4   :  { %v1726_v29 = vpop.xlane.xlu0 %1725 }
0x21e5   :  { %v1732_v30 = vperm.slane %v1726_v29, %v2420_v14 }
0x21ec   :  { %v1729_v20 = vpop.xlane.xlu0 %1728 }
0x21ed   :  { %v1733_v34 = vperm.slane %v1729_v20, %v2420_v14 }
0x21ef   :  { %v1734_v39 = vsel %vm208_vm1, %v1733_v34, %v1732_v30 }
0x21f0   :  { %v1736_v44 = vsel %vm211_vm2, %v1734_v39, -inf }
0x21f1   :  { %1737 = vmax.xlane.f32.xlu1 %v1736_v44 }
0x2264   :  { %v1738_v45 = vpop.xlane.xlu1 %1737 }
0x2265   :  { %v1740_v46 = vperm.slane %v1738_v45, 0  ;;  %v1741_v47 = vperm.slane %v1738_v45, 1 }
0x2267   :  { %v1744_v48 = vsub.f32 %v1726_v29, %v1740_v46  ;;  %v1745_v49 = vsub.f32 %v1729_v20, %v1741_v47 }
0x2269   :  { %v1746_v51 = vmul.f32 1.442695, %v1744_v48  ;;  %v1748_v21 = vmul.f32 1.442695, %v1745_v49  ;;  %v1848_v49 = vpop.f32.mrf.mxu0 }
0x226b   :  { %2206 = vpow2.f32 %v1746_v51  ;;  %v1849_v51 = vadd.f32 %v2610_v40, %v1848_v49 }
0x226c   :  { %2208 = vpow2.f32 %v1748_v21 }
0x2271   :  { %v2207_v10 = vpop.eup %2206 }
0x2272   :  { %v2209_v52 = vpop.eup %2208  ;;  %1753 = vperm.xlu1 %2199, %v2207_v10  }
0x2273   :  { %1756 = vperm.xlu2 %2200, %v2209_v52  }
0x22cd   :  { %v1757_v53 = vpop.permute.xlu2 %1756 }
0x22ce   :  { %v1759_v33 = vperm.slane %v1757_v53, %v2420_v14 }
0x22e4   :  { %v1754_v54 = vpop.permute.xlu1 %1753 }
0x22e5   :  { %v1758_v35 = vperm.slane %v1754_v54, %v2420_v14 }
0x22e7   :  { %v1760_v36 = vsel %vm208_vm1, %v1759_v33, %v1758_v35 }
0x22e8   :  { %v1762_v37 = vsel %vm211_vm2, %v1760_v36, 0.0 }
0x22e9   :  { %1763 = vadd.xlane.f32.xlu2 %v1762_v37 }
0x235c   :  { %v1764_v26 = vpop.xlane.xlu2 %1763 }
0x235d   :  { %v1766_v27 = vperm.slane %v1764_v26, 0  ;;  %v1767_v56 = vperm.slane %v1764_v26, 1 }
0x235f   :  { %2210 = vrcp.f32 %v1766_v27  ;;  %v1781_v9 = vand.u32 2147483648, %v1766_v27  ;;  %v1796_v3 = vand.u32 2147483648, %v1767_v56  ;;  %v1779_v16 = vand.u32 2147483647, %v1766_v27 }
0x2360   :  { %2212 = vrcp.f32 %v1767_v56  ;;  %v1794_v57 = vand.u32 2147483647, %v1767_v56  ;;  %vm1775_vm2 = vweird.f32 %v1766_v27  ;;  %vm1790_vm8 = vweird.f32 %v1767_v56 }
0x2361   :  { %v1782_v32 = vor.u32 1.1754944e-38, %v1781_v9  ;;  %v1797_v41 = vor.u32 1.1754944e-38, %v1796_v3  ;;  %vm1780_vm11 = vcmp.eq.f32.partialorder %v1779_v16, 8.507059e+37 }
0x2362   :  { %vm1795_vm13 = vcmp.eq.f32.partialorder %v1794_v57, 8.507059e+37 }
0x2365   :  { %v2211_v31 = vpop.eup %2210 }
0x2366   :  { %v2213_v6 = vpop.eup %2212  ;;  %v1771_v42 = vmul.f32 %v2211_v31, %v1766_v27  ;;  %vm1776_vm6 = vweird.f32 %v2211_v31 }
0x2367   :  { %v1786_v63 = vmul.f32 %v2213_v6, %v1767_v56  ;;  %vm1791_vm7 = vweird.f32 %v2213_v6  ;;  %vm1777_vm9 = vmor %vm1775_vm2, %vm1776_vm6 }
0x2368   :  { %v1772_v7 = vsub.f32 1.0, %v1771_v42  ;;  %vm1792_vm10 = vmor %vm1790_vm8, %vm1791_vm7 }
0x2369   :  { %v1787_v8 = vsub.f32 1.0, %v1786_v63 }
0x236a   :  { %v1773_v55 = vmul.f32 %v2211_v31, %v1772_v7 }
0x236b   :  { %v1788_v43 = vmul.f32 %v2213_v6, %v1787_v8 }
0x236c   :  { %v1774_v38 = vadd.f32 %v2211_v31, %v1773_v55 }
0x236d   :  { %v1789_v59 = vadd.f32 %v2213_v6, %v1788_v43 }
0x236e   :  { %v1778_v50 = vsel %vm1777_vm9, %v2211_v31, %v1774_v38 }
0x236f   :  { %v1793_v15 = vsel %vm1792_vm10, %v2213_v6, %v1789_v59  ;;  %v1783_v2 = vsel %vm1780_vm11, %v1782_v32, %v1778_v50 }
0x2370   :  { %v1798_v12 = vsel %vm1795_vm13, %v1797_v41, %v1793_v15  ;;  %v1784_v18 = vmul.f32 %v2207_v10, %v1783_v2 }
0x2371   :  { %v1799_v19 = vmul.f32 %v2209_v52, %v1798_v12 }
0x2372   :  { %1802 = vperm.xlu0 %2201, %v1784_v18  }
0x2373   :  { %1807 = vperm.xlu1 %2199, %v1799_v19  }
0x237b   :  { %1871 = vrot.lane.b32.xlu1 %v3073_v28, %s2266_s6 }
0x2383   :  { %1894 = vrot.lane.b32.xlu1 %v3073_v28, %s2267_s17 }
0x23e4   :  { %v1803_v23 = vpop.permute.xlu0 %1802 }
0x23e5   :  { %v1808_v13 = vpop.permute.xlu1 %1807  ;;  %v1810_v25 = vmul.f32 %v1803_v23, %v2369_v4  ;;  %v1954_v17 = vperm.slane %v1803_v23, %v2420_v14 }
0x23e6   :  { %v1811_v22 = vmul.f32 %v1808_v13, %v2374_v5  ;;  %v1955_v24 = vperm.slane %v1808_v13, %v2420_v14 }
0x23e7   :  { %v1812_v61 = vsel %vm104_vm0, %v1810_v25, 0.0 }
0x23e8   :  { %v1819_v62 = vsel %vm104_vm0, %v1811_v22, 0.0  ;;  %v1813_v0 = vrot.slane %v1812_v61, 4  ;;  %v1956_v11 = vsel %vm208_vm1, %v1955_v24, %v1954_v17 }
0x23e9   :  { %v1820_v28 = vrot.slane %v1819_v62, 4  ;;  %v1958_v29 = vsel %vm461_vm12, %v1956_v11, 0.0 }
0x23ea   :  { %v1814_v20 = vadd.f32 %v1813_v0, %v1812_v61  ;;  %v1960_v30 = vrot.slane %v1958_v29, 1  ;;  %1962 = vst [vmem:[%s3191_s13 + $0x5] sm:$0x1] %v1958_v29 }
0x23eb   :  { %v1821_v4 = vadd.f32 %v1820_v28, %v1819_v62 }
0x23ec   :  { %v1815_v5 = vrot.slane %v1814_v20, 2  ;;  %1963 = vst [vmem:[%s3191_s13 + $0xd] sm:$0x1] %v1960_v30  ;;  %s2280_s13 = smov [#allocation7]  }
0x23ed   :  { %v1822_v14 = vrot.slane %v1821_v4, 2  ;;  %v1872_v10 = vpop.permute.xlu1 %1871 }
0x23ee   :  { %v1816_v34 = vadd.f32 %v1815_v5, %v1814_v20 }
0x23ef   :  { %v1823_v39 = vadd.f32 %v1822_v14, %v1821_v4 }
0x23f0   :  { %v1817_v44 = vrot.slane %v1816_v34, 1 }
0x23f1   :  { %v1824_v45 = vrot.slane %v1823_v39, 1 }
0x23f2   :  { %v1818_v46 = vadd.f32 %v1817_v44, %v1816_v34 }
0x23f3   :  { %v1825_v47 = vadd.f32 %v1824_v45, %v1823_v39 }
0x23f5   :  { %v1828_v48 = vsel %vm208_vm1, %v1825_v47, %v1818_v46  ;;  %v1895_v42 = vpop.permute.xlu1 %1894 }
0x23f6   :  { %2051 = vmatmul.msk.f32.vlgmr.msrb.gmra.mxu2 %vm104_vm0, %v1828_v48 }
0x2479   :  { %v1868_v21 = vpop.f32.mrf.mxu2 }
0x247a   :  { %v1869_v52 = vadd.f32 %v1868_v21, %v1849_v51 }
0x247c   :  { %v1874_v53 = vadd.f32 %v1872_v10, %v1869_v52 }
0x247e   :  { %v2052_v54 = vmul.f32 -1.442695, %v1874_v53 }
0x2480   :  { %2214 = vpow2.f32 %v2052_v54 }
0x2486   :  { %v2215_v33 = vpop.eup %2214 }
0x2487   :  { %v1878_v35 = vadd.f32 1.0, %v2215_v33 }
0x2489   :  { %2216 = vrcp.f32 %v1878_v35  ;;  %v1890_v27 = vand.u32 2147483648, %v1878_v35  ;;  %v1888_v31 = vand.u32 2147483647, %v1878_v35  ;;  %vm1884_vm12 = vweird.f32 %v1878_v35 }
0x248b   :  { %v1891_v40 = vor.u32 1.1754944e-38, %v1890_v27  ;;  %vm1889_vm15 = vcmp.eq.f32.partialorder %v1888_v31, 8.507059e+37 }
0x248f   :  { %v2217_v36 = vpop.eup %2216 }
0x2490   :  { %v1880_v37 = vmul.f32 %v2217_v36, %v1878_v35  ;;  %vm1885_vm1 = vweird.f32 %v2217_v36 }
0x2491   :  { %vm1886_vm14 = vmor %vm1884_vm12, %vm1885_vm1 }
0x2492   :  { %v1881_v26 = vsub.f32 1.0, %v1880_v37 }
0x2494   :  { %v1882_v56 = vmul.f32 %v2217_v36, %v1881_v26 }
0x2496   :  { %v1883_v6 = vadd.f32 %v2217_v36, %v1882_v56 }
0x2498   :  { %v1887_v63 = vsel %vm1886_vm14, %v2217_v36, %v1883_v6 }
0x2499   :  { %v1892_v7 = vsel %vm1889_vm15, %v1891_v40, %v1887_v63 }
0x249a   :  { %v1897_v8 = vmul.f32 %v1895_v42, %v1892_v7  ;;  %v1904_v16 = vsub.f32 1.0, %v1892_v7  ;;  %v1910_v38 = vmul.f32 %v1892_v7, %v3064_v1 }
0x249c   :  { %1899 = vrot.lane.b32.xlu2 %v1897_v8, %s2269_s8 }
0x24f6   :  { %v1900_v9 = vpop.permute.xlu2 %1899 }
0x24f7   :  { %v1902_v3 = vadd.f32 %v1900_v9, %v1869_v52 }
0x24f9   :  { %2218 = vtanh.f32 %v1902_v3 }
0x24ff   :  { %v2219_v55 = vpop.eup %2218 }
0x2500   :  { %1906 = vrot.lane.b32.xlu0 %v2219_v55, %s2266_s6 }
0x2572   :  { %v1907_v43 = vpop.permute.xlu0 %1906 }
0x2573   :  { %v1909_v57 = vmul.f32 %v1907_v43, %v1904_v16 }
0x2575   :  { %v1911_v59 = vadd.f32 %v1910_v38, %v1909_v57 }
0x2577   :  { %1913 = vrot.lane.b32.xlu1 %v1911_v59, %s2266_s6  ;;  %s1974_s6 = sshll.u32 %s2280_s13, 4  ;;  %s1975_s6 = int_to_ptr.vmem [resolvable:$true] %s1974_s6 }
0x25e9   :  { %v1914_v32 = vpop.permute.xlu1 %1913 }
0x25ea   :  { %2053 = vmatmul.msk.f32.vlgmr.msra.gmra.mxu3 %vm104_vm0, %v1914_v32  ;;  %1966 = vst.msk [vmem:[#allocation7] sm:$0x3] %vm1965_vm3, %v1914_v32 }
0x25eb   :  { %1979 = dma.vmem_to_hbm [thread:$0]  %s1975_s6, 32, %s1977_s24, [#allocation5]  }
0x266d   :  { %v1934_v41 = vpop.f32.mrf.mxu3 }
0x266e   :  { %v1935_v50 = vadd.f32 %v1934_v41, %v2646_v58 }
0x2670   :  { %v1937_v15 = vsel %vm439_vm4, %v1935_v50, -inf }
0x2671   :  { %1938 = vmax.xlane.f32.xlu0 %v1937_v15 }
0x26e4   :  { %v1939_v2 = vpop.xlane.xlu0 %1938 }
0x26e5   :  { %v1940_v12 = vsub.f32 %v1935_v50, %v1939_v2 }
0x26e7   :  { %v1941_v18 = vmul.f32 1.442695, %v1940_v12 }
0x26e9   :  { %2220 = vpow2.f32 %v1941_v18 }
0x26ef   :  { %v2221_v19 = vpop.eup %2220 }
0x26f0   :  { %v1943_v1 = vsel %vm439_vm4, %v2221_v19, 0.0 }
0x26f1   :  { %1944 = vadd.xlane.f32.xlu1 %v1943_v1 }
0x2764   :  { %v1945_v58 = vpop.xlane.xlu1 %1944 }
0x2765   :  { %2222 = vlog2.f32 %v1945_v58 }
0x276b   :  { %v2223_v60 = vpop.eup %2222 }
0x276c   :  { %v1947_v23 = vmul.f32 0.6931472, %v2223_v60 }
0x276e   :  { %v1948_v13 = vsub.f32 %v1940_v12, %v1947_v23 }
0x2770   :  { %v1950_v25 = vrot.slane %v1948_v13, 1  ;;  %1952 = vst [vmem:[%s3189_s11 + $0x5] sm:$0x1] %v1948_v13 }
0x2772   :  { %1953 = vst [vmem:[%s3189_s11 + $0xd] sm:$0x1] %v1950_v25 }
0x2773   :  { %2262 = dma.done.wait [#allocation5], 32  }
0x2774   :  { %2263 = vsyncadd [#allocation5], 4294967264 }
0x2775   :  { %1990 = vsyncpa [#allocation5], 1 }
0x2776   :  { %1991 = vsyncpa [#allocation6], 1 }

</bundles_post_ra>
